<compile_context>
chip_gen: v7x
topology: tpu7x:2x2x1
jax: 0.10.0
libtpu: 0.0.40
codegen_flags: <defaults>
</compile_context>

<pallas_src>
import functools

import numpy as np
import jax
import jax.numpy as jnp
from jax.experimental import pallas as pl
from jax.experimental.pallas import tpu as pltpu

# ---- deterministic "module init" constants (matches Dice_FL defaults) ------
LABELS = [0, 1, 2, 3]          # config['PARAMETERS']['labels'] stand-in
GAMMA = 2                      # focal gamma (== 2 -> explicit square in-kernel)
ALPHA = 0.25                   # FocalLoss._alpha (hardcoded in reference)
EPSILON = 1e-5                 # dice epsilon
IGNORE_INDEX = None            # default -> all channels participate

_LANES = 128                   # lane width of a vreg
_ROW_GRAIN = 256               # in-kernel chunk: rows of 128 voxels per step
_ACC_ROWS = 32                 # sublane rows kept resident per accumulator
_MAX_ROWS = 2048               # <= 2048*128 = 256K voxels per grid step
_LOG_CLAMP = 1e-30             # guards log(0) (padding & fp underflow)


def _vmem_capacity_bytes():
    """Trace-time VMEM capacity; conservative default if the query fails."""
    try:
        return int(pltpu.get_tpu_info().vmem_capacity_bytes)
    except Exception:
        return 64 * 1024 * 1024   # v7x per-TC physical VMEM (smallest gen)


def _pick_rows(S, C):
    """Rows (of 128 voxels) per spatial tile: largest multiple of _ROW_GRAIN
    that keeps double-buffered (f32 logits + int8 targets) well inside VMEM."""
    budget = _vmem_capacity_bytes() // 6
    bytes_per_row = 2 * _LANES * (C * 4 + 1)      # 2 bufs x (C f32 + 1 int8)
    rows = (budget // bytes_per_row) // _ROW_GRAIN * _ROW_GRAIN
    rows = max(_ROW_GRAIN, min(_MAX_ROWS, rows))
    rows_needed = -(-S // _LANES)                 # ceil(S / 128)
    rows_needed = -(-rows_needed // _ROW_GRAIN) * _ROW_GRAIN
    return min(rows, rows_needed)                 # don't over-pad small problems


def _fold_rows(a):
    """(rows, 128) -> (_ACC_ROWS, 128): balanced tree of vreg-block adds.

    Pure VPU; defers the cross-lane / cross-sublane reduction out of the hot
    loop. The final (32, 128) -> scalar sum is done once in the wrapper on a
    tiny (N, C, 32, 128) array.
    """
    rows = a.shape[0]
    chunks = [a[j * _ACC_ROWS:(j + 1) * _ACC_ROWS, :]
              for j in range(rows // _ACC_ROWS)]
    while len(chunks) > 1:
        nxt = [chunks[i] + chunks[i + 1] for i in range(0, len(chunks) - 1, 2)]
        if len(chunks) % 2:
            nxt.append(chunks[-1])
        chunks = nxt
    return chunks[0]


def _dice_fl_kernel(x_ref, t_ref, inter_ref, denom_ref, focal_ref, *, C, rows):
    """Per-batch partial reductions over one spatial tile.

    x_ref:  (1, C, rows, 128) float32 logits tile.
    t_ref:  (1, 1, rows, 128) int8 label tile (pad value -1 matches no channel).
    inter_ref / denom_ref / focal_ref: (1, C, 32, 128) accumulators, resident
    across the spatial (reduction) grid axis.
    """
    k = pl.program_id(1)

    @pl.when(k == 0)
    def _():
        inter_ref[...] = jnp.zeros_like(inter_ref)
        denom_ref[...] = jnp.zeros_like(denom_ref)
        focal_ref[...] = jnp.zeros_like(focal_ref)

    cr = min(_ROW_GRAIN, rows)
    n_chunks = rows // cr

    zero = jnp.zeros((_ACC_ROWS, _LANES), jnp.float32)
    inter_acc = [zero] * C
    denom_acc = [zero] * C
    focal_acc = [zero] * C

    # Process the (large) resident tile in small row-chunks so live VMEM
    # temporaries stay bounded while grid-step overhead stays amortized.
    for j in range(n_chunks):
        r0 = j * cr
        tgt = t_ref[0, 0, r0:r0 + cr, :].astype(jnp.int32)        # (cr, 128)

        onehots = []
        sel = None
        for c in range(C):
            xc = x_ref[0, c, r0:r0 + cr, :]                       # (cr, 128) f32
            oh = (tgt == c).astype(jnp.float32)                   # (cr, 128)
            pr = xc * oh
            sel = pr if sel is None else sel + pr                 # selected prob
            onehots.append(oh)
            inter_acc[c] = inter_acc[c] + _fold_rows(pr)
            denom_acc[c] = denom_acc[c] + _fold_rows(xc + oh)

        # focal inner term once per voxel on the selected probability
        # (GAMMA == 2 -> explicit square, no pow; 4x fewer EUP logs than
        # computing it per channel). Clamp guards padding / fp underflow.
        one_minus = 1.0 - sel
        g = jnp.log(jnp.maximum(sel, _LOG_CLAMP)) * (one_minus * one_minus)

        for c in range(C):
            focal_acc[c] = focal_acc[c] + _fold_rows(onehots[c] * g)

    for c in range(C):
        inter_ref[0, c] += inter_acc[c]
        denom_ref[0, c] += denom_acc[c]
        # unscaled focal partial: sum(t * log(x) * (1-x)^2); -ALPHA applied
        # once at finalization in the wrapper.
        focal_ref[0, c] += focal_acc[c]


def _partial_sums(x4, t4, rows):
    """x4: (N, C, R, 128) f32, t4: (N, 1, R, 128) int8 -> 3x (N, C, 32, 128)."""
    N, C, R_tot, _ = x4.shape
    n_k = R_tot // rows

    kernel = functools.partial(_dice_fl_kernel, C=C, rows=rows)

    acc_shape = jax.ShapeDtypeStruct((N, C, _ACC_ROWS, _LANES), jnp.float32)
    acc_spec = pl.BlockSpec((1, C, _ACC_ROWS, _LANES), lambda b, k: (b, 0, 0, 0))

    tile_bytes = rows * _LANES * (C * 4 + 1)
    vmem_limit = int(min(_vmem_capacity_bytes() * 3 // 4,
                         6 * tile_bytes + (16 << 20)))

    return pl.pallas_call(
        kernel,
        out_shape=(acc_shape, acc_shape, acc_shape),
        grid_spec=pltpu.PrefetchScalarGridSpec(
            num_scalar_prefetch=0,
            grid=(N, n_k),                          # batch parallel, spatial reduce
            in_specs=[
                pl.BlockSpec((1, C, rows, _LANES), lambda b, k: (b, 0, k, 0)),
                pl.BlockSpec((1, 1, rows, _LANES), lambda b, k: (b, 0, k, 0)),
            ],
            out_specs=(acc_spec, acc_spec, acc_spec),
        ),
        compiler_params=pltpu.CompilerParams(
            dimension_semantics=("parallel", "arbitrary"),
            vmem_limit_bytes=vmem_limit,
        ),
    )(x4, t4)


def dice_fl_forward(logits, targets):
    """Dice_FL.forward: logits (N, C, D, H, W) float32, targets (N, D, H, W) int."""
    N, C = logits.shape[0], logits.shape[1]
    S = int(np.prod(logits.shape[2:]))

    x3 = logits.reshape(N, C, S).astype(jnp.float32)

    # to_one_hot glue (functional): remap label 4 -> 3; keep labels as int8
    # (values 0..C-1) — the one-hot itself is built inside the kernel.
    tgt = jnp.where(targets == 4, 3, targets).astype(jnp.int8)
    t3 = tgt.reshape(N, 1, S)

    rows = _pick_rows(S, C)
    TS = rows * _LANES
    S_pad = -(-S // TS) * TS
    if S_pad != S:
        # TODO(synk): padding materializes a copy of the logit stream when S is
        # not a multiple of the tile; pad logits with 0 (no denom contribution)
        # and targets with -1 (no one-hot match -> no inter/focal contribution).
        x3 = jnp.pad(x3, ((0, 0), (0, 0), (0, S_pad - S)))
        t3 = jnp.pad(t3, ((0, 0), (0, 0), (0, S_pad - S)), constant_values=-1)

    x4 = x3.reshape(N, C, S_pad // _LANES, _LANES)
    t4 = t3.reshape(N, 1, S_pad // _LANES, _LANES)

    inter, denom, focal = _partial_sums(x4, t4, rows)
    inter = jnp.sum(inter, axis=(-2, -1))     # (N, C) — single cross-lane reduce
    denom = jnp.sum(denom, axis=(-2, -1))
    focal = jnp.sum(focal, axis=(-2, -1))

    # channel mask for ignore_index (mirrors the PyTorch truthiness behavior:
    # `if not self.ignore_index or i != int(self.ignore_index)`)
    if IGNORE_INDEX is None or IGNORE_INDEX == 0:
        ch_mask = jnp.ones((C,), jnp.float32)
    else:
        ch_mask = (jnp.arange(C) != int(IGNORE_INDEX)).astype(jnp.float32)

    # DiceLoss: sum_c mean_b (1 - 2*inter / (denom + eps))
    dice_score = 2.0 * inter / (denom + EPSILON)          # (N, C)
    dice_per_ch = jnp.mean(1.0 - dice_score, axis=0)      # (C,)
    dl_loss = jnp.sum(dice_per_ch * ch_mask)

    # FocalLoss: -ALPHA applied once here (folded out of the per-element math)
    fl_loss = jnp.sum((-ALPHA) * jnp.sum(focal, axis=0) * ch_mask)

    return dl_loss + fl_loss


def _reference(logits, targets):
    """Pure-numpy reference mirroring the PyTorch forward, for sanity check."""
    logits = np.asarray(logits, np.float32)
    targets = np.asarray(targets)
    targets = np.where(targets == 4, 3, targets)
    N, C = logits.shape[0], logits.shape[1]
    onehot = (targets[:, None] == np.arange(C).reshape(1, C, 1, 1, 1)).astype(np.float32)
    tot = 0.0
    for i in range(C):
        lg = logits[:, i].reshape(N, -1)
        tg = onehot[:, i].reshape(N, -1)
        inter = (lg * tg).sum(-1)
        dice = 2.0 * inter / ((lg + tg).sum(-1) + EPSILON)
        tot += np.mean(1.0 - dice)
    for i in range(C):
        lg = logits[:, i].reshape(N, -1)
        tg = onehot[:, i].reshape(N, -1)
        loss = -tg * np.log(lg)
        loss = ALPHA * loss * (1.0 - lg) ** GAMMA
        tot += loss.sum()
    return np.float32(tot)


if __name__ == "__main__":
    key = jax.random.PRNGKey(0)
    k1, k2 = jax.random.split(key)

    N, C, D, H, W = 2, len(LABELS), 4, 8, 8   # small shapes; S = 256

    # Focal loss takes log(pred): use softmax-normalized "probability logits"
    # (positive, in (0,1)) so the loss is finite — same numerics as the module
    # would see after a softmax head.
    raw = jax.random.normal(k1, (N, C, D, H, W), dtype=jnp.float32)
    logits = jax.nn.softmax(raw, axis=1)
    targets = jax.random.randint(k2, (N, D, H, W), 0, 5, dtype=jnp.int32)  # includes label 4

    out = jax.jit(dice_fl_forward)(logits, targets)
    out = jax.block_until_ready(out)

    ref = _reference(np.asarray(logits), np.asarray(targets))
    np.testing.assert_allclose(np.asarray(out), ref, rtol=1e-4, atol=1e-4)

    print("KERNEL_OK")
</pallas_src>

<mosaic_0001>
module attributes {stable_mosaic.version = 11 : i64} {
  func.func @_dice_fl_kernel(%arg0: i32, %arg1: i32, %arg2: memref<1x4x256x128xf32, #tpu.memory_space<vmem>>, %arg3: memref<1x1x256x128xi8, #tpu.memory_space<vmem>>, %arg4: memref<1x4x32x128xf32, #tpu.memory_space<vmem>>, %arg5: memref<1x4x32x128xf32, #tpu.memory_space<vmem>>, %arg6: memref<1x4x32x128xf32, #tpu.memory_space<vmem>>) attributes {dimension_semantics = [#tpu.dimension_semantics<parallel>, #tpu.dimension_semantics<arbitrary>], iteration_bounds = array<i64: 2, 1>, scalar_prefetch = 0 : i64, scratch_operands = 0 : i64, tpu.core_type = #tpu.core_type<tc>, window_params = [{transform_indices = @transform_0, window_bounds = array<i64: 1, 4, 256, 128>}, {transform_indices = @transform_1, window_bounds = array<i64: 1, 1, 256, 128>}, {transform_indices = @transform_2, window_bounds = array<i64: 1, 4, 32, 128>}, {transform_indices = @transform_3, window_bounds = array<i64: 1, 4, 32, 128>}, {transform_indices = @transform_4, window_bounds = array<i64: 1, 4, 32, 128>}]} {
    %c0_i32 = arith.constant 0 : i32
    %0 = arith.cmpi eq, %arg1, %c0_i32 : i32
    %1 = arith.extui %0 : i1 to i32
    %c0_i32_0 = arith.constant 0 : i32
    %2 = arith.cmpi ne, %1, %c0_i32_0 : i32
    scf.if %2 {
      %cst_116 = arith.constant 0.000000e+00 : f32
      %317 = vector.broadcast %cst_116 : f32 to vector<1x4x32x128xf32>
      %c0_117 = arith.constant 0 : index
      %c0_118 = arith.constant 0 : index
      %c0_119 = arith.constant 0 : index
      %c0_120 = arith.constant 0 : index
      %318 = vector.load %arg4[%c0_117, %c0_118, %c0_119, %c0_120] : memref<1x4x32x128xf32, #tpu.memory_space<vmem>>, vector<1x4x32x128xf32>
      tpu.vector_store %arg4[%c0_117, %c0_118, %c0_119, %c0_120], %317 {strides = array<i32>} : memref<1x4x32x128xf32, #tpu.memory_space<vmem>>, vector<1x4x32x128xf32>,
      %cst_121 = arith.constant 0.000000e+00 : f32
      %319 = vector.broadcast %cst_121 : f32 to vector<1x4x32x128xf32>
      %c0_122 = arith.constant 0 : index
      %c0_123 = arith.constant 0 : index
      %c0_124 = arith.constant 0 : index
      %c0_125 = arith.constant 0 : index
      %320 = vector.load %arg5[%c0_122, %c0_123, %c0_124, %c0_125] : memref<1x4x32x128xf32, #tpu.memory_space<vmem>>, vector<1x4x32x128xf32>
      tpu.vector_store %arg5[%c0_122, %c0_123, %c0_124, %c0_125], %319 {strides = array<i32>} : memref<1x4x32x128xf32, #tpu.memory_space<vmem>>, vector<1x4x32x128xf32>,
      %cst_126 = arith.constant 0.000000e+00 : f32
      %321 = vector.broadcast %cst_126 : f32 to vector<1x4x32x128xf32>
      %c0_127 = arith.constant 0 : index
      %c0_128 = arith.constant 0 : index
      %c0_129 = arith.constant 0 : index
      %c0_130 = arith.constant 0 : index
      %322 = vector.load %arg6[%c0_127, %c0_128, %c0_129, %c0_130] : memref<1x4x32x128xf32, #tpu.memory_space<vmem>>, vector<1x4x32x128xf32>
      tpu.vector_store %arg6[%c0_127, %c0_128, %c0_129, %c0_130], %321 {strides = array<i32>} : memref<1x4x32x128xf32, #tpu.memory_space<vmem>>, vector<1x4x32x128xf32>,
    } else {
    }
    %cst = arith.constant 0.000000e+00 : f32
    %3 = vector.broadcast %cst : f32 to vector<32x128xf32>
    %c0 = arith.constant 0 : index
    %c0_1 = arith.constant 0 : index
    %c0_2 = arith.constant 0 : index
    %c0_3 = arith.constant 0 : index
    %4 = vector.load %arg3[%c0, %c0_1, %c0_2, %c0_3] : memref<1x1x256x128xi8, #tpu.memory_space<vmem>>, vector<1x1x256x128xi8>
    %5 = vector.shape_cast %4 : vector<1x1x256x128xi8> to vector<256x128xi8>
    %6 = arith.extsi %5 : vector<256x128xi8> to vector<256x128xi32>
    %c0_4 = arith.constant 0 : index
    %c0_5 = arith.constant 0 : index
    %c0_6 = arith.constant 0 : index
    %c0_7 = arith.constant 0 : index
    %7 = vector.load %arg2[%c0_4, %c0_5, %c0_6, %c0_7] : memref<1x4x256x128xf32, #tpu.memory_space<vmem>>, vector<1x1x256x128xf32>
    %8 = vector.shape_cast %7 : vector<1x1x256x128xf32> to vector<256x128xf32>
    %c0_i32_8 = arith.constant 0 : i32
    %9 = vector.broadcast %c0_i32_8 : i32 to vector<256x128xi32>
    %10 = arith.cmpi eq, %6, %9 : vector<256x128xi32>
    %11 = arith.extui %10 : vector<256x128xi1> to vector<256x128xi32>
    %12 = arith.sitofp %11 : vector<256x128xi32> to vector<256x128xf32>
    %13 = arith.mulf %8, %12 : vector<256x128xf32>
    %14 = vector.extract_strided_slice %13 {offsets = [0, 0], sizes = [32, 128], strides = [1, 1]} : vector<256x128xf32> to vector<32x128xf32>
    %15 = vector.extract_strided_slice %13 {offsets = [32, 0], sizes = [32, 128], strides = [1, 1]} : vector<256x128xf32> to vector<32x128xf32>
    %16 = vector.extract_strided_slice %13 {offsets = [64, 0], sizes = [32, 128], strides = [1, 1]} : vector<256x128xf32> to vector<32x128xf32>
    %17 = vector.extract_strided_slice %13 {offsets = [96, 0], sizes = [32, 128], strides = [1, 1]} : vector<256x128xf32> to vector<32x128xf32>
    %18 = vector.extract_strided_slice %13 {offsets = [128, 0], sizes = [32, 128], strides = [1, 1]} : vector<256x128xf32> to vector<32x128xf32>
    %19 = vector.extract_strided_slice %13 {offsets = [160, 0], sizes = [32, 128], strides = [1, 1]} : vector<256x128xf32> to vector<32x128xf32>
    %20 = vector.extract_strided_slice %13 {offsets = [192, 0], sizes = [32, 128], strides = [1, 1]} : vector<256x128xf32> to vector<32x128xf32>
    %21 = vector.extract_strided_slice %13 {offsets = [224, 0], sizes = [32, 128], strides = [1, 1]} : vector<256x128xf32> to vector<32x128xf32>
    %22 = arith.addf %14, %15 : vector<32x128xf32>
    %23 = arith.addf %16, %17 : vector<32x128xf32>
    %24 = arith.addf %18, %19 : vector<32x128xf32>
    %25 = arith.addf %20, %21 : vector<32x128xf32>
    %26 = arith.addf %22, %23 : vector<32x128xf32>
    %27 = arith.addf %24, %25 : vector<32x128xf32>
    %28 = arith.addf %26, %27 : vector<32x128xf32>
    %29 = arith.addf %3, %28 : vector<32x128xf32>
    %30 = arith.addf %8, %12 : vector<256x128xf32>
    %31 = vector.extract_strided_slice %30 {offsets = [0, 0], sizes = [32, 128], strides = [1, 1]} : vector<256x128xf32> to vector<32x128xf32>
    %32 = vector.extract_strided_slice %30 {offsets = [32, 0], sizes = [32, 128], strides = [1, 1]} : vector<256x128xf32> to vector<32x128xf32>
    %33 = vector.extract_strided_slice %30 {offsets = [64, 0], sizes = [32, 128], strides = [1, 1]} : vector<256x128xf32> to vector<32x128xf32>
    %34 = vector.extract_strided_slice %30 {offsets = [96, 0], sizes = [32, 128], strides = [1, 1]} : vector<256x128xf32> to vector<32x128xf32>
    %35 = vector.extract_strided_slice %30 {offsets = [128, 0], sizes = [32, 128], strides = [1, 1]} : vector<256x128xf32> to vector<32x128xf32>
    %36 = vector.extract_strided_slice %30 {offsets = [160, 0], sizes = [32, 128], strides = [1, 1]} : vector<256x128xf32> to vector<32x128xf32>
    %37 = vector.extract_strided_slice %30 {offsets = [192, 0], sizes = [32, 128], strides = [1, 1]} : vector<256x128xf32> to vector<32x128xf32>
    %38 = vector.extract_strided_slice %30 {offsets = [224, 0], sizes = [32, 128], strides = [1, 1]} : vector<256x128xf32> to vector<32x128xf32>
    %39 = arith.addf %31, %32 : vector<32x128xf32>
    %40 = arith.addf %33, %34 : vector<32x128xf32>
    %41 = arith.addf %35, %36 : vector<32x128xf32>
    %42 = arith.addf %37, %38 : vector<32x128xf32>
    %43 = arith.addf %39, %40 : vector<32x128xf32>
    %44 = arith.addf %41, %42 : vector<32x128xf32>
    %45 = arith.addf %43, %44 : vector<32x128xf32>
    %46 = arith.addf %3, %45 : vector<32x128xf32>
    %c0_9 = arith.constant 0 : index
    %c1 = arith.constant 1 : index
    %c0_10 = arith.constant 0 : index
    %c0_11 = arith.constant 0 : index
    %47 = vector.load %arg2[%c0_9, %c1, %c0_10, %c0_11] : memref<1x4x256x128xf32, #tpu.memory_space<vmem>>, vector<1x1x256x128xf32>
    %48 = vector.shape_cast %47 : vector<1x1x256x128xf32> to vector<256x128xf32>
    %c1_i32 = arith.constant 1 : i32
    %49 = vector.broadcast %c1_i32 : i32 to vector<256x128xi32>
    %50 = arith.cmpi eq, %6, %49 : vector<256x128xi32>
    %51 = arith.extui %50 : vector<256x128xi1> to vector<256x128xi32>
    %52 = arith.sitofp %51 : vector<256x128xi32> to vector<256x128xf32>
    %53 = arith.mulf %48, %52 : vector<256x128xf32>
    %54 = arith.addf %13, %53 : vector<256x128xf32>
    %55 = vector.extract_strided_slice %53 {offsets = [0, 0], sizes = [32, 128], strides = [1, 1]} : vector<256x128xf32> to vector<32x128xf32>
    %56 = vector.extract_strided_slice %53 {offsets = [32, 0], sizes = [32, 128], strides = [1, 1]} : vector<256x128xf32> to vector<32x128xf32>
    %57 = vector.extract_strided_slice %53 {offsets = [64, 0], sizes = [32, 128], strides = [1, 1]} : vector<256x128xf32> to vector<32x128xf32>
    %58 = vector.extract_strided_slice %53 {offsets = [96, 0], sizes = [32, 128], strides = [1, 1]} : vector<256x128xf32> to vector<32x128xf32>
    %59 = vector.extract_strided_slice %53 {offsets = [128, 0], sizes = [32, 128], strides = [1, 1]} : vector<256x128xf32> to vector<32x128xf32>
    %60 = vector.extract_strided_slice %53 {offsets = [160, 0], sizes = [32, 128], strides = [1, 1]} : vector<256x128xf32> to vector<32x128xf32>
    %61 = vector.extract_strided_slice %53 {offsets = [192, 0], sizes = [32, 128], strides = [1, 1]} : vector<256x128xf32> to vector<32x128xf32>
    %62 = vector.extract_strided_slice %53 {offsets = [224, 0], sizes = [32, 128], strides = [1, 1]} : vector<256x128xf32> to vector<32x128xf32>
    %63 = arith.addf %55, %56 : vector<32x128xf32>
    %64 = arith.addf %57, %58 : vector<32x128xf32>
    %65 = arith.addf %59, %60 : vector<32x128xf32>
    %66 = arith.addf %61, %62 : vector<32x128xf32>
    %67 = arith.addf %63, %64 : vector<32x128xf32>
    %68 = arith.addf %65, %66 : vector<32x128xf32>
    %69 = arith.addf %67, %68 : vector<32x128xf32>
    %70 = arith.addf %3, %69 : vector<32x128xf32>
    %71 = arith.addf %48, %52 : vector<256x128xf32>
    %72 = vector.extract_strided_slice %71 {offsets = [0, 0], sizes = [32, 128], strides = [1, 1]} : vector<256x128xf32> to vector<32x128xf32>
    %73 = vector.extract_strided_slice %71 {offsets = [32, 0], sizes = [32, 128], strides = [1, 1]} : vector<256x128xf32> to vector<32x128xf32>
    %74 = vector.extract_strided_slice %71 {offsets = [64, 0], sizes = [32, 128], strides = [1, 1]} : vector<256x128xf32> to vector<32x128xf32>
    %75 = vector.extract_strided_slice %71 {offsets = [96, 0], sizes = [32, 128], strides = [1, 1]} : vector<256x128xf32> to vector<32x128xf32>
    %76 = vector.extract_strided_slice %71 {offsets = [128, 0], sizes = [32, 128], strides = [1, 1]} : vector<256x128xf32> to vector<32x128xf32>
    %77 = vector.extract_strided_slice %71 {offsets = [160, 0], sizes = [32, 128], strides = [1, 1]} : vector<256x128xf32> to vector<32x128xf32>
    %78 = vector.extract_strided_slice %71 {offsets = [192, 0], sizes = [32, 128], strides = [1, 1]} : vector<256x128xf32> to vector<32x128xf32>
    %79 = vector.extract_strided_slice %71 {offsets = [224, 0], sizes = [32, 128], strides = [1, 1]} : vector<256x128xf32> to vector<32x128xf32>
    %80 = arith.addf %72, %73 : vector<32x128xf32>
    %81 = arith.addf %74, %75 : vector<32x128xf32>
    %82 = arith.addf %76, %77 : vector<32x128xf32>
    %83 = arith.addf %78, %79 : vector<32x128xf32>
    %84 = arith.addf %80, %81 : vector<32x128xf32>
    %85 = arith.addf %82, %83 : vector<32x128xf32>
    %86 = arith.addf %84, %85 : vector<32x128xf32>
    %87 = arith.addf %3, %86 : vector<32x128xf32>
    %c0_12 = arith.constant 0 : index
    %c2 = arith.constant 2 : index
    %c0_13 = arith.constant 0 : index
    %c0_14 = arith.constant 0 : index
    %88 = vector.load %arg2[%c0_12, %c2, %c0_13, %c0_14] : memref<1x4x256x128xf32, #tpu.memory_space<vmem>>, vector<1x1x256x128xf32>
    %89 = vector.shape_cast %88 : vector<1x1x256x128xf32> to vector<256x128xf32>
    %c2_i32 = arith.constant 2 : i32
    %90 = vector.broadcast %c2_i32 : i32 to vector<256x128xi32>
    %91 = arith.cmpi eq, %6, %90 : vector<256x128xi32>
    %92 = arith.extui %91 : vector<256x128xi1> to vector<256x128xi32>
    %93 = arith.sitofp %92 : vector<256x128xi32> to vector<256x128xf32>
    %94 = arith.mulf %89, %93 : vector<256x128xf32>
    %95 = arith.addf %54, %94 : vector<256x128xf32>
    %96 = vector.extract_strided_slice %94 {offsets = [0, 0], sizes = [32, 128], strides = [1, 1]} : vector<256x128xf32> to vector<32x128xf32>
    %97 = vector.extract_strided_slice %94 {offsets = [32, 0], sizes = [32, 128], strides = [1, 1]} : vector<256x128xf32> to vector<32x128xf32>
    %98 = vector.extract_strided_slice %94 {offsets = [64, 0], sizes = [32, 128], strides = [1, 1]} : vector<256x128xf32> to vector<32x128xf32>
    %99 = vector.extract_strided_slice %94 {offsets = [96, 0], sizes = [32, 128], strides = [1, 1]} : vector<256x128xf32> to vector<32x128xf32>
    %100 = vector.extract_strided_slice %94 {offsets = [128, 0], sizes = [32, 128], strides = [1, 1]} : vector<256x128xf32> to vector<32x128xf32>
    %101 = vector.extract_strided_slice %94 {offsets = [160, 0], sizes = [32, 128], strides = [1, 1]} : vector<256x128xf32> to vector<32x128xf32>
    %102 = vector.extract_strided_slice %94 {offsets = [192, 0], sizes = [32, 128], strides = [1, 1]} : vector<256x128xf32> to vector<32x128xf32>
    %103 = vector.extract_strided_slice %94 {offsets = [224, 0], sizes = [32, 128], strides = [1, 1]} : vector<256x128xf32> to vector<32x128xf32>
    %104 = arith.addf %96, %97 : vector<32x128xf32>
    %105 = arith.addf %98, %99 : vector<32x128xf32>
    %106 = arith.addf %100, %101 : vector<32x128xf32>
    %107 = arith.addf %102, %103 : vector<32x128xf32>
    %108 = arith.addf %104, %105 : vector<32x128xf32>
    %109 = arith.addf %106, %107 : vector<32x128xf32>
    %110 = arith.addf %108, %109 : vector<32x128xf32>
    %111 = arith.addf %3, %110 : vector<32x128xf32>
    %112 = arith.addf %89, %93 : vector<256x128xf32>
    %113 = vector.extract_strided_slice %112 {offsets = [0, 0], sizes = [32, 128], strides = [1, 1]} : vector<256x128xf32> to vector<32x128xf32>
    %114 = vector.extract_strided_slice %112 {offsets = [32, 0], sizes = [32, 128], strides = [1, 1]} : vector<256x128xf32> to vector<32x128xf32>
    %115 = vector.extract_strided_slice %112 {offsets = [64, 0], sizes = [32, 128], strides = [1, 1]} : vector<256x128xf32> to vector<32x128xf32>
    %116 = vector.extract_strided_slice %112 {offsets = [96, 0], sizes = [32, 128], strides = [1, 1]} : vector<256x128xf32> to vector<32x128xf32>
    %117 = vector.extract_strided_slice %112 {offsets = [128, 0], sizes = [32, 128], strides = [1, 1]} : vector<256x128xf32> to vector<32x128xf32>
    %118 = vector.extract_strided_slice %112 {offsets = [160, 0], sizes = [32, 128], strides = [1, 1]} : vector<256x128xf32> to vector<32x128xf32>
    %119 = vector.extract_strided_slice %112 {offsets = [192, 0], sizes = [32, 128], strides = [1, 1]} : vector<256x128xf32> to vector<32x128xf32>
    %120 = vector.extract_strided_slice %112 {offsets = [224, 0], sizes = [32, 128], strides = [1, 1]} : vector<256x128xf32> to vector<32x128xf32>
    %121 = arith.addf %113, %114 : vector<32x128xf32>
    %122 = arith.addf %115, %116 : vector<32x128xf32>
    %123 = arith.addf %117, %118 : vector<32x128xf32>
    %124 = arith.addf %119, %120 : vector<32x128xf32>
    %125 = arith.addf %121, %122 : vector<32x128xf32>
    %126 = arith.addf %123, %124 : vector<32x128xf32>
    %127 = arith.addf %125, %126 : vector<32x128xf32>
    %128 = arith.addf %3, %127 : vector<32x128xf32>
    %c0_15 = arith.constant 0 : index
    %c3 = arith.constant 3 : index
    %c0_16 = arith.constant 0 : index
    %c0_17 = arith.constant 0 : index
    %129 = vector.load %arg2[%c0_15, %c3, %c0_16, %c0_17] : memref<1x4x256x128xf32, #tpu.memory_space<vmem>>, vector<1x1x256x128xf32>
    %130 = vector.shape_cast %129 : vector<1x1x256x128xf32> to vector<256x128xf32>
    %c3_i32 = arith.constant 3 : i32
    %131 = vector.broadcast %c3_i32 : i32 to vector<256x128xi32>
    %132 = arith.cmpi eq, %6, %131 : vector<256x128xi32>
    %133 = arith.extui %132 : vector<256x128xi1> to vector<256x128xi32>
    %134 = arith.sitofp %133 : vector<256x128xi32> to vector<256x128xf32>
    %135 = arith.mulf %130, %134 : vector<256x128xf32>
    %136 = arith.addf %95, %135 : vector<256x128xf32>
    %137 = vector.extract_strided_slice %135 {offsets = [0, 0], sizes = [32, 128], strides = [1, 1]} : vector<256x128xf32> to vector<32x128xf32>
    %138 = vector.extract_strided_slice %135 {offsets = [32, 0], sizes = [32, 128], strides = [1, 1]} : vector<256x128xf32> to vector<32x128xf32>
    %139 = vector.extract_strided_slice %135 {offsets = [64, 0], sizes = [32, 128], strides = [1, 1]} : vector<256x128xf32> to vector<32x128xf32>
    %140 = vector.extract_strided_slice %135 {offsets = [96, 0], sizes = [32, 128], strides = [1, 1]} : vector<256x128xf32> to vector<32x128xf32>
    %141 = vector.extract_strided_slice %135 {offsets = [128, 0], sizes = [32, 128], strides = [1, 1]} : vector<256x128xf32> to vector<32x128xf32>
    %142 = vector.extract_strided_slice %135 {offsets = [160, 0], sizes = [32, 128], strides = [1, 1]} : vector<256x128xf32> to vector<32x128xf32>
    %143 = vector.extract_strided_slice %135 {offsets = [192, 0], sizes = [32, 128], strides = [1, 1]} : vector<256x128xf32> to vector<32x128xf32>
    %144 = vector.extract_strided_slice %135 {offsets = [224, 0], sizes = [32, 128], strides = [1, 1]} : vector<256x128xf32> to vector<32x128xf32>
    %145 = arith.addf %137, %138 : vector<32x128xf32>
    %146 = arith.addf %139, %140 : vector<32x128xf32>
    %147 = arith.addf %141, %142 : vector<32x128xf32>
    %148 = arith.addf %143, %144 : vector<32x128xf32>
    %149 = arith.addf %145, %146 : vector<32x128xf32>
    %150 = arith.addf %147, %148 : vector<32x128xf32>
    %151 = arith.addf %149, %150 : vector<32x128xf32>
    %152 = arith.addf %3, %151 : vector<32x128xf32>
    %153 = arith.addf %130, %134 : vector<256x128xf32>
    %154 = vector.extract_strided_slice %153 {offsets = [0, 0], sizes = [32, 128], strides = [1, 1]} : vector<256x128xf32> to vector<32x128xf32>
    %155 = vector.extract_strided_slice %153 {offsets = [32, 0], sizes = [32, 128], strides = [1, 1]} : vector<256x128xf32> to vector<32x128xf32>
    %156 = vector.extract_strided_slice %153 {offsets = [64, 0], sizes = [32, 128], strides = [1, 1]} : vector<256x128xf32> to vector<32x128xf32>
    %157 = vector.extract_strided_slice %153 {offsets = [96, 0], sizes = [32, 128], strides = [1, 1]} : vector<256x128xf32> to vector<32x128xf32>
    %158 = vector.extract_strided_slice %153 {offsets = [128, 0], sizes = [32, 128], strides = [1, 1]} : vector<256x128xf32> to vector<32x128xf32>
    %159 = vector.extract_strided_slice %153 {offsets = [160, 0], sizes = [32, 128], strides = [1, 1]} : vector<256x128xf32> to vector<32x128xf32>
    %160 = vector.extract_strided_slice %153 {offsets = [192, 0], sizes = [32, 128], strides = [1, 1]} : vector<256x128xf32> to vector<32x128xf32>
    %161 = vector.extract_strided_slice %153 {offsets = [224, 0], sizes = [32, 128], strides = [1, 1]} : vector<256x128xf32> to vector<32x128xf32>
    %162 = arith.addf %154, %155 : vector<32x128xf32>
    %163 = arith.addf %156, %157 : vector<32x128xf32>
    %164 = arith.addf %158, %159 : vector<32x128xf32>
    %165 = arith.addf %160, %161 : vector<32x128xf32>
    %166 = arith.addf %162, %163 : vector<32x128xf32>
    %167 = arith.addf %164, %165 : vector<32x128xf32>
    %168 = arith.addf %166, %167 : vector<32x128xf32>
    %169 = arith.addf %3, %168 : vector<32x128xf32>
    %cst_18 = arith.constant 1.000000e+00 : f32
    %170 = vector.broadcast %cst_18 : f32 to vector<256x128xf32>
    %171 = arith.subf %170, %136 : vector<256x128xf32>
    %cst_19 = arith.constant 1.000000e-30 : f32
    %172 = vector.broadcast %cst_19 : f32 to vector<256x128xf32>
    %173 = arith.maximumf %136, %172 : vector<256x128xf32>
    %174 = math.log %173 : vector<256x128xf32>
    %175 = arith.mulf %171, %171 : vector<256x128xf32>
    %176 = arith.mulf %174, %175 : vector<256x128xf32>
    %177 = arith.mulf %12, %176 : vector<256x128xf32>
    %178 = vector.extract_strided_slice %177 {offsets = [0, 0], sizes = [32, 128], strides = [1, 1]} : vector<256x128xf32> to vector<32x128xf32>
    %179 = vector.extract_strided_slice %177 {offsets = [32, 0], sizes = [32, 128], strides = [1, 1]} : vector<256x128xf32> to vector<32x128xf32>
    %180 = vector.extract_strided_slice %177 {offsets = [64, 0], sizes = [32, 128], strides = [1, 1]} : vector<256x128xf32> to vector<32x128xf32>
    %181 = vector.extract_strided_slice %177 {offsets = [96, 0], sizes = [32, 128], strides = [1, 1]} : vector<256x128xf32> to vector<32x128xf32>
    %182 = vector.extract_strided_slice %177 {offsets = [128, 0], sizes = [32, 128], strides = [1, 1]} : vector<256x128xf32> to vector<32x128xf32>
    %183 = vector.extract_strided_slice %177 {offsets = [160, 0], sizes = [32, 128], strides = [1, 1]} : vector<256x128xf32> to vector<32x128xf32>
    %184 = vector.extract_strided_slice %177 {offsets = [192, 0], sizes = [32, 128], strides = [1, 1]} : vector<256x128xf32> to vector<32x128xf32>
    %185 = vector.extract_strided_slice %177 {offsets = [224, 0], sizes = [32, 128], strides = [1, 1]} : vector<256x128xf32> to vector<32x128xf32>
    %186 = arith.addf %178, %179 : vector<32x128xf32>
    %187 = arith.addf %180, %181 : vector<32x128xf32>
    %188 = arith.addf %182, %183 : vector<32x128xf32>
    %189 = arith.addf %184, %185 : vector<32x128xf32>
    %190 = arith.addf %186, %187 : vector<32x128xf32>
    %191 = arith.addf %188, %189 : vector<32x128xf32>
    %192 = arith.addf %190, %191 : vector<32x128xf32>
    %193 = arith.addf %3, %192 : vector<32x128xf32>
    %194 = arith.mulf %52, %176 : vector<256x128xf32>
    %195 = vector.extract_strided_slice %194 {offsets = [0, 0], sizes = [32, 128], strides = [1, 1]} : vector<256x128xf32> to vector<32x128xf32>
    %196 = vector.extract_strided_slice %194 {offsets = [32, 0], sizes = [32, 128], strides = [1, 1]} : vector<256x128xf32> to vector<32x128xf32>
    %197 = vector.extract_strided_slice %194 {offsets = [64, 0], sizes = [32, 128], strides = [1, 1]} : vector<256x128xf32> to vector<32x128xf32>
    %198 = vector.extract_strided_slice %194 {offsets = [96, 0], sizes = [32, 128], strides = [1, 1]} : vector<256x128xf32> to vector<32x128xf32>
    %199 = vector.extract_strided_slice %194 {offsets = [128, 0], sizes = [32, 128], strides = [1, 1]} : vector<256x128xf32> to vector<32x128xf32>
    %200 = vector.extract_strided_slice %194 {offsets = [160, 0], sizes = [32, 128], strides = [1, 1]} : vector<256x128xf32> to vector<32x128xf32>
    %201 = vector.extract_strided_slice %194 {offsets = [192, 0], sizes = [32, 128], strides = [1, 1]} : vector<256x128xf32> to vector<32x128xf32>
    %202 = vector.extract_strided_slice %194 {offsets = [224, 0], sizes = [32, 128], strides = [1, 1]} : vector<256x128xf32> to vector<32x128xf32>
    %203 = arith.addf %195, %196 : vector<32x128xf32>
    %204 = arith.addf %197, %198 : vector<32x128xf32>
    %205 = arith.addf %199, %200 : vector<32x128xf32>
    %206 = arith.addf %201, %202 : vector<32x128xf32>
    %207 = arith.addf %203, %204 : vector<32x128xf32>
    %208 = arith.addf %205, %206 : vector<32x128xf32>
    %209 = arith.addf %207, %208 : vector<32x128xf32>
    %210 = arith.addf %3, %209 : vector<32x128xf32>
    %211 = arith.mulf %93, %176 : vector<256x128xf32>
    %212 = vector.extract_strided_slice %211 {offsets = [0, 0], sizes = [32, 128], strides = [1, 1]} : vector<256x128xf32> to vector<32x128xf32>
    %213 = vector.extract_strided_slice %211 {offsets = [32, 0], sizes = [32, 128], strides = [1, 1]} : vector<256x128xf32> to vector<32x128xf32>
    %214 = vector.extract_strided_slice %211 {offsets = [64, 0], sizes = [32, 128], strides = [1, 1]} : vector<256x128xf32> to vector<32x128xf32>
    %215 = vector.extract_strided_slice %211 {offsets = [96, 0], sizes = [32, 128], strides = [1, 1]} : vector<256x128xf32> to vector<32x128xf32>
    %216 = vector.extract_strided_slice %211 {offsets = [128, 0], sizes = [32, 128], strides = [1, 1]} : vector<256x128xf32> to vector<32x128xf32>
    %217 = vector.extract_strided_slice %211 {offsets = [160, 0], sizes = [32, 128], strides = [1, 1]} : vector<256x128xf32> to vector<32x128xf32>
    %218 = vector.extract_strided_slice %211 {offsets = [192, 0], sizes = [32, 128], strides = [1, 1]} : vector<256x128xf32> to vector<32x128xf32>
    %219 = vector.extract_strided_slice %211 {offsets = [224, 0], sizes = [32, 128], strides = [1, 1]} : vector<256x128xf32> to vector<32x128xf32>
    %220 = arith.addf %212, %213 : vector<32x128xf32>
    %221 = arith.addf %214, %215 : vector<32x128xf32>
    %222 = arith.addf %216, %217 : vector<32x128xf32>
    %223 = arith.addf %218, %219 : vector<32x128xf32>
    %224 = arith.addf %220, %221 : vector<32x128xf32>
    %225 = arith.addf %222, %223 : vector<32x128xf32>
    %226 = arith.addf %224, %225 : vector<32x128xf32>
    %227 = arith.addf %3, %226 : vector<32x128xf32>
    %228 = arith.mulf %134, %176 : vector<256x128xf32>
    %229 = vector.extract_strided_slice %228 {offsets = [0, 0], sizes = [32, 128], strides = [1, 1]} : vector<256x128xf32> to vector<32x128xf32>
    %230 = vector.extract_strided_slice %228 {offsets = [32, 0], sizes = [32, 128], strides = [1, 1]} : vector<256x128xf32> to vector<32x128xf32>
    %231 = vector.extract_strided_slice %228 {offsets = [64, 0], sizes = [32, 128], strides = [1, 1]} : vector<256x128xf32> to vector<32x128xf32>
    %232 = vector.extract_strided_slice %228 {offsets = [96, 0], sizes = [32, 128], strides = [1, 1]} : vector<256x128xf32> to vector<32x128xf32>
    %233 = vector.extract_strided_slice %228 {offsets = [128, 0], sizes = [32, 128], strides = [1, 1]} : vector<256x128xf32> to vector<32x128xf32>
    %234 = vector.extract_strided_slice %228 {offsets = [160, 0], sizes = [32, 128], strides = [1, 1]} : vector<256x128xf32> to vector<32x128xf32>
    %235 = vector.extract_strided_slice %228 {offsets = [192, 0], sizes = [32, 128], strides = [1, 1]} : vector<256x128xf32> to vector<32x128xf32>
    %236 = vector.extract_strided_slice %228 {offsets = [224, 0], sizes = [32, 128], strides = [1, 1]} : vector<256x128xf32> to vector<32x128xf32>
    %237 = arith.addf %229, %230 : vector<32x128xf32>
    %238 = arith.addf %231, %232 : vector<32x128xf32>
    %239 = arith.addf %233, %234 : vector<32x128xf32>
    %240 = arith.addf %235, %236 : vector<32x128xf32>
    %241 = arith.addf %237, %238 : vector<32x128xf32>
    %242 = arith.addf %239, %240 : vector<32x128xf32>
    %243 = arith.addf %241, %242 : vector<32x128xf32>
    %244 = arith.addf %3, %243 : vector<32x128xf32>
    %c0_20 = arith.constant 0 : index
    %c0_21 = arith.constant 0 : index
    %c0_22 = arith.constant 0 : index
    %c0_23 = arith.constant 0 : index
    %245 = vector.load %arg4[%c0_20, %c0_21, %c0_22, %c0_23] : memref<1x4x32x128xf32, #tpu.memory_space<vmem>>, vector<1x1x32x128xf32>
    %246 = vector.shape_cast %245 : vector<1x1x32x128xf32> to vector<32x128xf32>
    %247 = arith.addf %246, %29 : vector<32x128xf32>
    %c0_24 = arith.constant 0 : index
    %c0_25 = arith.constant 0 : index
    %c0_26 = arith.constant 0 : index
    %c0_27 = arith.constant 0 : index
    %248 = vector.load %arg4[%c0_24, %c0_25, %c0_26, %c0_27] : memref<1x4x32x128xf32, #tpu.memory_space<vmem>>, vector<1x1x32x128xf32>
    %249 = vector.shape_cast %248 : vector<1x1x32x128xf32> to vector<32x128xf32>
    %250 = vector.shape_cast %247 : vector<32x128xf32> to vector<1x1x32x128xf32>
    tpu.vector_store %arg4[%c0_24, %c0_25, %c0_26, %c0_27], %250 {strides = array<i32>} : memref<1x4x32x128xf32, #tpu.memory_space<vmem>>, vector<1x1x32x128xf32>,
    %c0_28 = arith.constant 0 : index
    %c0_29 = arith.constant 0 : index
    %c0_30 = arith.constant 0 : index
    %c0_31 = arith.constant 0 : index
    %251 = vector.load %arg5[%c0_28, %c0_29, %c0_30, %c0_31] : memref<1x4x32x128xf32, #tpu.memory_space<vmem>>, vector<1x1x32x128xf32>
    %252 = vector.shape_cast %251 : vector<1x1x32x128xf32> to vector<32x128xf32>
    %253 = arith.addf %252, %46 : vector<32x128xf32>
    %c0_32 = arith.constant 0 : index
    %c0_33 = arith.constant 0 : index
    %c0_34 = arith.constant 0 : index
    %c0_35 = arith.constant 0 : index
    %254 = vector.load %arg5[%c0_32, %c0_33, %c0_34, %c0_35] : memref<1x4x32x128xf32, #tpu.memory_space<vmem>>, vector<1x1x32x128xf32>
    %255 = vector.shape_cast %254 : vector<1x1x32x128xf32> to vector<32x128xf32>
    %256 = vector.shape_cast %253 : vector<32x128xf32> to vector<1x1x32x128xf32>
    tpu.vector_store %arg5[%c0_32, %c0_33, %c0_34, %c0_35], %256 {strides = array<i32>} : memref<1x4x32x128xf32, #tpu.memory_space<vmem>>, vector<1x1x32x128xf32>,
    %c0_36 = arith.constant 0 : index
    %c0_37 = arith.constant 0 : index
    %c0_38 = arith.constant 0 : index
    %c0_39 = arith.constant 0 : index
    %257 = vector.load %arg6[%c0_36, %c0_37, %c0_38, %c0_39] : memref<1x4x32x128xf32, #tpu.memory_space<vmem>>, vector<1x1x32x128xf32>
    %258 = vector.shape_cast %257 : vector<1x1x32x128xf32> to vector<32x128xf32>
    %259 = arith.addf %258, %193 : vector<32x128xf32>
    %c0_40 = arith.constant 0 : index
    %c0_41 = arith.constant 0 : index
    %c0_42 = arith.constant 0 : index
    %c0_43 = arith.constant 0 : index
    %260 = vector.load %arg6[%c0_40, %c0_41, %c0_42, %c0_43] : memref<1x4x32x128xf32, #tpu.memory_space<vmem>>, vector<1x1x32x128xf32>
    %261 = vector.shape_cast %260 : vector<1x1x32x128xf32> to vector<32x128xf32>
    %262 = vector.shape_cast %259 : vector<32x128xf32> to vector<1x1x32x128xf32>
    tpu.vector_store %arg6[%c0_40, %c0_41, %c0_42, %c0_43], %262 {strides = array<i32>} : memref<1x4x32x128xf32, #tpu.memory_space<vmem>>, vector<1x1x32x128xf32>,
    %c0_44 = arith.constant 0 : index
    %c1_45 = arith.constant 1 : index
    %c0_46 = arith.constant 0 : index
    %c0_47 = arith.constant 0 : index
    %263 = vector.load %arg4[%c0_44, %c1_45, %c0_46, %c0_47] : memref<1x4x32x128xf32, #tpu.memory_space<vmem>>, vector<1x1x32x128xf32>
    %264 = vector.shape_cast %263 : vector<1x1x32x128xf32> to vector<32x128xf32>
    %265 = arith.addf %264, %70 : vector<32x128xf32>
    %c0_48 = arith.constant 0 : index
    %c1_49 = arith.constant 1 : index
    %c0_50 = arith.constant 0 : index
    %c0_51 = arith.constant 0 : index
    %266 = vector.load %arg4[%c0_48, %c1_49, %c0_50, %c0_51] : memref<1x4x32x128xf32, #tpu.memory_space<vmem>>, vector<1x1x32x128xf32>
    %267 = vector.shape_cast %266 : vector<1x1x32x128xf32> to vector<32x128xf32>
    %268 = vector.shape_cast %265 : vector<32x128xf32> to vector<1x1x32x128xf32>
    tpu.vector_store %arg4[%c0_48, %c1_49, %c0_50, %c0_51], %268 {strides = array<i32>} : memref<1x4x32x128xf32, #tpu.memory_space<vmem>>, vector<1x1x32x128xf32>,
    %c0_52 = arith.constant 0 : index
    %c1_53 = arith.constant 1 : index
    %c0_54 = arith.constant 0 : index
    %c0_55 = arith.constant 0 : index
    %269 = vector.load %arg5[%c0_52, %c1_53, %c0_54, %c0_55] : memref<1x4x32x128xf32, #tpu.memory_space<vmem>>, vector<1x1x32x128xf32>
    %270 = vector.shape_cast %269 : vector<1x1x32x128xf32> to vector<32x128xf32>
    %271 = arith.addf %270, %87 : vector<32x128xf32>
    %c0_56 = arith.constant 0 : index
    %c1_57 = arith.constant 1 : index
    %c0_58 = arith.constant 0 : index
    %c0_59 = arith.constant 0 : index
    %272 = vector.load %arg5[%c0_56, %c1_57, %c0_58, %c0_59] : memref<1x4x32x128xf32, #tpu.memory_space<vmem>>, vector<1x1x32x128xf32>
    %273 = vector.shape_cast %272 : vector<1x1x32x128xf32> to vector<32x128xf32>
    %274 = vector.shape_cast %271 : vector<32x128xf32> to vector<1x1x32x128xf32>
    tpu.vector_store %arg5[%c0_56, %c1_57, %c0_58, %c0_59], %274 {strides = array<i32>} : memref<1x4x32x128xf32, #tpu.memory_space<vmem>>, vector<1x1x32x128xf32>,
    %c0_60 = arith.constant 0 : index
    %c1_61 = arith.constant 1 : index
    %c0_62 = arith.constant 0 : index
    %c0_63 = arith.constant 0 : index
    %275 = vector.load %arg6[%c0_60, %c1_61, %c0_62, %c0_63] : memref<1x4x32x128xf32, #tpu.memory_space<vmem>>, vector<1x1x32x128xf32>
    %276 = vector.shape_cast %275 : vector<1x1x32x128xf32> to vector<32x128xf32>
    %277 = arith.addf %276, %210 : vector<32x128xf32>
    %c0_64 = arith.constant 0 : index
    %c1_65 = arith.constant 1 : index
    %c0_66 = arith.constant 0 : index
    %c0_67 = arith.constant 0 : index
    %278 = vector.load %arg6[%c0_64, %c1_65, %c0_66, %c0_67] : memref<1x4x32x128xf32, #tpu.memory_space<vmem>>, vector<1x1x32x128xf32>
    %279 = vector.shape_cast %278 : vector<1x1x32x128xf32> to vector<32x128xf32>
    %280 = vector.shape_cast %277 : vector<32x128xf32> to vector<1x1x32x128xf32>
    tpu.vector_store %arg6[%c0_64, %c1_65, %c0_66, %c0_67], %280 {strides = array<i32>} : memref<1x4x32x128xf32, #tpu.memory_space<vmem>>, vector<1x1x32x128xf32>,
    %c0_68 = arith.constant 0 : index
    %c2_69 = arith.constant 2 : index
    %c0_70 = arith.constant 0 : index
    %c0_71 = arith.constant 0 : index
    %281 = vector.load %arg4[%c0_68, %c2_69, %c0_70, %c0_71] : memref<1x4x32x128xf32, #tpu.memory_space<vmem>>, vector<1x1x32x128xf32>
    %282 = vector.shape_cast %281 : vector<1x1x32x128xf32> to vector<32x128xf32>
    %283 = arith.addf %282, %111 : vector<32x128xf32>
    %c0_72 = arith.constant 0 : index
    %c2_73 = arith.constant 2 : index
    %c0_74 = arith.constant 0 : index
    %c0_75 = arith.constant 0 : index
    %284 = vector.load %arg4[%c0_72, %c2_73, %c0_74, %c0_75] : memref<1x4x32x128xf32, #tpu.memory_space<vmem>>, vector<1x1x32x128xf32>
    %285 = vector.shape_cast %284 : vector<1x1x32x128xf32> to vector<32x128xf32>
    %286 = vector.shape_cast %283 : vector<32x128xf32> to vector<1x1x32x128xf32>
    tpu.vector_store %arg4[%c0_72, %c2_73, %c0_74, %c0_75], %286 {strides = array<i32>} : memref<1x4x32x128xf32, #tpu.memory_space<vmem>>, vector<1x1x32x128xf32>,
    %c0_76 = arith.constant 0 : index
    %c2_77 = arith.constant 2 : index
    %c0_78 = arith.constant 0 : index
    %c0_79 = arith.constant 0 : index
    %287 = vector.load %arg5[%c0_76, %c2_77, %c0_78, %c0_79] : memref<1x4x32x128xf32, #tpu.memory_space<vmem>>, vector<1x1x32x128xf32>
    %288 = vector.shape_cast %287 : vector<1x1x32x128xf32> to vector<32x128xf32>
    %289 = arith.addf %288, %128 : vector<32x128xf32>
    %c0_80 = arith.constant 0 : index
    %c2_81 = arith.constant 2 : index
    %c0_82 = arith.constant 0 : index
    %c0_83 = arith.constant 0 : index
    %290 = vector.load %arg5[%c0_80, %c2_81, %c0_82, %c0_83] : memref<1x4x32x128xf32, #tpu.memory_space<vmem>>, vector<1x1x32x128xf32>
    %291 = vector.shape_cast %290 : vector<1x1x32x128xf32> to vector<32x128xf32>
    %292 = vector.shape_cast %289 : vector<32x128xf32> to vector<1x1x32x128xf32>
    tpu.vector_store %arg5[%c0_80, %c2_81, %c0_82, %c0_83], %292 {strides = array<i32>} : memref<1x4x32x128xf32, #tpu.memory_space<vmem>>, vector<1x1x32x128xf32>,
    %c0_84 = arith.constant 0 : index
    %c2_85 = arith.constant 2 : index
    %c0_86 = arith.constant 0 : index
    %c0_87 = arith.constant 0 : index
    %293 = vector.load %arg6[%c0_84, %c2_85, %c0_86, %c0_87] : memref<1x4x32x128xf32, #tpu.memory_space<vmem>>, vector<1x1x32x128xf32>
    %294 = vector.shape_cast %293 : vector<1x1x32x128xf32> to vector<32x128xf32>
    %295 = arith.addf %294, %227 : vector<32x128xf32>
    %c0_88 = arith.constant 0 : index
    %c2_89 = arith.constant 2 : index
    %c0_90 = arith.constant 0 : index
    %c0_91 = arith.constant 0 : index
    %296 = vector.load %arg6[%c0_88, %c2_89, %c0_90, %c0_91] : memref<1x4x32x128xf32, #tpu.memory_space<vmem>>, vector<1x1x32x128xf32>
    %297 = vector.shape_cast %296 : vector<1x1x32x128xf32> to vector<32x128xf32>
    %298 = vector.shape_cast %295 : vector<32x128xf32> to vector<1x1x32x128xf32>
    tpu.vector_store %arg6[%c0_88, %c2_89, %c0_90, %c0_91], %298 {strides = array<i32>} : memref<1x4x32x128xf32, #tpu.memory_space<vmem>>, vector<1x1x32x128xf32>,
    %c0_92 = arith.constant 0 : index
    %c3_93 = arith.constant 3 : index
    %c0_94 = arith.constant 0 : index
    %c0_95 = arith.constant 0 : index
    %299 = vector.load %arg4[%c0_92, %c3_93, %c0_94, %c0_95] : memref<1x4x32x128xf32, #tpu.memory_space<vmem>>, vector<1x1x32x128xf32>
    %300 = vector.shape_cast %299 : vector<1x1x32x128xf32> to vector<32x128xf32>
    %301 = arith.addf %300, %152 : vector<32x128xf32>
    %c0_96 = arith.constant 0 : index
    %c3_97 = arith.constant 3 : index
    %c0_98 = arith.constant 0 : index
    %c0_99 = arith.constant 0 : index
    %302 = vector.load %arg4[%c0_96, %c3_97, %c0_98, %c0_99] : memref<1x4x32x128xf32, #tpu.memory_space<vmem>>, vector<1x1x32x128xf32>
    %303 = vector.shape_cast %302 : vector<1x1x32x128xf32> to vector<32x128xf32>
    %304 = vector.shape_cast %301 : vector<32x128xf32> to vector<1x1x32x128xf32>
    tpu.vector_store %arg4[%c0_96, %c3_97, %c0_98, %c0_99], %304 {strides = array<i32>} : memref<1x4x32x128xf32, #tpu.memory_space<vmem>>, vector<1x1x32x128xf32>,
    %c0_100 = arith.constant 0 : index
    %c3_101 = arith.constant 3 : index
    %c0_102 = arith.constant 0 : index
    %c0_103 = arith.constant 0 : index
    %305 = vector.load %arg5[%c0_100, %c3_101, %c0_102, %c0_103] : memref<1x4x32x128xf32, #tpu.memory_space<vmem>>, vector<1x1x32x128xf32>
    %306 = vector.shape_cast %305 : vector<1x1x32x128xf32> to vector<32x128xf32>
    %307 = arith.addf %306, %169 : vector<32x128xf32>
    %c0_104 = arith.constant 0 : index
    %c3_105 = arith.constant 3 : index
    %c0_106 = arith.constant 0 : index
    %c0_107 = arith.constant 0 : index
    %308 = vector.load %arg5[%c0_104, %c3_105, %c0_106, %c0_107] : memref<1x4x32x128xf32, #tpu.memory_space<vmem>>, vector<1x1x32x128xf32>
    %309 = vector.shape_cast %308 : vector<1x1x32x128xf32> to vector<32x128xf32>
    %310 = vector.shape_cast %307 : vector<32x128xf32> to vector<1x1x32x128xf32>
    tpu.vector_store %arg5[%c0_104, %c3_105, %c0_106, %c0_107], %310 {strides = array<i32>} : memref<1x4x32x128xf32, #tpu.memory_space<vmem>>, vector<1x1x32x128xf32>,
    %c0_108 = arith.constant 0 : index
    %c3_109 = arith.constant 3 : index
    %c0_110 = arith.constant 0 : index
    %c0_111 = arith.constant 0 : index
    %311 = vector.load %arg6[%c0_108, %c3_109, %c0_110, %c0_111] : memref<1x4x32x128xf32, #tpu.memory_space<vmem>>, vector<1x1x32x128xf32>
    %312 = vector.shape_cast %311 : vector<1x1x32x128xf32> to vector<32x128xf32>
    %313 = arith.addf %312, %244 : vector<32x128xf32>
    %c0_112 = arith.constant 0 : index
    %c3_113 = arith.constant 3 : index
    %c0_114 = arith.constant 0 : index
    %c0_115 = arith.constant 0 : index
    %314 = vector.load %arg6[%c0_112, %c3_113, %c0_114, %c0_115] : memref<1x4x32x128xf32, #tpu.memory_space<vmem>>, vector<1x1x32x128xf32>
    %315 = vector.shape_cast %314 : vector<1x1x32x128xf32> to vector<32x128xf32>
    %316 = vector.shape_cast %313 : vector<32x128xf32> to vector<1x1x32x128xf32>
    tpu.vector_store %arg6[%c0_112, %c3_113, %c0_114, %c0_115], %316 {strides = array<i32>} : memref<1x4x32x128xf32, #tpu.memory_space<vmem>>, vector<1x1x32x128xf32>,
    return
  }
  func.func @transform_0(%arg0: i32, %arg1: i32) -> (i32, i32, i32, i32) {
    %c0_i32 = arith.constant 0 : i32
    %c0_i32_0 = arith.constant 0 : i32
    %c0_i32_1 = arith.constant 0 : i32
    return %arg0, %c0_i32, %arg1, %c0_i32_0 : i32, i32, i32, i32
  }
  func.func @transform_1(%arg0: i32, %arg1: i32) -> (i32, i32, i32, i32) {
    %c0_i32 = arith.constant 0 : i32
    %c0_i32_0 = arith.constant 0 : i32
    %c0_i32_1 = arith.constant 0 : i32
    return %arg0, %c0_i32, %arg1, %c0_i32_0 : i32, i32, i32, i32
  }
  func.func @transform_2(%arg0: i32, %arg1: i32) -> (i32, i32, i32, i32) {
    %c0_i32 = arith.constant 0 : i32
    %c0_i32_0 = arith.constant 0 : i32
    %c0_i32_1 = arith.constant 0 : i32
    %c0_i32_2 = arith.constant 0 : i32
    return %arg0, %c0_i32, %c0_i32_0, %c0_i32_1 : i32, i32, i32, i32
  }
  func.func @transform_3(%arg0: i32, %arg1: i32) -> (i32, i32, i32, i32) {
    %c0_i32 = arith.constant 0 : i32
    %c0_i32_0 = arith.constant 0 : i32
    %c0_i32_1 = arith.constant 0 : i32
    %c0_i32_2 = arith.constant 0 : i32
    return %arg0, %c0_i32, %c0_i32_0, %c0_i32_1 : i32, i32, i32, i32
  }
  func.func @transform_4(%arg0: i32, %arg1: i32) -> (i32, i32, i32, i32) {
    %c0_i32 = arith.constant 0 : i32
    %c0_i32_0 = arith.constant 0 : i32
    %c0_i32_1 = arith.constant 0 : i32
    %c0_i32_2 = arith.constant 0 : i32
    return %arg0, %c0_i32, %c0_i32_0, %c0_i32_1 : i32, i32, i32, i32
  }
}

</mosaic_0001>

<bundles_post_ra>
// kernel: dice_fl_forward.1
= control target key start
LH: loop header
LB: loop body
LE: loop exit
PB: predicated region body
PF: predicated region fallthrough
CT: control target
= control target key end

     0   :  { %s2825_s15 = smov 0   ;;  %s2827_s16 = smov 0   ;;  %s5121_s0 = inlined_call_operand.vmem [shape: f32[2,4,256,128], index: 0, kind: input, shape index: {}]   ;;  %s5122_s1 = inlined_call_operand.vmem [shape: s8[2,1,256,128], index: 1, kind: input, shape index: {}]   ;;  %s5123_s2 = inlined_call_operand.vmem [shape: f32[2,4,32,128], index: 2, kind: output, shape index: {0}]   ;;  %s5124_s3 = inlined_call_operand.vmem [shape: f32[2,4,32,128], index: 3, kind: output, shape index: {1}]   ;;  %s5125_s4 = inlined_call_operand.vmem [shape: f32[2,4,32,128], index: 4, kind: output, shape index: {2}]  }
   0x1   :  { %s2829_s17 = smov 0  }
   0x2 LB: > { %s27_s18 = sadd.s32 1, %s2793_s16  ;;  %p2260_p0 = scmp.ge.s32.totalorder %s2797_s17, 1  ;;  %s2797_s17 = sphi %s2829_s17, %s15_s17   ;;  %s2793_s16 = sphi %s2827_s16, %s6136_s16   ;;  %s2789_s15 = sphi %s2825_s15, %s6135_s15  }
   0x3   : > { %p29_p1 = scmp.ge.s32.totalorder %s27_s18, 2  ;;  %p203_p2 = scmp.lt.s32.totalorder %s2797_s17, 3 }
   0x5   : > { %s6138_s18 = smov (%p29_p1, %s27_s18), 0  ;;  %p204_p3 = pnand %p2260_p0, %p203_p2 }
   0x7   : > { %207 = sbr.rel (%p204_p3) target bundleno = 385 (0x181), region = 28 }
   0xe   : > { %p253_p4 = scmp.lt.s32.totalorder %s2789_s15, 1  ;;  %v5143_v24 = vmov 0.0  }
  0x10   : > { %s6140_s15 = smov (!%p253_p4, %s2789_s15), 1 }
  0x11   : > { %s2569_s19 = sshll.u32 %s6140_s15, 10  ;;  %s2570_s20 = sshll.u32 %s6140_s15, 6 }
  0x12   : > { %s2850_s23 = scalar_lea.vmem %s5122_s1, %s2570_s20  ;;  %s2855_s26 = scalar_lea.vmem %s5121_s0, %s2569_s19 }
  0x13   : > { %v2858_v0 = vld [vmem:[%s2850_s23] sm:$0xff]  ;;  %v2861_v1 = vld [vmem:[%s2850_s23 + $0x8] sm:$0xff]  ;;  %v2864_v2 = vld [vmem:[%s2850_s23 + $0x10] sm:$0xff]  ;;  %s3190_s27 = sshll.u32 %s6140_s15, 7 }
  0x14   : > { %v2867_v3 = vld [vmem:[%s2850_s23 + $0x18] sm:$0xff]  ;;  %v2870_v4 = vld [vmem:[%s2850_s23 + $0x20] sm:$0xff]  ;;  %v2873_v5 = vld [vmem:[%s2850_s23 + $0x28] sm:$0xff]  ;;  %v2876_v6 = vunpack.c.0.s8 %v2858_v0  ;;  %v2879_v7 = vunpack.c.0.s8 %v2861_v1  ;;  %v2882_v8 = vunpack.c.0.s8 %v2864_v2  ;;  %v2885_v9 = vunpack.c.1.s8 %v2858_v0  ;;  %s3206_s30 = scalar_lea.vmem %s5123_s2, %s3190_s27  ;;  %s4356_s7 = scalar_lea.vmem %s5124_s3, %s3190_s27 }
  0x15   : > { %v2888_v10 = vld [vmem:[%s2850_s23 + $0x30] sm:$0xff]  ;;  %v2891_v11 = vld [vmem:[%s2850_s23 + $0x38] sm:$0xff]  ;;  %v2894_v12 = vunpack.c.0.s8 %v2867_v3  ;;  %v2897_v13 = vunpack.c.0.s8 %v2870_v4  ;;  %v2900_v14 = vunpack.c.0.s8 %v2873_v5  ;;  %v2903_v15 = vunpack.c.1.s8 %v2861_v1  ;;  %v379_v18 = vld [vmem:[%s2855_s26] sm:$0xff]  ;;  %s4480_s10 = scalar_lea.vmem %s5125_s4, %s3190_s27 }
  0x16   : > { %v2906_v16 = vunpack.c.0.s8 %v2888_v10  ;;  %v2909_v17 = vunpack.c.0.s8 %v2891_v11  ;;  %v383_v19 = vld [vmem:[%s2855_s26 + $0x20] sm:$0xff]  ;;  %vm411_vm0 = vcmp.eq.s32.totalorder %v2876_v6, 0  ;;  %vm415_vm1 = vcmp.eq.s32.totalorder %v2879_v7, 0 }
  0x17   : > { %v387_v20 = vld [vmem:[%s2855_s26 + $0x40] sm:$0xff]  ;;  %vm419_vm2 = vcmp.eq.s32.totalorder %v2882_v8, 0  ;;  %vm423_vm3 = vcmp.eq.s32.totalorder %v2894_v12, 0  ;;  %vm427_vm4 = vcmp.eq.s32.totalorder %v2897_v13, 0  ;;  %vm431_vm5 = vcmp.eq.s32.totalorder %v2900_v14, 0 }
  0x18   : > { %v391_v21 = vld [vmem:[%s2855_s26 + $0x60] sm:$0xff]  ;;  %vm435_vm6 = vcmp.eq.s32.totalorder %v2906_v16, 0  ;;  %vm439_vm7 = vcmp.eq.s32.totalorder %v2909_v17, 0  ;;  %v2926_v25 = vsel %vm411_vm0, 1.0, %v5143_v24  ;;  %v2929_v26 = vsel %vm415_vm1, 1.0, %v5143_v24 }
  0x19   : > { %v395_v22 = vld [vmem:[%s2855_s26 + $0x80] sm:$0xff]  ;;  %v2934_v29 = vsel %vm419_vm2, 1.0, %v5143_v24  ;;  %v2937_v30 = vsel %vm423_vm3, 1.0, %v5143_v24  ;;  %v2940_v31 = vsel %vm427_vm4, 1.0, %v5143_v24  ;;  %v2943_v32 = vsel %vm431_vm5, 1.0, %v5143_v24 }
  0x1a   : > { %v399_v23 = vld [vmem:[%s2855_s26 + $0xa0] sm:$0xff]  ;;  %v2946_v33 = vsel %vm435_vm6, 1.0, %v5143_v24  ;;  %v2949_v34 = vsel %vm439_vm7, 1.0, %v5143_v24  ;;  %v507_v35 = vmul.f32 %v2926_v25, %v379_v18  ;;  %v511_v36 = vmul.f32 %v2929_v26, %v383_v19 }
  0x1b   : > { %v403_v27 = vld [vmem:[%s2855_s26 + $0xc0] sm:$0xff]  ;;  %v515_v37 = vmul.f32 %v2934_v29, %v387_v20  ;;  %v519_v38 = vmul.f32 %v2937_v30, %v391_v21  ;;  %v523_v39 = vmul.f32 %v2940_v31, %v395_v22  ;;  %v527_v40 = vmul.f32 %v2943_v32, %v399_v23 }
  0x1c   : > { %v407_v28 = vld [vmem:[%s2855_s26 + $0xe0] sm:$0xff]  ;;  %v531_v41 = vmul.f32 %v2946_v33, %v403_v27  ;;  %v539_v43 = vadd.f32 %v511_v36, %v507_v35  ;;  %vm668_vm8 = vcmp.eq.s32.totalorder %v2876_v6, 1  ;;  %vm672_vm9 = vcmp.eq.s32.totalorder %v2879_v7, 1 }
  0x1d   : > { %v535_v42 = vmul.f32 %v2949_v34, %v407_v28  ;;  %v543_v44 = vadd.f32 %v519_v38, %v515_v37  ;;  %v547_v45 = vadd.f32 %v527_v40, %v523_v39  ;;  %vm676_vm10 = vcmp.eq.s32.totalorder %v2882_v8, 1  ;;  %v2303_v47 = vld [vmem:[%s2855_s26 + $0x100] sm:$0xff] }
  0x1e   : > { %vm680_vm11 = vcmp.eq.s32.totalorder %v2894_v12, 1  ;;  %vm684_vm12 = vcmp.eq.s32.totalorder %v2897_v13, 1  ;;  %vm688_vm13 = vcmp.eq.s32.totalorder %v2900_v14, 1  ;;  %v2307_v49 = vld [vmem:[%s2855_s26 + $0x120] sm:$0xff]  ;;  %vm692_vm14 = vcmp.eq.s32.totalorder %v2906_v16, 1 }
  0x1f   : > { %v551_v46 = vadd.f32 %v535_v42, %v531_v41  ;;  %v555_v48 = vadd.f32 %v543_v44, %v539_v43  ;;  %v2311_v50 = vld [vmem:[%s2855_s26 + $0x140] sm:$0xff]  ;;  %vm696_vm15 = vcmp.eq.s32.totalorder %v2909_v17, 1  ;;  %v2974_v52 = vsel %vm668_vm8, 1.0, %v5143_v24 }
  0x20   : > { %v2315_v51 = vld [vmem:[%s2855_s26 + $0x160] sm:$0xff]  ;;  %5490 = vst [vmem:[#allocation2_spill] sm:$0xff] %v2974_v52  ;;  %v2982_v57 = vsel %vm672_vm9, 1.0, %v5143_v24  ;;  %v2987_v58 = vsel %vm676_vm10, 1.0, %v5143_v24  ;;  %v2992_v59 = vsel %vm680_vm11, 1.0, %v5143_v24  ;;  %v2998_v61 = vsel %vm684_vm12, 1.0, %v5143_v24 }
  0x21   : > { %v559_v53 = vadd.f32 %v551_v46, %v547_v45  ;;  %v2319_v54 = vld [vmem:[%s2855_s26 + $0x180] sm:$0xff]  ;;  %5491 = vst [vmem:[#allocation3_spill] sm:$0xff] %v2982_v57  ;;  %5492 = vst [vmem:[#allocation4_spill] sm:$0xff] %v2987_v58  ;;  %v3003_v62 = vsel %vm688_vm13, 1.0, %v5143_v24  ;;  %v3006_v63 = vsel %vm692_vm14, 1.0, %v5143_v24  ;;  %v3009_v18 = vsel %vm696_vm15, 1.0, %v5143_v24 }
  0x22   : > { %v2323_v55 = vld [vmem:[%s2855_s26 + $0x1a0] sm:$0xff]  ;;  %5493 = vst [vmem:[#allocation5_spill] sm:$0xff] %v2992_v59  ;;  %5494 = vst [vmem:[#allocation6_spill] sm:$0xff] %v2998_v61  ;;  %v3014_v20 = vmul.f32 %v2974_v52, %v2303_v47  ;;  %v3017_v21 = vmul.f32 %v2982_v57, %v2307_v49  ;;  %v3020_v22 = vmul.f32 %v2987_v58, %v2311_v50  ;;  %vm957_vm0 = vcmp.eq.s32.totalorder %v2876_v6, 2 }
  0x23   : > { %v2327_v56 = vld [vmem:[%s2855_s26 + $0x1c0] sm:$0xff]  ;;  %5495 = vst [vmem:[#allocation7_spill] sm:$0xff] %v3003_v62  ;;  %5496 = vst [vmem:[#allocation8_spill] sm:$0xff] %v3006_v63  ;;  %v3011_v19 = vadd.f32 %v559_v53, %v555_v48  ;;  %v3023_v23 = vmul.f32 %v2992_v59, %v2315_v51  ;;  %v3026_v27 = vmul.f32 %v2998_v61, %v2319_v54  ;;  %vm961_vm1 = vcmp.eq.s32.totalorder %v2879_v7, 2 }
  0x24   : > { %v2331_v60 = vld [vmem:[%s2855_s26 + $0x1e0] sm:$0xff]  ;;  %5497 = vst [vmem:[#allocation9_spill] sm:$0xff] %v3009_v18  ;;  %5498 = vst [vmem:[#allocation10_spill] sm:$0xff] %v3014_v20  ;;  %v3029_v28 = vmul.f32 %v3003_v62, %v2323_v55  ;;  %v3032_v43 = vmul.f32 %v3006_v63, %v2327_v56  ;;  %v796_v45 = vadd.f32 %v3014_v20, %v507_v35  ;;  %vm965_vm2 = vcmp.eq.s32.totalorder %v2882_v8, 2 }
  0x25   : > { %5499 = vst [vmem:[#allocation11_spill] sm:$0xff] %v3017_v21  ;;  %5500 = vst [vmem:[#allocation12_spill] sm:$0xff] %v3020_v22  ;;  %v3035_v44 = vmul.f32 %v3009_v18, %v2331_v60  ;;  %v800_v46 = vadd.f32 %v3017_v21, %v511_v36  ;;  %v804_v47 = vadd.f32 %v3020_v22, %v515_v37  ;;  %v2367_v54 = vld [vmem:[%s2855_s26 + $0x200] sm:$0xff]  ;;  %vm969_vm3 = vcmp.eq.s32.totalorder %v2894_v12, 2  ;;  %v2312_v22 = vld [vmem:[%s2855_s26 + $0x148] sm:$0xff] }
  0x26   : > { %5501 = vst [vmem:[#allocation13_spill] sm:$0xff] %v3023_v23  ;;  %5502 = vst [vmem:[#allocation14_spill] sm:$0xff] %v3026_v27  ;;  %v808_v48 = vadd.f32 %v3023_v23, %v519_v38  ;;  %v812_v49 = vadd.f32 %v3026_v27, %v523_v39  ;;  %v816_v50 = vadd.f32 %v3029_v28, %v527_v40  ;;  %v2371_v55 = vld [vmem:[%s2855_s26 + $0x220] sm:$0xff]  ;;  %vm973_vm4 = vcmp.eq.s32.totalorder %v2897_v13, 2  ;;  %v2308_v23 = vld [vmem:[%s2855_s26 + $0x128] sm:$0xff] }
  0x27   : > { %5503 = vst [vmem:[#allocation15_spill] sm:$0xff] %v3029_v28  ;;  %5504 = vst [vmem:[#allocation16_spill] sm:$0xff] %v3032_v43  ;;  %v820_v51 = vadd.f32 %v3032_v43, %v531_v41  ;;  %v824_v53 = vadd.f32 %v3035_v44, %v535_v42  ;;  %v2375_v56 = vld [vmem:[%s2855_s26 + $0x240] sm:$0xff]  ;;  %vm977_vm5 = vcmp.eq.s32.totalorder %v2900_v14, 2  ;;  %vm981_vm6 = vcmp.eq.s32.totalorder %v2906_v16, 2 }
  0x28   : > { %5505 = vst [vmem:[#allocation17_spill] sm:$0xff] %v3035_v44  ;;  %v2379_v35 = vld [vmem:[%s2855_s26 + $0x260] sm:$0xff]  ;;  %vm985_vm7 = vcmp.eq.s32.totalorder %v2909_v17, 2  ;;  %v3061_v39 = vsel %vm957_vm0, 1.0, %v5143_v24  ;;  %v3064_v40 = vsel %vm961_vm1, 1.0, %v5143_v24  ;;  %v3067_v41 = vsel %vm965_vm2, 1.0, %v5143_v24  ;;  %1958 = vst [vmem:[%s3206_s30] sm:$0xff] %v3011_v19 }
  0x29   : > { %v2383_v36 = vld [vmem:[%s2855_s26 + $0x280] sm:$0xff]  ;;  %5506 = vst [vmem:[#allocation18_spill] sm:$0xff] %v3061_v39  ;;  %5507 = vst [vmem:[#allocation19_spill] sm:$0xff] %v3064_v40  ;;  %v3071_v60 = vsel %vm969_vm3, 1.0, %v5143_v24  ;;  %v3074_v18 = vsel %vm973_vm4, 1.0, %v5143_v24  ;;  %v3077_v63 = vsel %vm977_vm5, 1.0, %v5143_v24  ;;  %v3086_v59 = vmul.f32 %v3061_v39, %v2367_v54 }
  0x2a   : > { %v2387_v37 = vld [vmem:[%s2855_s26 + $0x2a0] sm:$0xff]  ;;  %5508 = vst [vmem:[#allocation20_spill] sm:$0xff] %v3067_v41  ;;  %5509 = vst [vmem:[#allocation21_spill] sm:$0xff] %v3071_v60  ;;  %v3080_v62 = vsel %vm981_vm6, 1.0, %v5143_v24  ;;  %v3083_v61 = vsel %vm985_vm7, 1.0, %v5143_v24  ;;  %v3089_v58 = vmul.f32 %v3064_v40, %v2371_v55  ;;  %v3092_v57 = vmul.f32 %v3067_v41, %v2375_v56  ;;  %v392_v19 = vld [vmem:[%s2855_s26 + $0x68] sm:$0xff] }
  0x2b   : > { %v2391_v38 = vld [vmem:[%s2855_s26 + $0x2c0] sm:$0xff]  ;;  %5510 = vst [vmem:[#allocation22_spill] sm:$0xff] %v3074_v18  ;;  %5511 = vst [vmem:[#allocation23_spill] sm:$0xff] %v3077_v63  ;;  %v3095_v52 = vmul.f32 %v3071_v60, %v2379_v35  ;;  %v3098_v44 = vmul.f32 %v3074_v18, %v2383_v36  ;;  %v3101_v24 = vmul.f32 %v3077_v63, %v2387_v37  ;;  %vm1246_vm8 = vcmp.eq.s32.totalorder %v2876_v6, 3 }
  0x2c   : > { %v2395_v42 = vld [vmem:[%s2855_s26 + $0x2e0] sm:$0xff]  ;;  %5512 = vst [vmem:[#allocation24_spill] sm:$0xff] %v3080_v62  ;;  %5513 = vst [vmem:[#allocation25_spill] sm:$0xff] %v3083_v61  ;;  %v3104_v54 = vmul.f32 %v3080_v62, %v2391_v38  ;;  %v1085_v56 = vadd.f32 %v3086_v59, %v796_v45  ;;  %v1089_v41 = vadd.f32 %v3089_v58, %v800_v46  ;;  %vm1250_vm9 = vcmp.eq.s32.totalorder %v2879_v7, 3 }
  0x2d   : > { %5514 = vst [vmem:[#allocation26_spill] sm:$0xff] %v3086_v59  ;;  %5515 = vst [vmem:[#allocation27_spill] sm:$0xff] %v3089_v58  ;;  %v3107_v55 = vmul.f32 %v3083_v61, %v2395_v42  ;;  %v1093_v35 = vadd.f32 %v3092_v57, %v804_v47  ;;  %v1097_v36 = vadd.f32 %v3095_v52, %v808_v48  ;;  %v2431_v61 = vld [vmem:[%s2855_s26 + $0x300] sm:$0xff]  ;;  %vm1254_vm10 = vcmp.eq.s32.totalorder %v2882_v8, 3 }
  0x2e   : > { %5516 = vst [vmem:[#allocation28_spill] sm:$0xff] %v3092_v57  ;;  %5517 = vst [vmem:[#allocation29_spill] sm:$0xff] %v3095_v52  ;;  %v1101_v18 = vadd.f32 %v3098_v44, %v812_v49  ;;  %v1105_v37 = vadd.f32 %v3101_v24, %v816_v50  ;;  %v1109_v38 = vadd.f32 %v3104_v54, %v820_v51  ;;  %v2435_v62 = vld [vmem:[%s2855_s26 + $0x320] sm:$0xff]  ;;  %vm1258_vm11 = vcmp.eq.s32.totalorder %v2894_v12, 3 }
  0x2f   : > { %5518 = vst [vmem:[#allocation30_spill] sm:$0xff] %v3098_v44  ;;  %5519 = vst [vmem:[#allocation31_spill] sm:$0xff] %v3101_v24  ;;  %v1113_v42 = vadd.f32 %v3107_v55, %v824_v53  ;;  %v2439_v63 = vld [vmem:[%s2855_s26 + $0x340] sm:$0xff]  ;;  %vm1262_vm12 = vcmp.eq.s32.totalorder %v2897_v13, 3  ;;  %vm1266_vm13 = vcmp.eq.s32.totalorder %v2900_v14, 3  ;;  %vm1270_vm14 = vcmp.eq.s32.totalorder %v2906_v16, 3 }
  0x30   : > { %5520 = vst [vmem:[#allocation32_spill] sm:$0xff] %v3104_v54  ;;  %5521 = vst [vmem:[#allocation33_spill] sm:$0xff] %v3107_v55  ;;  %v2443_v45 = vld [vmem:[%s2855_s26 + $0x360] sm:$0xff]  ;;  %vm1274_vm15 = vcmp.eq.s32.totalorder %v2909_v17, 3  ;;  %v5522_v49 = vmov 0.0   ;;  %vm412_vm0 = vcmp.eq.s32.totalorder %v2885_v9, 0 }
  0x31   : > { %v2447_v46 = vld [vmem:[%s2855_s26 + $0x380] sm:$0xff]  ;;  %v3133_v6 = vsel %vm1246_vm8, 1.0, %v5522_v49  ;;  %v3136_v7 = vsel %vm1250_vm9, 1.0, %v5522_v49  ;;  %v3139_v8 = vsel %vm1254_vm10, 1.0, %v5522_v49  ;;  %v3143_v13 = vsel %vm1258_vm11, 1.0, %v5522_v49 }
  0x32   : > { %v2451_v47 = vld [vmem:[%s2855_s26 + $0x3a0] sm:$0xff]  ;;  %5523 = vst [vmem:[#allocation34_spill] sm:$0xff] %v3133_v6  ;;  %5524 = vst [vmem:[#allocation35_spill] sm:$0xff] %v3136_v7  ;;  %v3146_v14 = vsel %vm1262_vm12, 1.0, %v5522_v49  ;;  %v3149_v16 = vsel %vm1266_vm13, 1.0, %v5522_v49  ;;  %v3152_v17 = vsel %vm1270_vm14, 1.0, %v5522_v49  ;;  %v3158_v51 = vmul.f32 %v3133_v6, %v2431_v61 }
  0x33   : > { %v2455_v48 = vld [vmem:[%s2855_s26 + $0x3c0] sm:$0xff]  ;;  %5525 = vst [vmem:[#allocation36_spill] sm:$0xff] %v3139_v8  ;;  %5526 = vst [vmem:[#allocation37_spill] sm:$0xff] %v3143_v13  ;;  %v3155_v50 = vsel %vm1274_vm15, 1.0, %v5522_v49  ;;  %v3161_v53 = vmul.f32 %v3136_v7, %v2435_v62  ;;  %v3164_v60 = vmul.f32 %v3139_v8, %v2439_v63  ;;  %v3167_v40 = vmul.f32 %v3143_v13, %v2443_v45 }
  0x34   : > { %v2459_v12 = vld [vmem:[%s2855_s26 + $0x3e0] sm:$0xff]  ;;  %5527 = vst [vmem:[#allocation38_spill] sm:$0xff] %v3146_v14  ;;  %5528 = vst [vmem:[#allocation39_spill] sm:$0xff] %v3149_v16  ;;  %v3170_v39 = vmul.f32 %v3146_v14, %v2447_v46  ;;  %v3173_v55 = vmul.f32 %v3149_v16, %v2451_v47  ;;  %v3176_v54 = vmul.f32 %v3152_v17, %v2455_v48  ;;  %vm416_vm1 = vcmp.eq.s32.totalorder %v2903_v15, 0 }
  0x35   : > { %5529 = vst [vmem:[#allocation40_spill] sm:$0xff] %v3152_v17  ;;  %5530 = vst [vmem:[#allocation41_spill] sm:$0xff] %v3155_v50  ;;  %v3179_v61 = vmul.f32 %v3155_v50, %v2459_v12  ;;  %v1374_v62 = vadd.f32 %v3158_v51, %v1085_v56  ;;  %v1378_v63 = vadd.f32 %v3161_v53, %v1089_v41  ;;  %vm669_vm8 = vcmp.eq.s32.totalorder %v2885_v9, 1 }
  0x36   : > { %5531 = vst [vmem:[#allocation42_spill] sm:$0xff] %v3158_v51  ;;  %5532 = vst [vmem:[#allocation43_spill] sm:$0xff] %v3161_v53  ;;  %v1382_v45 = vadd.f32 %v3164_v60, %v1093_v35  ;;  %v1386_v13 = vadd.f32 %v3167_v40, %v1097_v36  ;;  %v1390_v46 = vadd.f32 %v3170_v39, %v1101_v18  ;;  %vm673_vm9 = vcmp.eq.s32.totalorder %v2903_v15, 1 }
  0x37   : > { %5533 = vst [vmem:[#allocation44_spill] sm:$0xff] %v3164_v60  ;;  %5534 = vst [vmem:[#allocation45_spill] sm:$0xff] %v3167_v40  ;;  %v1394_v47 = vadd.f32 %v3173_v55, %v1105_v37  ;;  %v1398_v16 = vadd.f32 %v3176_v54, %v1109_v38  ;;  %v1402_v48 = vadd.f32 %v3179_v61, %v1113_v42  ;;  %v1502_v17 = vsub.f32 1.0, %v1374_v62 }
  0x38   : > { %5535 = vst [vmem:[#allocation46_spill] sm:$0xff] %v3170_v39  ;;  %5536 = vst [vmem:[#allocation47_spill] sm:$0xff] %v3173_v55  ;;  %v1506_v12 = vsub.f32 1.0, %v1378_v63  ;;  %v1510_v50 = vsub.f32 1.0, %v1382_v45  ;;  %v1514_v14 = vsub.f32 1.0, %v1386_v13  ;;  %v1518_v8 = vsub.f32 1.0, %v1390_v46 }
  0x39   : > { %5537 = vst [vmem:[#allocation48_spill] sm:$0xff] %v3176_v54  ;;  %5538 = vst [vmem:[#allocation49_spill] sm:$0xff] %v3179_v61  ;;  %v1522_v56 = vsub.f32 1.0, %v1394_v47  ;;  %v1526_v7 = vsub.f32 1.0, %v1398_v16  ;;  %v1530_v41 = vsub.f32 1.0, %v1402_v48  ;;  %v3192_v18 = vmul.f32 %v1502_v17, %v1502_v17 }
  0x3a   : > { %v1534_v35 = vmax.f32 %v1374_v62, 1e-30  ;;  %v1538_v36 = vmax.f32 %v1378_v63, 1e-30  ;;  %v1542_v37 = vmax.f32 %v1382_v45, 1e-30  ;;  %v3194_v54 = vmul.f32 %v1506_v12, %v1506_v12 }
  0x3b   : > { %5539 = vst [vmem:[#allocation50_spill] sm:$0xff] %v3192_v18  ;;  %v1546_v6 = vmax.f32 %v1386_v13, 1e-30  ;;  %v1550_v38 = vmax.f32 %v1390_v46, 1e-30  ;;  %v3196_v39 = vmul.f32 %v1510_v50, %v1510_v50  ;;  %v3198_v40 = vmul.f32 %v1514_v14, %v1514_v14  ;;  %v380_v63 = vld [vmem:[%s2855_s26 + $0x8] sm:$0xff] }
  0x3c   : > { %5540 = vst [vmem:[#allocation51_spill] sm:$0xff] %v3194_v54  ;;  %v1554_v42 = vmax.f32 %v1394_v47, 1e-30  ;;  %v1558_v61 = vmax.f32 %v1398_v16, 1e-30  ;;  %2599 = vlog2.f32 %v1534_v35  ;;  %v3200_v60 = vmul.f32 %v1518_v8, %v1518_v8  ;;  %v384_v45 = vld [vmem:[%s2855_s26 + $0x28] sm:$0xff] }
  0x3d   : > { %v1562_v55 = vmax.f32 %v1402_v48, 1e-30  ;;  %2601 = vlog2.f32 %v1538_v36  ;;  %5541 = vst [vmem:[#allocation52_spill] sm:$0xff] %v3196_v39  ;;  %5542 = vst [vmem:[#allocation53_spill] sm:$0xff] %v3198_v40  ;;  %v3208_v13 = vmul.f32 %v1522_v56, %v1522_v56  ;;  %v3210_v16 = vmul.f32 %v1526_v7, %v1526_v7  ;;  %v388_v46 = vld [vmem:[%s2855_s26 + $0x48] sm:$0xff] }
  0x3e   : > { %5543 = vst [vmem:[#allocation54_spill] sm:$0xff] %v3200_v60  ;;  %2603 = vlog2.f32 %v1542_v37  ;;  %v3212_v17 = vmul.f32 %v1530_v41, %v1530_v41  ;;  %v3215_v8 = vunpack.c.1.s8 %v2864_v2  ;;  %v3218_v14 = vunpack.c.1.s8 %v2867_v3  ;;  %v396_v47 = vld [vmem:[%s2855_s26 + $0x88] sm:$0xff] }
  0x3f   : > { %5544 = vst [vmem:[#allocation55_spill] sm:$0xff] %v3208_v13  ;;  %5545 = vst [vmem:[#allocation56_spill] sm:$0xff] %v3210_v16  ;;  %2605 = vlog2.f32 %v1546_v6  ;;  %v3221_v50 = vunpack.c.1.s8 %v2870_v4  ;;  %v3224_v62 = vunpack.c.1.s8 %v2873_v5  ;;  %v3227_v7 = vunpack.c.1.s8 %v2888_v10  ;;  %v400_v48 = vld [vmem:[%s2855_s26 + $0xa8] sm:$0xff] }
  0x40   : > { %5546 = vst [vmem:[#allocation57_spill] sm:$0xff] %v3212_v17  ;;  %2607 = vlog2.f32 %v1550_v38  ;;  %v3232_v6 = vunpack.c.1.s8 %v2891_v11  ;;  %vm420_vm2 = vcmp.eq.s32.totalorder %v3215_v8, 0  ;;  %vm424_vm3 = vcmp.eq.s32.totalorder %v3218_v14, 0  ;;  %v408_v12 = vld [vmem:[%s2855_s26 + $0xe8] sm:$0xff] }
  0x41   : > { %2609 = vlog2.f32 %v1554_v42  ;;  %vm428_vm4 = vcmp.eq.s32.totalorder %v3221_v50, 0  ;;  %vm432_vm5 = vcmp.eq.s32.totalorder %v3224_v62, 0  ;;  %vm436_vm6 = vcmp.eq.s32.totalorder %v3227_v7, 0  ;;  %v2316_v17 = vld [vmem:[%s2855_s26 + $0x168] sm:$0xff] }
  0x42   : > { %2611 = vlog2.f32 %v1558_v61  ;;  %vm440_vm7 = vcmp.eq.s32.totalorder %v3232_v6, 0  ;;  %v404_v61 = vld [vmem:[%s2855_s26 + $0xc8] sm:$0xff]  ;;  %v3253_v56 = vsel %vm412_vm0, 1.0, %v5522_v49  ;;  %v3261_v41 = vsel %vm420_vm2, 1.0, %v5522_v49 }
  0x43   : > { %2613 = vlog2.f32 %v1562_v55  ;;  %v3258_v55 = vsel %vm416_vm1, 1.0, %v5522_v49  ;;  %v3264_v35 = vsel %vm424_vm3, 1.0, %v5522_v49  ;;  %v3267_v36 = vsel %vm428_vm4, 1.0, %v5522_v49  ;;  %v2320_v16 = vld [vmem:[%s2855_s26 + $0x188] sm:$0xff] }
  0x44   : > { %v3270_v37 = vsel %vm432_vm5, 1.0, %v5522_v49  ;;  %v3273_v38 = vsel %vm436_vm6, 1.0, %v5522_v49  ;;  %v3276_v42 = vsel %vm440_vm7, 1.0, %v5522_v49  ;;  %v508_v51 = vmul.f32 %v3253_v56, %v380_v63  ;;  %v2324_v13 = vld [vmem:[%s2855_s26 + $0x1a8] sm:$0xff] }
  0x45   : > { %v512_v24 = vmul.f32 %v3258_v55, %v384_v45  ;;  %v516_v44 = vmul.f32 %v3261_v41, %v388_v46  ;;  %v520_v52 = vmul.f32 %v3264_v35, %v392_v19  ;;  %v524_v58 = vmul.f32 %v3267_v36, %v396_v47  ;;  %v2328_v40 = vld [vmem:[%s2855_s26 + $0x1c8] sm:$0xff] }
  0x46   : > { %v3278_v53 = vpop.eup %2599  ;;  %v528_v59 = vmul.f32 %v3270_v37, %v400_v48  ;;  %v532_v43 = vmul.f32 %v3273_v38, %v404_v61  ;;  %v536_v28 = vmul.f32 %v3276_v42, %v408_v12  ;;  %vm677_vm10 = vcmp.eq.s32.totalorder %v3215_v8, 1  ;;  %v2304_v12 = vld [vmem:[%s2855_s26 + $0x108] sm:$0xff] }
  0x47   : > { %5547 = vst [vmem:[#allocation58_spill] sm:$0xff] %v3278_v53  ;;  %v3284_v57 = vpop.eup %2601  ;;  %v540_v45 = vadd.f32 %v512_v24, %v508_v51  ;;  %v544_v27 = vadd.f32 %v520_v52, %v516_v44  ;;  %vm681_vm11 = vcmp.eq.s32.totalorder %v3218_v14, 1  ;;  %vm685_vm12 = vcmp.eq.s32.totalorder %v3221_v50, 1  ;;  %v2332_v39 = vld [vmem:[%s2855_s26 + $0x1e8] sm:$0xff] }
  0x48   : > { %5548 = vst [vmem:[#allocation59_spill] sm:$0xff] %v3284_v57  ;;  %v3290_v63 = vpop.eup %2603  ;;  %v548_v19 = vadd.f32 %v528_v59, %v524_v58  ;;  %v552_v47 = vadd.f32 %v536_v28, %v532_v43  ;;  %vm689_vm13 = vcmp.eq.s32.totalorder %v3224_v62, 1  ;;  %vm693_vm14 = vcmp.eq.s32.totalorder %v3227_v7, 1 }
  0x49   : > { %5549 = vst [vmem:[#allocation60_spill] sm:$0xff] %v3290_v63  ;;  %v3294_v46 = vpop.eup %2605  ;;  %v556_v61 = vadd.f32 %v544_v27, %v540_v45  ;;  %vm697_vm15 = vcmp.eq.s32.totalorder %v3232_v6, 1  ;;  %v3315_v27 = vsel %vm669_vm8, 1.0, %v5522_v49  ;;  %v3320_v45 = vsel %vm673_vm9, 1.0, %v5522_v49 }
  0x4a   : > { %5550 = vst [vmem:[#allocation61_spill] sm:$0xff] %v3294_v46  ;;  %v3298_v48 = vpop.eup %2607  ;;  %v560_v20 = vadd.f32 %v552_v47, %v548_v19  ;;  %5553 = vst [vmem:[#allocation64_spill] sm:$0xff] %v3315_v27  ;;  %v3329_v19 = vsel %vm677_vm10, 1.0, %v5522_v49  ;;  %v3334_v47 = vsel %vm681_vm11, 1.0, %v5522_v49  ;;  %v3339_v54 = vsel %vm685_vm12, 1.0, %v5522_v49 }
  0x4b   : > { %5551 = vst [vmem:[#allocation62_spill] sm:$0xff] %v3298_v48  ;;  %v3306_v21 = vpop.eup %2609  ;;  %5554 = vst [vmem:[#allocation65_spill] sm:$0xff] %v3320_v45  ;;  %v3344_v18 = vsel %vm689_vm13, 1.0, %v5522_v49  ;;  %v3353_v48 = vsel %vm693_vm14, 1.0, %v5522_v49  ;;  %v3356_v46 = vsel %vm697_vm15, 1.0, %v5522_v49  ;;  %v3359_v63 = vmul.f32 %v3315_v27, %v2304_v12 }
  0x4c   : > { %5552 = vst [vmem:[#allocation63_spill] sm:$0xff] %v3306_v21  ;;  %v3322_v60 = vpop.eup %2611  ;;  %5556 = vst [vmem:[#allocation67_spill] sm:$0xff] %v3329_v19  ;;  %v3348_v21 = vadd.f32 %v560_v20, %v556_v61  ;;  %v3362_v57 = vmul.f32 %v3320_v45, %v2308_v23  ;;  %v3368_v20 = vmul.f32 %v3334_v47, %v2316_v17  ;;  %vm958_vm0 = vcmp.eq.s32.totalorder %v2885_v9, 2 }
  0x4d   : > { %5555 = vst [vmem:[#allocation66_spill] sm:$0xff] %v3322_v60  ;;  %5557 = vst [vmem:[#allocation68_spill] sm:$0xff] %v3334_v47  ;;  %v3346_v60 = vpop.eup %2613  ;;  %v3371_v61 = vmul.f32 %v3339_v54, %v2320_v16  ;;  %v3374_v53 = vmul.f32 %v3344_v18, %v2324_v13  ;;  %v3377_v12 = vmul.f32 %v3353_v48, %v2328_v40  ;;  %vm962_vm1 = vcmp.eq.s32.totalorder %v2903_v15, 2 }
  0x4e   : > { %5558 = vst [vmem:[#allocation69_spill] sm:$0xff] %v3339_v54  ;;  %5559 = vst [vmem:[#allocation70_spill] sm:$0xff] %v3344_v18  ;;  %v3380_v23 = vmul.f32 %v3356_v46, %v2332_v39  ;;  %v809_v16 = vadd.f32 %v3368_v20, %v520_v52  ;;  %v2368_v39 = vld [vmem:[%s2855_s26 + $0x208] sm:$0xff]  ;;  %vm966_vm2 = vcmp.eq.s32.totalorder %v3215_v8, 2  ;;  %vm970_vm3 = vcmp.eq.s32.totalorder %v3218_v14, 2 }
  0x4f   : > { %5560 = vst [vmem:[#allocation71_spill] sm:$0xff] %v3346_v60  ;;  %5561 = vst [vmem:[#allocation72_spill] sm:$0xff] %v3353_v48  ;;  %v3365_v60 = vmul.f32 %v3329_v19, %v2312_v22  ;;  %v797_v22 = vadd.f32 %v3359_v63, %v508_v51  ;;  %v801_v19 = vadd.f32 %v3362_v57, %v512_v24  ;;  %v2372_v51 = vld [vmem:[%s2855_s26 + $0x228] sm:$0xff]  ;;  %vm974_vm4 = vcmp.eq.s32.totalorder %v3221_v50, 2 }
  0x50   : > { %5562 = vst [vmem:[#allocation73_spill] sm:$0xff] %v3356_v46  ;;  %5563 = vst [vmem:[#allocation74_spill] sm:$0xff] %v3359_v63  ;;  %v813_v54 = vadd.f32 %v3371_v61, %v524_v58  ;;  %v817_v13 = vadd.f32 %v3374_v53, %v528_v59  ;;  %v821_v40 = vadd.f32 %v3377_v12, %v532_v43  ;;  %v2376_v24 = vld [vmem:[%s2855_s26 + $0x248] sm:$0xff]  ;;  %vm978_vm5 = vcmp.eq.s32.totalorder %v3224_v62, 2 }
  0x51   : > { %5564 = vst [vmem:[#allocation75_spill] sm:$0xff] %v3362_v57  ;;  %5565 = vst [vmem:[#allocation76_spill] sm:$0xff] %v3365_v60  ;;  %v805_v17 = vadd.f32 %v3365_v60, %v516_v44  ;;  %v825_v48 = vadd.f32 %v3380_v23, %v536_v28  ;;  %v2380_v46 = vld [vmem:[%s2855_s26 + $0x268] sm:$0xff]  ;;  %vm982_vm6 = vcmp.eq.s32.totalorder %v3227_v7, 2  ;;  %vm986_vm7 = vcmp.eq.s32.totalorder %v3232_v6, 2 }
  0x52   : > { %5566 = vst [vmem:[#allocation77_spill] sm:$0xff] %v3368_v20  ;;  %5567 = vst [vmem:[#allocation78_spill] sm:$0xff] %v3371_v61  ;;  %v2384_v52 = vld [vmem:[%s2855_s26 + $0x288] sm:$0xff]  ;;  %v3405_v59 = vsel %vm958_vm0, 1.0, %v5522_v49  ;;  %v3410_v44 = vsel %vm962_vm1, 1.0, %v5522_v49  ;;  %v3413_v18 = vsel %vm966_vm2, 1.0, %v5522_v49 }
  0x53   : > { %5568 = vst [vmem:[#allocation79_spill] sm:$0xff] %v3374_v53  ;;  %5569 = vst [vmem:[#allocation80_spill] sm:$0xff] %v3377_v12  ;;  %v2388_v58 = vld [vmem:[%s2855_s26 + $0x2a8] sm:$0xff]  ;;  %v3416_v47 = vsel %vm970_vm3, 1.0, %v5522_v49  ;;  %v3419_v45 = vsel %vm974_vm4, 1.0, %v5522_v49  ;;  %v3422_v27 = vsel %vm978_vm5, 1.0, %v5522_v49  ;;  %v3431_v53 = vmul.f32 %v3405_v59, %v2368_v39 }
  0x54   : > { %5570 = vst [vmem:[#allocation81_spill] sm:$0xff] %v3380_v23  ;;  %5571 = vst [vmem:[#allocation82_spill] sm:$0xff] %v3405_v59  ;;  %v2392_v28 = vld [vmem:[%s2855_s26 + $0x2c8] sm:$0xff]  ;;  %v3425_v23 = vsel %vm982_vm6, 1.0, %v5522_v49  ;;  %v3428_v12 = vsel %vm986_vm7, 1.0, %v5522_v49  ;;  %v3434_v61 = vmul.f32 %v3410_v44, %v2372_v51  ;;  %v3437_v20 = vmul.f32 %v3413_v18, %v2376_v24 }
  0x55   : > { %v2396_v43 = vld [vmem:[%s2855_s26 + $0x2e8] sm:$0xff]  ;;  %5572 = vst [vmem:[#allocation83_spill] sm:$0xff] %v3410_v44  ;;  %5573 = vst [vmem:[#allocation84_spill] sm:$0xff] %v3413_v18  ;;  %v3440_v60 = vmul.f32 %v3416_v47, %v2380_v46  ;;  %v3443_v57 = vmul.f32 %v3419_v45, %v2384_v52  ;;  %v3446_v63 = vmul.f32 %v3422_v27, %v2388_v58  ;;  %vm1247_vm8 = vcmp.eq.s32.totalorder %v2885_v9, 3 }
  0x56   : > { %5574 = vst [vmem:[#allocation85_spill] sm:$0xff] %v3416_v47  ;;  %5575 = vst [vmem:[#allocation86_spill] sm:$0xff] %v3419_v45  ;;  %v3449_v39 = vmul.f32 %v3425_v23, %v2392_v28  ;;  %v3452_v51 = vmul.f32 %v3428_v12, %v2396_v43  ;;  %v1086_v24 = vadd.f32 %v3431_v53, %v797_v22  ;;  %v2432_v43 = vld [vmem:[%s2855_s26 + $0x308] sm:$0xff]  ;;  %vm1251_vm9 = vcmp.eq.s32.totalorder %v2903_v15, 3 }
  0x57   : > { %5576 = vst [vmem:[#allocation87_spill] sm:$0xff] %v3422_v27  ;;  %5577 = vst [vmem:[#allocation88_spill] sm:$0xff] %v3425_v23  ;;  %v1090_v18 = vadd.f32 %v3434_v61, %v801_v19  ;;  %v1094_v46 = vadd.f32 %v3437_v20, %v805_v17  ;;  %v1098_v52 = vadd.f32 %v3440_v60, %v809_v16  ;;  %v2436_v22 = vld [vmem:[%s2855_s26 + $0x328] sm:$0xff]  ;;  %vm1255_vm10 = vcmp.eq.s32.totalorder %v3215_v8, 3 }
  0x58   : > { %5578 = vst [vmem:[#allocation89_spill] sm:$0xff] %v3428_v12  ;;  %5579 = vst [vmem:[#allocation90_spill] sm:$0xff] %v3431_v53  ;;  %v1102_v45 = vadd.f32 %v3443_v57, %v813_v54  ;;  %v1106_v58 = vadd.f32 %v3446_v63, %v817_v13  ;;  %v1110_v28 = vadd.f32 %v3449_v39, %v821_v40  ;;  %v2440_v19 = vld [vmem:[%s2855_s26 + $0x348] sm:$0xff]  ;;  %vm1259_vm11 = vcmp.eq.s32.totalorder %v3218_v14, 3 }
  0x59   : > { %5580 = vst [vmem:[#allocation91_spill] sm:$0xff] %v3434_v61  ;;  %5581 = vst [vmem:[#allocation92_spill] sm:$0xff] %v3437_v20  ;;  %v1114_v23 = vadd.f32 %v3452_v51, %v825_v48  ;;  %v2444_v12 = vld [vmem:[%s2855_s26 + $0x368] sm:$0xff]  ;;  %vm1263_vm12 = vcmp.eq.s32.totalorder %v3221_v50, 3  ;;  %vm1267_vm13 = vcmp.eq.s32.totalorder %v3224_v62, 3  ;;  %vm1271_vm14 = vcmp.eq.s32.totalorder %v3227_v7, 3 }
  0x5a   : > { %5582 = vst [vmem:[#allocation93_spill] sm:$0xff] %v3440_v60  ;;  %5583 = vst [vmem:[#allocation94_spill] sm:$0xff] %v3443_v57  ;;  %v2448_v54 = vld [vmem:[%s2855_s26 + $0x388] sm:$0xff]  ;;  %vm1275_vm15 = vcmp.eq.s32.totalorder %v3232_v6, 3  ;;  %v3477_v9 = vsel %vm1247_vm8, 1.0, %v5522_v49  ;;  %v3482_v15 = vsel %vm1251_vm9, 1.0, %v5522_v49 }
  0x5b   : > { %5584 = vst [vmem:[#allocation95_spill] sm:$0xff] %v3446_v63  ;;  %5585 = vst [vmem:[#allocation96_spill] sm:$0xff] %v3449_v39  ;;  %v2452_v17 = vld [vmem:[%s2855_s26 + $0x3a8] sm:$0xff]  ;;  %v3485_v8 = vsel %vm1255_vm10, 1.0, %v5522_v49  ;;  %v3488_v14 = vsel %vm1259_vm11, 1.0, %v5522_v49  ;;  %v3491_v50 = vsel %vm1263_vm12, 1.0, %v5522_v49  ;;  %v3503_v13 = vmul.f32 %v3477_v9, %v2432_v43 }
  0x5c   : > { %5586 = vst [vmem:[#allocation97_spill] sm:$0xff] %v3452_v51  ;;  %5587 = vst [vmem:[#allocation98_spill] sm:$0xff] %v3477_v9  ;;  %v2456_v48 = vld [vmem:[%s2855_s26 + $0x3c8] sm:$0xff]  ;;  %v3494_v62 = vsel %vm1267_vm13, 1.0, %v5522_v49  ;;  %v3497_v7 = vsel %vm1271_vm14, 1.0, %v5522_v49  ;;  %v3500_v6 = vsel %vm1275_vm15, 1.0, %v5522_v49  ;;  %v3506_v40 = vmul.f32 %v3482_v15, %v2436_v22 }
  0x5d   : > { %v2460_v16 = vld [vmem:[%s2855_s26 + $0x3e8] sm:$0xff]  ;;  %5588 = vst [vmem:[#allocation99_spill] sm:$0xff] %v3482_v15  ;;  %5589 = vst [vmem:[#allocation100_spill] sm:$0xff] %v3485_v8  ;;  %v3509_v27 = vmul.f32 %v3485_v8, %v2440_v19  ;;  %v3512_v47 = vmul.f32 %v3488_v14, %v2444_v12  ;;  %v3515_v44 = vmul.f32 %v3491_v50, %v2448_v54 }
  0x5e   : > { %5590 = vst [vmem:[#allocation101_spill] sm:$0xff] %v3488_v14  ;;  %5591 = vst [vmem:[#allocation102_spill] sm:$0xff] %v3491_v50  ;;  %v3518_v59 = vmul.f32 %v3494_v62, %v2452_v17  ;;  %v3521_v51 = vmul.f32 %v3497_v7, %v2456_v48  ;;  %v3524_v43 = vmul.f32 %v3500_v6, %v2460_v16 }
  0x5f   : > { %5592 = vst [vmem:[#allocation103_spill] sm:$0xff] %v3494_v62  ;;  %5593 = vst [vmem:[#allocation104_spill] sm:$0xff] %v3497_v7  ;;  %v1375_v22 = vadd.f32 %v3503_v13, %v1086_v24  ;;  %v1379_v19 = vadd.f32 %v3506_v40, %v1090_v18  ;;  %v1383_v8 = vadd.f32 %v3509_v27, %v1094_v46 }
  0x60   : > { %5594 = vst [vmem:[#allocation105_spill] sm:$0xff] %v3500_v6  ;;  %5595 = vst [vmem:[#allocation106_spill] sm:$0xff] %v3503_v13  ;;  %v1387_v12 = vadd.f32 %v3512_v47, %v1098_v52  ;;  %v1391_v54 = vadd.f32 %v3515_v44, %v1102_v45  ;;  %v1395_v50 = vadd.f32 %v3518_v59, %v1106_v58 }
  0x61   : > { %5596 = vst [vmem:[#allocation107_spill] sm:$0xff] %v3506_v40  ;;  %5597 = vst [vmem:[#allocation108_spill] sm:$0xff] %v3509_v27  ;;  %v1399_v17 = vadd.f32 %v3521_v51, %v1110_v28  ;;  %v1403_v48 = vadd.f32 %v3524_v43, %v1114_v23  ;;  %v1503_v7 = vsub.f32 1.0, %v1375_v22  ;;  %v1507_v62 = vsub.f32 1.0, %v1379_v19 }
  0x62   : > { %5598 = vst [vmem:[#allocation109_spill] sm:$0xff] %v3512_v47  ;;  %5599 = vst [vmem:[#allocation110_spill] sm:$0xff] %v3515_v44  ;;  %v1511_v16 = vsub.f32 1.0, %v1383_v8  ;;  %v1515_v6 = vsub.f32 1.0, %v1387_v12  ;;  %v1519_v14 = vsub.f32 1.0, %v1391_v54  ;;  %v1523_v24 = vsub.f32 1.0, %v1395_v50 }
  0x63   : > { %5600 = vst [vmem:[#allocation111_spill] sm:$0xff] %v3518_v59  ;;  %5601 = vst [vmem:[#allocation112_spill] sm:$0xff] %v3521_v51  ;;  %v1527_v15 = vsub.f32 1.0, %v1399_v17  ;;  %v1531_v18 = vsub.f32 1.0, %v1403_v48  ;;  %v1535_v9 = vmax.f32 %v1375_v22, 1e-30  ;;  %v3534_v47 = vmul.f32 %v1503_v7, %v1503_v7 }
  0x64   : > { %5602 = vst [vmem:[#allocation113_spill] sm:$0xff] %v3524_v43  ;;  %v1539_v46 = vmax.f32 %v1379_v19, 1e-30  ;;  %v1543_v27 = vmax.f32 %v1383_v8, 1e-30  ;;  %v3536_v23 = vmul.f32 %v1507_v62, %v1507_v62  ;;  %v3538_v43 = vmul.f32 %v1511_v16, %v1511_v16  ;;  %1959 = vst [vmem:[%s3206_s30 + $0x8] sm:$0xff] %v3348_v21 }
  0x65   : > { %v1547_v52 = vmax.f32 %v1387_v12, 1e-30  ;;  %5603 = vst [vmem:[#allocation114_spill] sm:$0xff] %v3534_v47  ;;  %v1551_v45 = vmax.f32 %v1391_v54, 1e-30  ;;  %2615 = vlog2.f32 %v1535_v9  ;;  %v3540_v51 = vmul.f32 %v1515_v6, %v1515_v6  ;;  %v3577_v21 = vld [vmem:[%s2855_s26 + $0x10] sm:$0xff] }
  0x66   : > { %v1555_v58 = vmax.f32 %v1395_v50, 1e-30  ;;  %v1559_v59 = vmax.f32 %v1399_v17, 1e-30  ;;  %v1563_v28 = vmax.f32 %v1403_v48, 1e-30  ;;  %2617 = vlog2.f32 %v1539_v46 }
  0x67   : > { %5604 = vst [vmem:[#allocation115_spill] sm:$0xff] %v3536_v23  ;;  %5605 = vst [vmem:[#allocation116_spill] sm:$0xff] %v3538_v43  ;;  %2619 = vlog2.f32 %v1543_v27  ;;  %v3542_v22 = vmul.f32 %v1519_v14, %v1519_v14  ;;  %v3544_v8 = vmul.f32 %v1523_v24, %v1523_v24  ;;  %v3546_v7 = vmul.f32 %v1527_v15, %v1527_v15  ;;  %v3606_v6 = vld [vmem:[%s2855_s26 + $0xf0] sm:$0xff] }
  0x68   : > { %5606 = vst [vmem:[#allocation117_spill] sm:$0xff] %v3540_v51  ;;  %2621 = vlog2.f32 %v1547_v52  ;;  %v3548_v50 = vmul.f32 %v1531_v18, %v1531_v18  ;;  %v3551_v9 = vunpack.c.2.s8 %v2858_v0  ;;  %v3554_v27 = vunpack.c.2.s8 %v2861_v1  ;;  %5614 = vst [vmem:[#allocation125_spill] sm:$0xff] %v3606_v6  ;;  %v2305_v51 = vld [vmem:[%s2855_s26 + $0x110] sm:$0xff] }
  0x69   : > { %5607 = vst [vmem:[#allocation118_spill] sm:$0xff] %v3542_v22  ;;  %5608 = vst [vmem:[#allocation119_spill] sm:$0xff] %v3544_v8  ;;  %2623 = vlog2.f32 %v1551_v45  ;;  %v3557_v14 = vunpack.c.2.s8 %v2864_v2  ;;  %v3562_v15 = vunpack.c.2.s8 %v2867_v3  ;;  %v3565_v62 = vunpack.c.2.s8 %v2870_v4  ;;  %v3581_v3 = vld [vmem:[%s2855_s26 + $0x30] sm:$0xff] }
  0x6a   : > { %5609 = vst [vmem:[#allocation120_spill] sm:$0xff] %v3546_v7  ;;  %5610 = vst [vmem:[#allocation121_spill] sm:$0xff] %v3548_v50  ;;  %2625 = vlog2.f32 %v1555_v58  ;;  %v3568_v0 = vunpack.c.2.s8 %v2873_v5  ;;  %v3571_v1 = vunpack.c.2.s8 %v2888_v10  ;;  %v3574_v2 = vunpack.c.2.s8 %v2891_v11  ;;  %v3584_v4 = vld [vmem:[%s2855_s26 + $0x50] sm:$0xff] }
  0x6b   : > { %2627 = vlog2.f32 %v1559_v59  ;;  %vm413_vm0 = vcmp.eq.s32.totalorder %v3551_v9, 0  ;;  %v3587_v5 = vld [vmem:[%s2855_s26 + $0x70] sm:$0xff]  ;;  %vm417_vm1 = vcmp.eq.s32.totalorder %v3554_v27, 0  ;;  %vm421_vm2 = vcmp.eq.s32.totalorder %v3557_v14, 0 }
  0x6c   : > { %2629 = vlog2.f32 %v1563_v28  ;;  %vm425_vm3 = vcmp.eq.s32.totalorder %v3562_v15, 0  ;;  %v3593_v10 = vld [vmem:[%s2855_s26 + $0x90] sm:$0xff]  ;;  %vm429_vm4 = vcmp.eq.s32.totalorder %v3565_v62, 0  ;;  %vm433_vm5 = vcmp.eq.s32.totalorder %v3568_v0, 0 }
  0x6d   : > { %5611 = vst [vmem:[#allocation122_spill] sm:$0xff] %v3593_v10  ;;  %v3596_v11 = vld [vmem:[%s2855_s26 + $0xb0] sm:$0xff]  ;;  %vm437_vm6 = vcmp.eq.s32.totalorder %v3571_v1, 0  ;;  %vm441_vm7 = vcmp.eq.s32.totalorder %v3574_v2, 0  ;;  %v3611_v19 = vsel %vm413_vm0, 1.0, %v5522_v49  ;;  %v3614_v12 = vsel %vm417_vm1, 1.0, %v5522_v49 }
  0x6e   : > { %5612 = vst [vmem:[#allocation123_spill] sm:$0xff] %v3596_v11  ;;  %v3603_v59 = vld [vmem:[%s2855_s26 + $0xd0] sm:$0xff]  ;;  %v3617_v54 = vsel %vm421_vm2, 1.0, %v5522_v49  ;;  %v3620_v17 = vsel %vm425_vm3, 1.0, %v5522_v49  ;;  %v3625_v16 = vsel %vm429_vm4, 1.0, %v5522_v49  ;;  %v3628_v24 = vsel %vm433_vm5, 1.0, %v5522_v49 }
  0x6f   : > { %5613 = vst [vmem:[#allocation124_spill] sm:$0xff] %v3603_v59  ;;  %v3622_v48 = vpop.eup %2615  ;;  %5616 = vst [vmem:[#allocation127_spill] sm:$0xff] %v3625_v16  ;;  %v3631_v18 = vsel %vm437_vm6, 1.0, %v5522_v49  ;;  %v3634_v46 = vsel %vm441_vm7, 1.0, %v5522_v49  ;;  %v509_v45 = vmul.f32 %v3611_v19, %v3577_v21  ;;  %v513_v58 = vmul.f32 %v3614_v12, %v3581_v3  ;;  %v2309_v43 = vld [vmem:[%s2855_s26 + $0x130] sm:$0xff] }
  0x70   : > { %5615 = vst [vmem:[#allocation126_spill] sm:$0xff] %v3622_v48  ;;  %5617 = vst [vmem:[#allocation128_spill] sm:$0xff] %v3628_v24  ;;  %v3636_v52 = vpop.eup %2617  ;;  %v517_v28 = vmul.f32 %v3617_v54, %v3584_v4  ;;  %v521_v44 = vmul.f32 %v3620_v17, %v3587_v5  ;;  %v525_v13 = vmul.f32 %v3625_v16, %v3593_v10  ;;  %vm670_vm8 = vcmp.eq.s32.totalorder %v3551_v9, 1  ;;  %v2313_v23 = vld [vmem:[%s2855_s26 + $0x150] sm:$0xff] }
  0x71   : > { %5618 = vst [vmem:[#allocation129_spill] sm:$0xff] %v3631_v18  ;;  %5619 = vst [vmem:[#allocation130_spill] sm:$0xff] %v3634_v46  ;;  %v3646_v40 = vpop.eup %2619  ;;  %v529_v39 = vmul.f32 %v3628_v24, %v3596_v11  ;;  %v533_v63 = vmul.f32 %v3631_v18, %v3603_v59  ;;  %v537_v57 = vmul.f32 %v3634_v46, %v3606_v6  ;;  %vm674_vm9 = vcmp.eq.s32.totalorder %v3554_v27, 1  ;;  %v2329_v48 = vld [vmem:[%s2855_s26 + $0x1d0] sm:$0xff] }
  0x72   : > { %5620 = vst [vmem:[#allocation131_spill] sm:$0xff] %v3636_v52  ;;  %5621 = vst [vmem:[#allocation132_spill] sm:$0xff] %v3646_v40  ;;  %v3656_v60 = vpop.eup %2621  ;;  %v541_v20 = vadd.f32 %v513_v58, %v509_v45  ;;  %v545_v61 = vadd.f32 %v521_v44, %v517_v28  ;;  %vm678_vm10 = vcmp.eq.s32.totalorder %v3557_v14, 1  ;;  %vm682_vm11 = vcmp.eq.s32.totalorder %v3562_v15, 1  ;;  %v2321_v40 = vld [vmem:[%s2855_s26 + $0x190] sm:$0xff] }
  0x73   : > { %5622 = vst [vmem:[#allocation133_spill] sm:$0xff] %v3656_v60  ;;  %v3660_v53 = vpop.eup %2623  ;;  %v549_v50 = vadd.f32 %v529_v39, %v525_v13  ;;  %v553_v7 = vadd.f32 %v537_v57, %v533_v63  ;;  %vm686_vm12 = vcmp.eq.s32.totalorder %v3565_v62, 1  ;;  %vm690_vm13 = vcmp.eq.s32.totalorder %v3568_v0, 1  ;;  %v2317_v60 = vld [vmem:[%s2855_s26 + $0x170] sm:$0xff] }
  0x74   : > { %5623 = vst [vmem:[#allocation134_spill] sm:$0xff] %v3660_v53  ;;  %v3664_v8 = vpop.eup %2625  ;;  %v557_v22 = vadd.f32 %v545_v61, %v541_v20  ;;  %vm694_vm14 = vcmp.eq.s32.totalorder %v3571_v1, 1  ;;  %v2325_v52 = vld [vmem:[%s2855_s26 + $0x1b0] sm:$0xff]  ;;  %vm698_vm15 = vcmp.eq.s32.totalorder %v3574_v2, 1  ;;  %v3681_v20 = vsel %vm670_vm8, 1.0, %v5522_v49 }
  0x75   : > { %5624 = vst [vmem:[#allocation135_spill] sm:$0xff] %v3664_v8  ;;  %v3672_v47 = vpop.eup %2627  ;;  %v561_v53 = vadd.f32 %v553_v7, %v549_v50  ;;  %5626 = vst [vmem:[#allocation137_spill] sm:$0xff] %v3681_v20  ;;  %v3686_v61 = vsel %vm674_vm9, 1.0, %v5522_v49  ;;  %v3695_v7 = vsel %vm678_vm10, 1.0, %v5522_v49  ;;  %v3700_v50 = vsel %vm682_vm11, 1.0, %v5522_v49 }
  0x76   : > { %5625 = vst [vmem:[#allocation136_spill] sm:$0xff] %v3672_v47  ;;  %5627 = vst [vmem:[#allocation138_spill] sm:$0xff] %v3686_v61  ;;  %v3688_v8 = vpop.eup %2629  ;;  %v2333_v47 = vld [vmem:[%s2855_s26 + $0x1f0] sm:$0xff]  ;;  %v3705_v46 = vsel %vm686_vm12, 1.0, %v5522_v49  ;;  %v3717_v18 = vsel %vm694_vm14, 1.0, %v5522_v49  ;;  %v3720_v59 = vsel %vm698_vm15, 1.0, %v5522_v49  ;;  %v3723_v24 = vmul.f32 %v3681_v20, %v2305_v51 }
  0x77   : > { %5628 = vst [vmem:[#allocation139_spill] sm:$0xff] %v3688_v8  ;;  %5629 = vst [vmem:[#allocation140_spill] sm:$0xff] %v3695_v7  ;;  %v3710_v8 = vsel %vm690_vm13, 1.0, %v5522_v49  ;;  %v3712_v6 = vadd.f32 %v561_v53, %v557_v22  ;;  %v3726_v11 = vmul.f32 %v3686_v61, %v2309_v43  ;;  %v3729_v16 = vmul.f32 %v3695_v7, %v2313_v23 }
  0x78   : > { %5630 = vst [vmem:[#allocation141_spill] sm:$0xff] %v3700_v50  ;;  %5631 = vst [vmem:[#allocation142_spill] sm:$0xff] %v3705_v46  ;;  %v3732_v53 = vmul.f32 %v3700_v50, %v2317_v60  ;;  %v3735_v22 = vmul.f32 %v3705_v46, %v2321_v40  ;;  %v3738_v10 = vmul.f32 %v3710_v8, %v2325_v52  ;;  %vm959_vm0 = vcmp.eq.s32.totalorder %v3551_v9, 2 }
  0x79   : > { %5632 = vst [vmem:[#allocation143_spill] sm:$0xff] %v3710_v8  ;;  %5633 = vst [vmem:[#allocation144_spill] sm:$0xff] %v3717_v18  ;;  %v3741_v51 = vmul.f32 %v3717_v18, %v2329_v48  ;;  %v3744_v43 = vmul.f32 %v3720_v59, %v2333_v47  ;;  %v798_v23 = vadd.f32 %v3723_v24, %v509_v45  ;;  %v2369_v47 = vld [vmem:[%s2855_s26 + $0x210] sm:$0xff]  ;;  %vm963_vm1 = vcmp.eq.s32.totalorder %v3554_v27, 2 }
  0x7a   : > { %5634 = vst [vmem:[#allocation145_spill] sm:$0xff] %v3720_v59  ;;  %5635 = vst [vmem:[#allocation146_spill] sm:$0xff] %v3723_v24  ;;  %v802_v7 = vadd.f32 %v3726_v11, %v513_v58  ;;  %v806_v60 = vadd.f32 %v3729_v16, %v517_v28  ;;  %v810_v40 = vadd.f32 %v3732_v53, %v521_v44  ;;  %v2373_v45 = vld [vmem:[%s2855_s26 + $0x230] sm:$0xff]  ;;  %vm967_vm2 = vcmp.eq.s32.totalorder %v3557_v14, 2 }
  0x7b   : > { %5636 = vst [vmem:[#allocation147_spill] sm:$0xff] %v3726_v11  ;;  %5637 = vst [vmem:[#allocation148_spill] sm:$0xff] %v3729_v16  ;;  %v814_v46 = vadd.f32 %v3735_v22, %v525_v13  ;;  %v818_v52 = vadd.f32 %v3738_v10, %v529_v39  ;;  %v822_v48 = vadd.f32 %v3741_v51, %v533_v63  ;;  %v2377_v58 = vld [vmem:[%s2855_s26 + $0x250] sm:$0xff]  ;;  %vm971_vm3 = vcmp.eq.s32.totalorder %v3562_v15, 2 }
  0x7c   : > { %5638 = vst [vmem:[#allocation149_spill] sm:$0xff] %v3732_v53  ;;  %5639 = vst [vmem:[#allocation150_spill] sm:$0xff] %v3735_v22  ;;  %v826_v18 = vadd.f32 %v3744_v43, %v537_v57  ;;  %v2381_v59 = vld [vmem:[%s2855_s26 + $0x270] sm:$0xff]  ;;  %vm975_vm4 = vcmp.eq.s32.totalorder %v3565_v62, 2  ;;  %vm979_vm5 = vcmp.eq.s32.totalorder %v3568_v0, 2  ;;  %vm983_vm6 = vcmp.eq.s32.totalorder %v3571_v1, 2 }
  0x7d   : > { %5640 = vst [vmem:[#allocation151_spill] sm:$0xff] %v3738_v10  ;;  %5641 = vst [vmem:[#allocation152_spill] sm:$0xff] %v3741_v51  ;;  %v2385_v44 = vld [vmem:[%s2855_s26 + $0x290] sm:$0xff]  ;;  %vm987_vm7 = vcmp.eq.s32.totalorder %v3574_v2, 2  ;;  %v3769_v57 = vsel %vm959_vm0, 1.0, %v5522_v49  ;;  %v3774_v28 = vsel %vm963_vm1, 1.0, %v5522_v49 }
  0x7e   : > { %5642 = vst [vmem:[#allocation153_spill] sm:$0xff] %v3744_v43  ;;  %v2389_v63 = vld [vmem:[%s2855_s26 + $0x2b0] sm:$0xff]  ;;  %5643 = vst [vmem:[#allocation154_spill] sm:$0xff] %v3769_v57  ;;  %v3777_v8 = vsel %vm967_vm2, 1.0, %v5522_v49  ;;  %v3780_v50 = vsel %vm971_vm3, 1.0, %v5522_v49  ;;  %v3783_v61 = vsel %vm975_vm4, 1.0, %v5522_v49  ;;  %v3795_v10 = vmul.f32 %v3769_v57, %v2369_v47 }
  0x7f   : > { %v2393_v39 = vld [vmem:[%s2855_s26 + $0x2d0] sm:$0xff]  ;;  %5644 = vst [vmem:[#allocation155_spill] sm:$0xff] %v3774_v28  ;;  %5645 = vst [vmem:[#allocation156_spill] sm:$0xff] %v3777_v8  ;;  %v3786_v20 = vsel %vm979_vm5, 1.0, %v5522_v49  ;;  %v3789_v43 = vsel %vm983_vm6, 1.0, %v5522_v49  ;;  %v3792_v51 = vsel %vm987_vm7, 1.0, %v5522_v49  ;;  %v3798_v22 = vmul.f32 %v3774_v28, %v2373_v45 }
  0x80   : > { %v2397_v13 = vld [vmem:[%s2855_s26 + $0x2f0] sm:$0xff]  ;;  %5646 = vst [vmem:[#allocation157_spill] sm:$0xff] %v3780_v50  ;;  %5647 = vst [vmem:[#allocation158_spill] sm:$0xff] %v3783_v61  ;;  %v3801_v53 = vmul.f32 %v3777_v8, %v2377_v58  ;;  %v3804_v16 = vmul.f32 %v3780_v50, %v2381_v59  ;;  %v3807_v11 = vmul.f32 %v3783_v61, %v2385_v44  ;;  %vm1248_vm8 = vcmp.eq.s32.totalorder %v3551_v9, 3 }
  0x81   : > { %5648 = vst [vmem:[#allocation159_spill] sm:$0xff] %v3786_v20  ;;  %5649 = vst [vmem:[#allocation160_spill] sm:$0xff] %v3789_v43  ;;  %v3810_v24 = vmul.f32 %v3786_v20, %v2389_v63  ;;  %v3813_v47 = vmul.f32 %v3789_v43, %v2393_v39  ;;  %v3816_v45 = vmul.f32 %v3792_v51, %v2397_v13  ;;  %v2433_v13 = vld [vmem:[%s2855_s26 + $0x310] sm:$0xff]  ;;  %vm1252_vm9 = vcmp.eq.s32.totalorder %v3554_v27, 3 }
  0x82   : > { %5650 = vst [vmem:[#allocation161_spill] sm:$0xff] %v3792_v51  ;;  %5651 = vst [vmem:[#allocation162_spill] sm:$0xff] %v3795_v10  ;;  %v1087_v58 = vadd.f32 %v3795_v10, %v798_v23  ;;  %v1091_v8 = vadd.f32 %v3798_v22, %v802_v7  ;;  %v1095_v59 = vadd.f32 %v3801_v53, %v806_v60  ;;  %v2437_v23 = vld [vmem:[%s2855_s26 + $0x330] sm:$0xff]  ;;  %vm1256_vm10 = vcmp.eq.s32.totalorder %v3557_v14, 3 }
  0x83   : > { %5652 = vst [vmem:[#allocation163_spill] sm:$0xff] %v3798_v22  ;;  %5653 = vst [vmem:[#allocation164_spill] sm:$0xff] %v3801_v53  ;;  %v1099_v44 = vadd.f32 %v3804_v16, %v810_v40  ;;  %v1103_v61 = vadd.f32 %v3807_v11, %v814_v46  ;;  %v1107_v63 = vadd.f32 %v3810_v24, %v818_v52  ;;  %v2441_v7 = vld [vmem:[%s2855_s26 + $0x350] sm:$0xff]  ;;  %vm1260_vm11 = vcmp.eq.s32.totalorder %v3562_v15, 3 }
  0x84   : > { %5654 = vst [vmem:[#allocation165_spill] sm:$0xff] %v3804_v16  ;;  %5655 = vst [vmem:[#allocation166_spill] sm:$0xff] %v3807_v11  ;;  %v1111_v39 = vadd.f32 %v3813_v47, %v822_v48  ;;  %v1115_v43 = vadd.f32 %v3816_v45, %v826_v18  ;;  %v2445_v51 = vld [vmem:[%s2855_s26 + $0x370] sm:$0xff]  ;;  %vm1264_vm12 = vcmp.eq.s32.totalorder %v3565_v62, 3  ;;  %vm1268_vm13 = vcmp.eq.s32.totalorder %v3568_v0, 3 }
  0x85   : > { %5656 = vst [vmem:[#allocation167_spill] sm:$0xff] %v3810_v24  ;;  %5657 = vst [vmem:[#allocation168_spill] sm:$0xff] %v3813_v47  ;;  %v2449_v46 = vld [vmem:[%s2855_s26 + $0x390] sm:$0xff]  ;;  %vm1272_vm14 = vcmp.eq.s32.totalorder %v3571_v1, 3  ;;  %vm1276_vm15 = vcmp.eq.s32.totalorder %v3574_v2, 3  ;;  %v3841_v9 = vsel %vm1248_vm8, 1.0, %v5522_v49 }
  0x86   : > { %5658 = vst [vmem:[#allocation169_spill] sm:$0xff] %v3816_v45  ;;  %v2453_v60 = vld [vmem:[%s2855_s26 + $0x3b0] sm:$0xff]  ;;  %5659 = vst [vmem:[#allocation170_spill] sm:$0xff] %v3841_v9  ;;  %v3846_v27 = vsel %vm1252_vm9, 1.0, %v5522_v49  ;;  %v3849_v14 = vsel %vm1256_vm10, 1.0, %v5522_v49  ;;  %v3852_v15 = vsel %vm1260_vm11, 1.0, %v5522_v49  ;;  %v3867_v52 = vmul.f32 %v3841_v9, %v2433_v13 }
  0x87   : > { %v2457_v18 = vld [vmem:[%s2855_s26 + $0x3d0] sm:$0xff]  ;;  %5660 = vst [vmem:[#allocation171_spill] sm:$0xff] %v3846_v27  ;;  %5661 = vst [vmem:[#allocation172_spill] sm:$0xff] %v3849_v14  ;;  %v3855_v62 = vsel %vm1264_vm12, 1.0, %v5522_v49  ;;  %v3858_v0 = vsel %vm1268_vm13, 1.0, %v5522_v49  ;;  %v3861_v1 = vsel %vm1272_vm14, 1.0, %v5522_v49  ;;  %v3870_v48 = vmul.f32 %v3846_v27, %v2437_v23 }
  0x88   : > { %v2461_v40 = vld [vmem:[%s2855_s26 + $0x3f0] sm:$0xff]  ;;  %5662 = vst [vmem:[#allocation173_spill] sm:$0xff] %v3852_v15  ;;  %5663 = vst [vmem:[#allocation174_spill] sm:$0xff] %v3855_v62  ;;  %v3864_v2 = vsel %vm1276_vm15, 1.0, %v5522_v49  ;;  %v3873_v20 = vmul.f32 %v3849_v14, %v2441_v7  ;;  %v3876_v50 = vmul.f32 %v3852_v15, %v2445_v51  ;;  %v3879_v28 = vmul.f32 %v3855_v62, %v2449_v46 }
  0x89   : > { %5664 = vst [vmem:[#allocation175_spill] sm:$0xff] %v3858_v0  ;;  %5665 = vst [vmem:[#allocation176_spill] sm:$0xff] %v3861_v1  ;;  %v3882_v57 = vmul.f32 %v3858_v0, %v2453_v60  ;;  %v3885_v45 = vmul.f32 %v3861_v1, %v2457_v18  ;;  %v3888_v13 = vmul.f32 %v3864_v2, %v2461_v40 }
  0x8a   : > { %5666 = vst [vmem:[#allocation177_spill] sm:$0xff] %v3864_v2  ;;  %5667 = vst [vmem:[#allocation178_spill] sm:$0xff] %v3867_v52  ;;  %v1376_v23 = vadd.f32 %v3867_v52, %v1087_v58  ;;  %v1380_v7 = vadd.f32 %v3870_v48, %v1091_v8  ;;  %v1384_v14 = vadd.f32 %v3873_v20, %v1095_v59 }
  0x8b   : > { %5668 = vst [vmem:[#allocation179_spill] sm:$0xff] %v3870_v48  ;;  %5669 = vst [vmem:[#allocation180_spill] sm:$0xff] %v3873_v20  ;;  %v1388_v51 = vadd.f32 %v3876_v50, %v1099_v44  ;;  %v1392_v46 = vadd.f32 %v3879_v28, %v1103_v61  ;;  %v1396_v62 = vadd.f32 %v3882_v57, %v1107_v63 }
  0x8c   : > { %5670 = vst [vmem:[#allocation181_spill] sm:$0xff] %v3876_v50  ;;  %5671 = vst [vmem:[#allocation182_spill] sm:$0xff] %v3879_v28  ;;  %v1400_v60 = vadd.f32 %v3885_v45, %v1111_v39  ;;  %v1404_v18 = vadd.f32 %v3888_v13, %v1115_v43  ;;  %v1504_v1 = vsub.f32 1.0, %v1376_v23  ;;  %v1508_v0 = vsub.f32 1.0, %v1380_v7 }
  0x8d   : > { %5672 = vst [vmem:[#allocation183_spill] sm:$0xff] %v3882_v57  ;;  %5673 = vst [vmem:[#allocation184_spill] sm:$0xff] %v3885_v45  ;;  %v1512_v40 = vsub.f32 1.0, %v1384_v14  ;;  %v1516_v2 = vsub.f32 1.0, %v1388_v51  ;;  %v1520_v15 = vsub.f32 1.0, %v1392_v46  ;;  %v1524_v58 = vsub.f32 1.0, %v1396_v62 }
  0x8e   : > { %5674 = vst [vmem:[#allocation185_spill] sm:$0xff] %v3888_v13  ;;  %v1528_v27 = vsub.f32 1.0, %v1400_v60  ;;  %v1532_v8 = vsub.f32 1.0, %v1404_v18  ;;  %v1536_v9 = vmax.f32 %v1376_v23, 1e-30  ;;  %v3898_v50 = vmul.f32 %v1504_v1, %v1504_v1  ;;  %1960 = vst [vmem:[%s3206_s30 + $0x10] sm:$0xff] %v3712_v6 }
  0x8f   : > { %v1540_v59 = vmax.f32 %v1380_v7, 1e-30  ;;  %v1544_v20 = vmax.f32 %v1384_v14, 1e-30  ;;  %v1548_v44 = vmax.f32 %v1388_v51, 1e-30  ;;  %v3900_v13 = vmul.f32 %v1508_v0, %v1508_v0 }
  0x90   : > { %5675 = vst [vmem:[#allocation186_spill] sm:$0xff] %v3898_v50  ;;  %v1552_v61 = vmax.f32 %v1392_v46, 1e-30  ;;  %v1556_v63 = vmax.f32 %v1396_v62, 1e-30  ;;  %2631 = vlog2.f32 %v1536_v9  ;;  %v3902_v45 = vmul.f32 %v1512_v40, %v1512_v40  ;;  %v2663_v0 = vld [vmem:[%s2850_s23] sm:$0xff] }
  0x91   : > { %v1560_v39 = vmax.f32 %v1400_v60, 1e-30  ;;  %v1564_v43 = vmax.f32 %v1404_v18, 1e-30  ;;  %2633 = vlog2.f32 %v1540_v59  ;;  %5676 = vst [vmem:[#allocation187_spill] sm:$0xff] %v3900_v13  ;;  %v3904_v14 = vmul.f32 %v1516_v2, %v1516_v2  ;;  %v2667_v60 = vld [vmem:[%s2850_s23 + $0x20] sm:$0xff] }
  0x92   : > { %5677 = vst [vmem:[#allocation188_spill] sm:$0xff] %v3902_v45  ;;  %2635 = vlog2.f32 %v1544_v20  ;;  %v3906_v1 = vmul.f32 %v1520_v15, %v1520_v15  ;;  %v3908_v23 = vmul.f32 %v1524_v58, %v1524_v58  ;;  %v3910_v9 = vmul.f32 %v1528_v27, %v1528_v27  ;;  %v2664_v20 = vld [vmem:[%s2850_s23 + $0x8] sm:$0xff]  ;;  %v2665_v15 = vld [vmem:[%s2850_s23 + $0x10] sm:$0xff]  ;;  %v2666_v27 = vld [vmem:[%s2850_s23 + $0x18] sm:$0xff] }
  0x93   : > { %5678 = vst [vmem:[#allocation189_spill] sm:$0xff] %v3904_v14  ;;  %2637 = vlog2.f32 %v1548_v44  ;;  %v3912_v62 = vmul.f32 %v1532_v8, %v1532_v8  ;;  %v3915_v7 = vunpack.c.3.s8 %v2663_v0  ;;  %v3918_v2 = vunpack.c.3.s8 %v2664_v20  ;;  %v2668_v40 = vld [vmem:[%s2850_s23 + $0x28] sm:$0xff]  ;;  %v2669_v8 = vld [vmem:[%s2850_s23 + $0x30] sm:$0xff]  ;;  %v2670_v44 = vld [vmem:[%s2850_s23 + $0x38] sm:$0xff] }
  0x94   : > { %5679 = vst [vmem:[#allocation190_spill] sm:$0xff] %v3906_v1  ;;  %5680 = vst [vmem:[#allocation191_spill] sm:$0xff] %v3908_v23  ;;  %2639 = vlog2.f32 %v1552_v61  ;;  %v3921_v51 = vunpack.c.3.s8 %v2665_v15  ;;  %v3926_v46 = vunpack.c.3.s8 %v2666_v27  ;;  %v3929_v18 = vunpack.c.3.s8 %v2667_v60  ;;  %v3941_v6 = vld [vmem:[%s2855_s26 + $0x18] sm:$0xff] }
  0x95   : > { %5681 = vst [vmem:[#allocation192_spill] sm:$0xff] %v3910_v9  ;;  %5682 = vst [vmem:[#allocation193_spill] sm:$0xff] %v3912_v62  ;;  %2641 = vlog2.f32 %v1556_v63  ;;  %v3932_v58 = vunpack.c.3.s8 %v2668_v40  ;;  %v3935_v59 = vunpack.c.3.s8 %v2669_v8  ;;  %v3938_v61 = vunpack.c.3.s8 %v2670_v44  ;;  %v3945_v63 = vld [vmem:[%s2855_s26 + $0x38] sm:$0xff] }
  0x96   : > { %2643 = vlog2.f32 %v1560_v39  ;;  %5683 = vst [vmem:[#allocation194_spill] sm:$0xff] %v3941_v6  ;;  %vm414_vm0 = vcmp.eq.s32.totalorder %v3915_v7, 0  ;;  %5684 = vst [vmem:[#allocation195_spill] sm:$0xff] %v3945_v63  ;;  %v3948_v0 = vld [vmem:[%s2855_s26 + $0x58] sm:$0xff]  ;;  %vm418_vm1 = vcmp.eq.s32.totalorder %v3918_v2, 0  ;;  %vm422_vm2 = vcmp.eq.s32.totalorder %v3921_v51, 0 }
  0x97   : > { %2645 = vlog2.f32 %v1564_v43  ;;  %5685 = vst [vmem:[#allocation196_spill] sm:$0xff] %v3948_v0  ;;  %v3951_v20 = vld [vmem:[%s2855_s26 + $0x78] sm:$0xff]  ;;  %vm426_vm3 = vcmp.eq.s32.totalorder %v3926_v46, 0  ;;  %vm430_vm4 = vcmp.eq.s32.totalorder %v3929_v18, 0  ;;  %vm434_vm5 = vcmp.eq.s32.totalorder %v3932_v58, 0 }
  0x98   : > { %5686 = vst [vmem:[#allocation197_spill] sm:$0xff] %v3951_v20  ;;  %v3957_v39 = vld [vmem:[%s2855_s26 + $0x98] sm:$0xff]  ;;  %vm438_vm6 = vcmp.eq.s32.totalorder %v3935_v59, 0  ;;  %vm442_vm7 = vcmp.eq.s32.totalorder %v3938_v61, 0  ;;  %v3975_v60 = vsel %vm414_vm0, 1.0, %v5522_v49  ;;  %v3978_v40 = vsel %vm418_vm1, 1.0, %v5522_v49 }
  0x99   : > { %5687 = vst [vmem:[#allocation198_spill] sm:$0xff] %v3957_v39  ;;  %v3960_v15 = vld [vmem:[%s2855_s26 + $0xb8] sm:$0xff]  ;;  %5691 = vst [vmem:[#allocation202_spill] sm:$0xff] %v3975_v60  ;;  %v3981_v8 = vsel %vm422_vm2, 1.0, %v5522_v49  ;;  %v3984_v44 = vsel %vm426_vm3, 1.0, %v5522_v49  ;;  %v3989_v28 = vsel %vm430_vm4, 1.0, %v5522_v49  ;;  %v510_v11 = vmul.f32 %v3975_v60, %v3941_v6 }
  0x9a   : > { %5688 = vst [vmem:[#allocation199_spill] sm:$0xff] %v3960_v15  ;;  %v3967_v43 = vld [vmem:[%s2855_s26 + $0xd8] sm:$0xff]  ;;  %5692 = vst [vmem:[#allocation203_spill] sm:$0xff] %v3978_v40  ;;  %v3986_v57 = vpop.eup %2631  ;;  %v3992_v48 = vsel %vm434_vm5, 1.0, %v5522_v49  ;;  %v3995_v52 = vsel %vm438_vm6, 1.0, %v5522_v49  ;;  %v3998_v47 = vsel %vm442_vm7, 1.0, %v5522_v49  ;;  %v514_v16 = vmul.f32 %v3978_v40, %v3945_v63 }
  0x9b   : > { %5689 = vst [vmem:[#allocation200_spill] sm:$0xff] %v3967_v43  ;;  %v3970_v27 = vld [vmem:[%s2855_s26 + $0xf8] sm:$0xff]  ;;  %5693 = vst [vmem:[#allocation204_spill] sm:$0xff] %v3981_v8  ;;  %v4000_v24 = vpop.eup %2633  ;;  %v518_v53 = vmul.f32 %v3981_v8, %v3948_v0  ;;  %v522_v22 = vmul.f32 %v3984_v44, %v3951_v20  ;;  %v526_v62 = vmul.f32 %v3989_v28, %v3957_v39  ;;  %vm671_vm8 = vcmp.eq.s32.totalorder %v3915_v7, 1 }
  0x9c   : > { %5690 = vst [vmem:[#allocation201_spill] sm:$0xff] %v3970_v27  ;;  %5694 = vst [vmem:[#allocation205_spill] sm:$0xff] %v3984_v44  ;;  %v4010_v10 = vpop.eup %2635  ;;  %v530_v9 = vmul.f32 %v3992_v48, %v3960_v15  ;;  %v534_v23 = vmul.f32 %v3995_v52, %v3967_v43  ;;  %v538_v1 = vmul.f32 %v3998_v47, %v3970_v27  ;;  %vm675_vm9 = vcmp.eq.s32.totalorder %v3918_v2, 1  ;;  %v4034_v27 = vld [vmem:[%s2855_s26 + $0x138] sm:$0xff] }
  0x9d   : > { %5695 = vst [vmem:[#allocation206_spill] sm:$0xff] %v3986_v57  ;;  %5696 = vst [vmem:[#allocation207_spill] sm:$0xff] %v3989_v28  ;;  %v4020_v14 = vpop.eup %2637  ;;  %v542_v45 = vadd.f32 %v514_v16, %v510_v11  ;;  %v546_v13 = vadd.f32 %v522_v22, %v518_v53  ;;  %vm679_vm10 = vcmp.eq.s32.totalorder %v3921_v51, 1  ;;  %vm683_vm11 = vcmp.eq.s32.totalorder %v3926_v46, 1 }
  0x9e   : > { %5697 = vst [vmem:[#allocation208_spill] sm:$0xff] %v3992_v48  ;;  %5698 = vst [vmem:[#allocation209_spill] sm:$0xff] %v3995_v52  ;;  %v4024_v50 = vpop.eup %2639  ;;  %v4037_v52 = vld [vmem:[%s2855_s26 + $0x158] sm:$0xff]  ;;  %vm687_vm12 = vcmp.eq.s32.totalorder %v3929_v18, 1  ;;  %vm691_vm13 = vcmp.eq.s32.totalorder %v3932_v58, 1  ;;  %vm695_vm14 = vcmp.eq.s32.totalorder %v3935_v59, 1 }
  0x9f   : > { %5699 = vst [vmem:[#allocation210_spill] sm:$0xff] %v3998_v47  ;;  %5700 = vst [vmem:[#allocation211_spill] sm:$0xff] %v4000_v24  ;;  %v554_v24 = vadd.f32 %v538_v1, %v534_v23  ;;  %v4028_v57 = vpop.eup %2641  ;;  %v4031_v47 = vld [vmem:[%s2855_s26 + $0x118] sm:$0xff]  ;;  %vm699_vm15 = vcmp.eq.s32.totalorder %v3938_v61, 1  ;;  %v4062_v15 = vsel %vm675_vm9, 1.0, %v5522_v49  ;;  %v4075_v28 = vsel %vm679_vm10, 1.0, %v5522_v49 }
  0xa0   : > { %5701 = vst [vmem:[#allocation212_spill] sm:$0xff] %v4010_v10  ;;  %5702 = vst [vmem:[#allocation213_spill] sm:$0xff] %v4020_v14  ;;  %v550_v10 = vadd.f32 %v530_v9, %v526_v62  ;;  %v558_v14 = vadd.f32 %v546_v13, %v542_v45  ;;  %v4045_v48 = vld [vmem:[%s2855_s26 + $0x178] sm:$0xff]  ;;  %v4080_v39 = vsel %vm683_vm11, 1.0, %v5522_v49  ;;  %v4085_v44 = vsel %vm687_vm12, 1.0, %v5522_v49 }
  0xa1   : > { %5703 = vst [vmem:[#allocation214_spill] sm:$0xff] %v4024_v50  ;;  %5704 = vst [vmem:[#allocation215_spill] sm:$0xff] %v4028_v57  ;;  %v4042_v50 = vpop.eup %2643  ;;  %v4048_v45 = vld [vmem:[%s2855_s26 + $0x198] sm:$0xff]  ;;  %v4057_v57 = vsel %vm671_vm8, 1.0, %v5522_v49  ;;  %v4097_v8 = vsel %vm695_vm14, 1.0, %v5522_v49  ;;  %v4100_v0 = vsel %vm699_vm15, 1.0, %v5522_v49  ;;  %v4108_v63 = vmul.f32 %v4062_v15, %v4034_v27 }
  0xa2   : > { %5705 = vst [vmem:[#allocation216_spill] sm:$0xff] %v4031_v47  ;;  %5706 = vst [vmem:[#allocation217_spill] sm:$0xff] %v4034_v27  ;;  %v562_v43 = vadd.f32 %v554_v24, %v550_v10  ;;  %v4051_v13 = vld [vmem:[%s2855_s26 + $0x1b8] sm:$0xff]  ;;  %v4104_v40 = vmul.f32 %v4057_v57, %v4031_v47  ;;  %v4120_v60 = vmul.f32 %v4085_v44, %v4048_v45  ;;  %vm960_vm0 = vcmp.eq.s32.totalorder %v3915_v7, 2 }
  0xa3   : > { %5707 = vst [vmem:[#allocation218_spill] sm:$0xff] %v4037_v52  ;;  %5708 = vst [vmem:[#allocation219_spill] sm:$0xff] %v4042_v50  ;;  %v4064_v50 = vpop.eup %2645  ;;  %v4067_v10 = vld [vmem:[%s2855_s26 + $0x1d8] sm:$0xff]  ;;  %vm964_vm1 = vcmp.eq.s32.totalorder %v3918_v2, 2  ;;  %vm968_vm2 = vcmp.eq.s32.totalorder %v3921_v51, 2  ;;  %vm972_vm3 = vcmp.eq.s32.totalorder %v3926_v46, 2 }
  0xa4   : > { %5709 = vst [vmem:[#allocation220_spill] sm:$0xff] %v4045_v48  ;;  %5710 = vst [vmem:[#allocation221_spill] sm:$0xff] %v4048_v45  ;;  %v4070_v24 = vld [vmem:[%s2855_s26 + $0x1f8] sm:$0xff]  ;;  %v4092_v20 = vadd.f32 %v562_v43, %v558_v14  ;;  %v4112_v14 = vmul.f32 %v4075_v28, %v4037_v52  ;;  %v4116_v43 = vmul.f32 %v4080_v39, %v4045_v48  ;;  %vm976_vm4 = vcmp.eq.s32.totalorder %v3929_v18, 2 }
  0xa5   : > { %5711 = vst [vmem:[#allocation222_spill] sm:$0xff] %v4051_v13  ;;  %5712 = vst [vmem:[#allocation223_spill] sm:$0xff] %v4057_v57  ;;  %v803_v48 = vadd.f32 %v4108_v63, %v514_v16  ;;  %v2378_v16 = vld [vmem:[%s2855_s26 + $0x258] sm:$0xff]  ;;  %vm980_vm5 = vcmp.eq.s32.totalorder %v3932_v58, 2  ;;  %vm984_vm6 = vcmp.eq.s32.totalorder %v3935_v59, 2  ;;  %vm988_vm7 = vcmp.eq.s32.totalorder %v3938_v61, 2 }
  0xa6   : > { %5713 = vst [vmem:[#allocation224_spill] sm:$0xff] %v4062_v15  ;;  %5714 = vst [vmem:[#allocation225_spill] sm:$0xff] %v4064_v50  ;;  %v4090_v50 = vsel %vm691_vm13, 1.0, %v5522_v49  ;;  %v4128_v15 = vmul.f32 %v4097_v8, %v4067_v10  ;;  %v811_v45 = vadd.f32 %v4116_v43, %v522_v22  ;;  %v2390_v22 = vld [vmem:[%s2855_s26 + $0x2b8] sm:$0xff]  ;;  %v4165_v52 = vsel %vm968_vm2, 1.0, %v5522_v49 }
  0xa7   : > { %5715 = vst [vmem:[#allocation226_spill] sm:$0xff] %v4067_v10  ;;  %5716 = vst [vmem:[#allocation227_spill] sm:$0xff] %v4070_v24  ;;  %v4124_v57 = vmul.f32 %v4090_v50, %v4051_v13  ;;  %v4168_v27 = vsel %vm972_vm3, 1.0, %v5522_v49  ;;  %v4171_v47 = vsel %vm976_vm4, 1.0, %v5522_v49  ;;  %vm1249_vm8 = vcmp.eq.s32.totalorder %v3915_v7, 3 }
  0xa8   : > { %5717 = vst [vmem:[#allocation228_spill] sm:$0xff] %v4075_v28  ;;  %5718 = vst [vmem:[#allocation229_spill] sm:$0xff] %v4080_v39  ;;  %v4132_v28 = vmul.f32 %v4100_v0, %v4070_v24  ;;  %v799_v39 = vadd.f32 %v4104_v40, %v510_v11  ;;  %v2374_v11 = vld [vmem:[%s2855_s26 + $0x238] sm:$0xff]  ;;  %vm1253_vm9 = vcmp.eq.s32.totalorder %v3918_v2, 3  ;;  %vm1257_vm10 = vcmp.eq.s32.totalorder %v3921_v51, 3 }
  0xa9   : > { %5719 = vst [vmem:[#allocation230_spill] sm:$0xff] %v4085_v44  ;;  %5720 = vst [vmem:[#allocation231_spill] sm:$0xff] %v4090_v50  ;;  %v807_v44 = vadd.f32 %v4112_v14, %v518_v53  ;;  %v815_v50 = vadd.f32 %v4120_v60, %v526_v62  ;;  %v819_v13 = vadd.f32 %v4124_v57, %v530_v9  ;;  %v2382_v24 = vld [vmem:[%s2855_s26 + $0x278] sm:$0xff]  ;;  %v4162_v62 = vsel %vm964_vm1, 1.0, %v5522_v49 }
  0xaa   : > { %5721 = vst [vmem:[#allocation232_spill] sm:$0xff] %v4097_v8  ;;  %5722 = vst [vmem:[#allocation233_spill] sm:$0xff] %v4100_v0  ;;  %v823_v8 = vadd.f32 %v4128_v15, %v534_v23  ;;  %v827_v10 = vadd.f32 %v4132_v28, %v538_v1  ;;  %v2370_v0 = vld [vmem:[%s2855_s26 + $0x218] sm:$0xff]  ;;  %v4157_v1 = vsel %vm960_vm0, 1.0, %v5522_v49  ;;  %vm1261_vm11 = vcmp.eq.s32.totalorder %v3926_v46, 3 }
  0xab   : > { %5723 = vst [vmem:[#allocation234_spill] sm:$0xff] %v4104_v40  ;;  %5724 = vst [vmem:[#allocation235_spill] sm:$0xff] %v4108_v63  ;;  %v2386_v53 = vld [vmem:[%s2855_s26 + $0x298] sm:$0xff]  ;;  %v4192_v63 = vmul.f32 %v4168_v27, %v2382_v24  ;;  %vm1265_vm12 = vcmp.eq.s32.totalorder %v3929_v18, 3  ;;  %vm1269_vm13 = vcmp.eq.s32.totalorder %v3932_v58, 3  ;;  %vm1273_vm14 = vcmp.eq.s32.totalorder %v3935_v59, 3 }
  0xac   : > { %5725 = vst [vmem:[#allocation236_spill] sm:$0xff] %v4112_v14  ;;  %5726 = vst [vmem:[#allocation237_spill] sm:$0xff] %v4116_v43  ;;  %v2394_v23 = vld [vmem:[%s2855_s26 + $0x2d8] sm:$0xff]  ;;  %v4186_v43 = vmul.f32 %v4162_v62, %v2374_v11  ;;  %v4189_v14 = vmul.f32 %v4165_v52, %v2378_v16  ;;  %v4195_v40 = vmul.f32 %v4171_v47, %v2386_v53  ;;  %vm1277_vm15 = vcmp.eq.s32.totalorder %v3938_v61, 3 }
  0xad   : > { %5727 = vst [vmem:[#allocation238_spill] sm:$0xff] %v4120_v60  ;;  %5728 = vst [vmem:[#allocation239_spill] sm:$0xff] %v4124_v57  ;;  %v2398_v9 = vld [vmem:[%s2855_s26 + $0x2f8] sm:$0xff]  ;;  %v4180_v57 = vsel %vm988_vm7, 1.0, %v5522_v49  ;;  %v4183_v60 = vmul.f32 %v4157_v1, %v2370_v0  ;;  %v1100_v53 = vadd.f32 %v4192_v63, %v811_v45  ;;  %v4229_v7 = vsel %vm1249_vm8, 1.0, %v5522_v49 }
  0xae   : > { %5729 = vst [vmem:[#allocation240_spill] sm:$0xff] %v4128_v15  ;;  %5730 = vst [vmem:[#allocation241_spill] sm:$0xff] %v4132_v28  ;;  %v4174_v28 = vsel %vm980_vm5, 1.0, %v5522_v49  ;;  %v4177_v15 = vsel %vm984_vm6, 1.0, %v5522_v49  ;;  %v4204_v11 = vmul.f32 %v4180_v57, %v2398_v9  ;;  %v1096_v24 = vadd.f32 %v4189_v14, %v807_v44  ;;  %v2434_v9 = vld [vmem:[%s2855_s26 + $0x318] sm:$0xff] }
  0xaf   : > { %5731 = vst [vmem:[#allocation242_spill] sm:$0xff] %v4157_v1  ;;  %5732 = vst [vmem:[#allocation243_spill] sm:$0xff] %v4162_v62  ;;  %v4198_v6 = vmul.f32 %v4174_v28, %v2390_v22  ;;  %v4201_v0 = vmul.f32 %v4177_v15, %v2394_v23  ;;  %v1088_v16 = vadd.f32 %v4183_v60, %v799_v39  ;;  %v2438_v39 = vld [vmem:[%s2855_s26 + $0x338] sm:$0xff]  ;;  %v4234_v2 = vsel %vm1253_vm9, 1.0, %v5522_v49 }
  0xb0   : > { %5733 = vst [vmem:[#allocation244_spill] sm:$0xff] %v4165_v52  ;;  %5734 = vst [vmem:[#allocation245_spill] sm:$0xff] %v4168_v27  ;;  %v1092_v52 = vadd.f32 %v4186_v43, %v803_v48  ;;  %v2442_v48 = vld [vmem:[%s2855_s26 + $0x358] sm:$0xff]  ;;  %v4237_v51 = vsel %vm1257_vm10, 1.0, %v5522_v49  ;;  %v4240_v46 = vsel %vm1261_vm11, 1.0, %v5522_v49  ;;  %v4243_v18 = vsel %vm1265_vm12, 1.0, %v5522_v49 }
  0xb1   : > { %5735 = vst [vmem:[#allocation246_spill] sm:$0xff] %v4171_v47  ;;  %5736 = vst [vmem:[#allocation247_spill] sm:$0xff] %v4174_v28  ;;  %v1104_v47 = vadd.f32 %v4195_v40, %v815_v50  ;;  %v1108_v22 = vadd.f32 %v4198_v6, %v819_v13  ;;  %v1112_v23 = vadd.f32 %v4201_v0, %v823_v8  ;;  %v2450_v50 = vld [vmem:[%s2855_s26 + $0x398] sm:$0xff]  ;;  %v4246_v58 = vsel %vm1269_vm13, 1.0, %v5522_v49 }
  0xb2   : > { %5737 = vst [vmem:[#allocation248_spill] sm:$0xff] %v4177_v15  ;;  %5738 = vst [vmem:[#allocation249_spill] sm:$0xff] %v4180_v57  ;;  %v1116_v15 = vadd.f32 %v4204_v11, %v827_v10  ;;  %v2446_v57 = vld [vmem:[%s2855_s26 + $0x378] sm:$0xff]  ;;  %v4249_v59 = vsel %vm1273_vm14, 1.0, %v5522_v49  ;;  %v4252_v61 = vsel %vm1277_vm15, 1.0, %v5522_v49  ;;  %v4255_v13 = vmul.f32 %v4229_v7, %v2434_v9 }
  0xb3   : > { %5739 = vst [vmem:[#allocation250_spill] sm:$0xff] %v4183_v60  ;;  %5740 = vst [vmem:[#allocation251_spill] sm:$0xff] %v4186_v43  ;;  %v2454_v8 = vld [vmem:[%s2855_s26 + $0x3b8] sm:$0xff]  ;;  %v4258_v10 = vmul.f32 %v4234_v2, %v2438_v39  ;;  %v4261_v28 = vmul.f32 %v4237_v51, %v2442_v48  ;;  %v4264_v27 = vmul.f32 %v4240_v46, %v2446_v57 }
  0xb4   : > { %5741 = vst [vmem:[#allocation252_spill] sm:$0xff] %v4189_v14  ;;  %5742 = vst [vmem:[#allocation253_spill] sm:$0xff] %v4192_v63  ;;  %v2458_v44 = vld [vmem:[%s2855_s26 + $0x3d8] sm:$0xff]  ;;  %v4267_v62 = vmul.f32 %v4243_v18, %v2450_v50  ;;  %v4270_v1 = vmul.f32 %v4246_v58, %v2454_v8  ;;  %v1377_v39 = vadd.f32 %v4255_v13, %v1088_v16  ;;  %v5779_v14 = vld [vmem:[#allocation195_spill] sm:$0xff] }
  0xb5   : > { %5743 = vst [vmem:[#allocation254_spill] sm:$0xff] %v4195_v40  ;;  %5744 = vst [vmem:[#allocation255_spill] sm:$0xff] %v4198_v6  ;;  %v2462_v45 = vld [vmem:[%s2855_s26 + $0x3f8] sm:$0xff]  ;;  %v4273_v49 = vmul.f32 %v4249_v59, %v2458_v44  ;;  %v1381_v48 = vadd.f32 %v4258_v10, %v1092_v52  ;;  %v1389_v57 = vadd.f32 %v4264_v27, %v1100_v53  ;;  %v5777_v40 = vld [vmem:[#allocation194_spill] sm:$0xff] }
  0xb6   : > { %5745 = vst [vmem:[#allocation256_spill] sm:$0xff] %v4201_v0  ;;  %5746 = vst [vmem:[#allocation257_spill] sm:$0xff] %v4204_v11  ;;  %v4276_v9 = vmul.f32 %v4252_v61, %v2462_v45  ;;  %v1393_v50 = vadd.f32 %v4267_v62, %v1104_v47 }
  0xb7   : > { %5747 = vst [vmem:[#allocation258_spill] sm:$0xff] %v4229_v7  ;;  %5748 = vst [vmem:[#allocation259_spill] sm:$0xff] %v4234_v2  ;;  %v1401_v8 = vadd.f32 %v4273_v49, %v1112_v23  ;;  %v1537_v7 = vmax.f32 %v1377_v39, 1e-30  ;;  %v1549_v53 = vmax.f32 %v1389_v57, 1e-30 }
  0xb8   : > { %5749 = vst [vmem:[#allocation260_spill] sm:$0xff] %v4237_v51  ;;  %5750 = vst [vmem:[#allocation261_spill] sm:$0xff] %v4240_v46  ;;  %v1385_v51 = vadd.f32 %v4261_v28, %v1096_v24  ;;  %v1405_v44 = vadd.f32 %v4276_v9, %v1116_v15  ;;  %v1521_v46 = vsub.f32 1.0, %v1393_v50  ;;  %v1541_v24 = vmax.f32 %v1381_v48, 1e-30 }
  0xb9   : > { %5751 = vst [vmem:[#allocation262_spill] sm:$0xff] %v4243_v18  ;;  %5752 = vst [vmem:[#allocation263_spill] sm:$0xff] %v4246_v58  ;;  %v1397_v18 = vadd.f32 %v4270_v1, %v1108_v22  ;;  %v1509_v58 = vsub.f32 1.0, %v1381_v48  ;;  %v1529_v2 = vsub.f32 1.0, %v1401_v8  ;;  %v1553_v47 = vmax.f32 %v1393_v50, 1e-30 }
  0xba   : > { %5753 = vst [vmem:[#allocation264_spill] sm:$0xff] %v4249_v59  ;;  %5754 = vst [vmem:[#allocation265_spill] sm:$0xff] %v4252_v61  ;;  %v1505_v59 = vsub.f32 1.0, %v1377_v39  ;;  %v1513_v45 = vsub.f32 1.0, %v1385_v51  ;;  %v1517_v61 = vsub.f32 1.0, %v1389_v57  ;;  %v1533_v52 = vsub.f32 1.0, %v1405_v44 }
  0xbb   : > { %5755 = vst [vmem:[#allocation266_spill] sm:$0xff] %v4255_v13  ;;  %5756 = vst [vmem:[#allocation267_spill] sm:$0xff] %v4258_v10  ;;  %v1525_v16 = vsub.f32 1.0, %v1397_v18  ;;  %v1557_v22 = vmax.f32 %v1397_v18, 1e-30  ;;  %2647 = vlog2.f32 %v1537_v7  ;;  %v4298_v7 = vmul.f32 %v1529_v2, %v1529_v2  ;;  %v2674_v2 = vld [vmem:[%s2855_s26 + $0x60] sm:$0xff] }
  0xbc   : > { %5757 = vst [vmem:[#allocation268_spill] sm:$0xff] %v4261_v28  ;;  %5758 = vst [vmem:[#allocation269_spill] sm:$0xff] %v4264_v27  ;;  %v1545_v28 = vmax.f32 %v1385_v51, 1e-30  ;;  %v4286_v27 = vmul.f32 %v1505_v59, %v1505_v59  ;;  %v1561_v23 = vmax.f32 %v1401_v8, 1e-30  ;;  %2649 = vlog2.f32 %v1541_v24 }
  0xbd   : > { %5759 = vst [vmem:[#allocation270_spill] sm:$0xff] %v4267_v62  ;;  %5760 = vst [vmem:[#allocation271_spill] sm:$0xff] %v4270_v1  ;;  %v1565_v15 = vmax.f32 %v1405_v44, 1e-30  ;;  %v4292_v51 = vmul.f32 %v1517_v61, %v1517_v61  ;;  %v4294_v59 = vmul.f32 %v1521_v46, %v1521_v46  ;;  %v4296_v39 = vmul.f32 %v1525_v16, %v1525_v16  ;;  %v2673_v46 = vld [vmem:[%s2855_s26 + $0x40] sm:$0xff]  ;;  %v2682_v1 = vld [vmem:[%s2855_s26 + $0x68] sm:$0xff] }
  0xbe   : > { %5761 = vst [vmem:[#allocation272_spill] sm:$0xff] %v4273_v49  ;;  %5762 = vst [vmem:[#allocation273_spill] sm:$0xff] %v4276_v9  ;;  %v4288_v9 = vmul.f32 %v1509_v58, %v1509_v58  ;;  %v4290_v49 = vmul.f32 %v1513_v45, %v1513_v45  ;;  %2651 = vlog2.f32 %v1545_v28  ;;  %v4300_v18 = vmul.f32 %v1533_v52, %v1533_v52  ;;  %v2671_v58 = vld [vmem:[%s2855_s26] sm:$0xff] }
  0xbf   : > { %5764 = vst [vmem:[#allocation275_spill] sm:$0xff] %v4292_v51  ;;  %5765 = vst [vmem:[#allocation276_spill] sm:$0xff] %v4294_v59  ;;  %2653 = vlog2.f32 %v1549_v53  ;;  %v571_v48 = vadd.f32 %v2671_v58, %v2926_v25  ;;  %v2672_v28 = vld [vmem:[%s2855_s26 + $0x20] sm:$0xff]  ;;  %v579_v57 = vadd.f32 %v2673_v46, %v2934_v29  ;;  %v583_v50 = vadd.f32 %v2674_v2, %v2937_v30  ;;  %v5795_v59 = vld [vmem:[#allocation60_spill] sm:$0xff] }
  0xc0   : > { %5763 = vst [vmem:[#allocation274_spill] sm:$0xff] %v4290_v49  ;;  %5766 = vst [vmem:[#allocation277_spill] sm:$0xff] %v4296_v39  ;;  %2655 = vlog2.f32 %v1553_v47  ;;  %v575_v61 = vadd.f32 %v2672_v28, %v2929_v26  ;;  %v2675_v8 = vld [vmem:[%s2855_s26 + $0x80] sm:$0xff]  ;;  %v2679_v28 = vld [vmem:[%s2855_s26 + $0x8] sm:$0xff] }
  0xc1   : > { %5767 = vst [vmem:[#allocation278_spill] sm:$0xff] %v4298_v7  ;;  %5768 = vst [vmem:[#allocation279_spill] sm:$0xff] %v4300_v18  ;;  %2657 = vlog2.f32 %v1557_v22  ;;  %v587_v44 = vadd.f32 %v2675_v8, %v2940_v31  ;;  %v2676_v45 = vld [vmem:[%s2855_s26 + $0xa0] sm:$0xff]  ;;  %v607_v22 = vadd.f32 %v583_v50, %v579_v57  ;;  %v572_v46 = vadd.f32 %v2679_v28, %v3253_v56  ;;  %v2684_v57 = vld [vmem:[%s2855_s26 + $0xa8] sm:$0xff] }
  0xc2   : > { %1961 = vst [vmem:[%s3206_s30 + $0x18] sm:$0xff] %v4092_v20  ;;  %v591_v16 = vadd.f32 %v2676_v45, %v2943_v32  ;;  %2659 = vlog2.f32 %v1561_v23  ;;  %v2677_v52 = vld [vmem:[%s2855_s26 + $0xc0] sm:$0xff]  ;;  %v603_v47 = vadd.f32 %v575_v61, %v571_v48  ;;  %v2680_v23 = vld [vmem:[%s2855_s26 + $0x28] sm:$0xff]  ;;  %v592_v50 = vadd.f32 %v2684_v57, %v3270_v37  ;;  %v5781_v18 = vld [vmem:[#allocation196_spill] sm:$0xff] }
  0xc3   : > { %v595_v24 = vadd.f32 %v2677_v52, %v2946_v33  ;;  %v2678_v53 = vld [vmem:[%s2855_s26 + $0xe0] sm:$0xff]  ;;  %2661 = vlog2.f32 %v1565_v15  ;;  %v576_v8 = vadd.f32 %v2680_v23, %v3258_v55  ;;  %v2681_v45 = vld [vmem:[%s2855_s26 + $0x48] sm:$0xff]  ;;  %v581_v57 = vadd.f32 %v3617_v54, %v3584_v4 }
  0xc4   : > { %v599_v20 = vadd.f32 %v2678_v53, %v2949_v34  ;;  %v611_v58 = vadd.f32 %v591_v16, %v587_v44  ;;  %v580_v52 = vadd.f32 %v2681_v45, %v3261_v41  ;;  %v584_v53 = vadd.f32 %v2682_v1, %v3264_v35  ;;  %v2683_v61 = vld [vmem:[%s2855_s26 + $0x88] sm:$0xff] }
  0xc5   : > { %v619_v48 = vadd.f32 %v607_v22, %v603_v47  ;;  %v588_v15 = vadd.f32 %v2683_v61, %v3267_v36  ;;  %v2685_v44 = vld [vmem:[%s2855_s26 + $0xc8] sm:$0xff]  ;;  %v604_v45 = vadd.f32 %v576_v8, %v572_v46  ;;  %v573_v22 = vadd.f32 %v3611_v19, %v3577_v21  ;;  %v5769_v21 = vld [vmem:[#allocation122_spill] sm:$0xff] }
  0xc6   : > { %v615_v2 = vadd.f32 %v599_v20, %v595_v24  ;;  %v596_v16 = vadd.f32 %v2685_v44, %v3273_v38  ;;  %v4334_v24 = vpop.eup %2647  ;;  %v2686_v28 = vld [vmem:[%s2855_s26 + $0xe8] sm:$0xff]  ;;  %v608_v62 = vadd.f32 %v584_v53, %v580_v52  ;;  %v577_v61 = vadd.f32 %v3614_v12, %v3581_v3  ;;  %v5772_v53 = vld [vmem:[#allocation128_spill] sm:$0xff] }
  0xc7   : > { %v600_v23 = vadd.f32 %v2686_v28, %v3276_v42  ;;  %v4338_v1 = vpop.eup %2649  ;;  %v612_v47 = vadd.f32 %v592_v50, %v588_v15  ;;  %v585_v46 = vadd.f32 %v3620_v17, %v3587_v5  ;;  %v5770_v3 = vld [vmem:[#allocation127_spill] sm:$0xff]  ;;  %v5774_v50 = vld [vmem:[#allocation129_spill] sm:$0xff] }
  0xc8   : > { %v623_v20 = vadd.f32 %v615_v2, %v611_v58  ;;  %v4346_v44 = vpop.eup %2651  ;;  %v620_v10 = vadd.f32 %v608_v62, %v604_v45  ;;  %v589_v52 = vadd.f32 %v5770_v3, %v5769_v21  ;;  %v5771_v4 = vld [vmem:[#allocation123_spill] sm:$0xff]  ;;  %v605_v45 = vadd.f32 %v577_v61, %v573_v22  ;;  %v5778_v21 = vld [vmem:[#allocation202_spill] sm:$0xff]  ;;  %v5783_v61 = vld [vmem:[#allocation197_spill] sm:$0xff] }
  0xc9   : > { %v616_v2 = vadd.f32 %v600_v23, %v596_v16  ;;  %v4350_v8 = vpop.eup %2653  ;;  %v593_v15 = vadd.f32 %v5772_v53, %v5771_v4  ;;  %v5775_v16 = vld [vmem:[#allocation125_spill] sm:$0xff]  ;;  %v609_v13 = vadd.f32 %v585_v46, %v581_v57  ;;  %v574_v63 = vadd.f32 %v5778_v21, %v5777_v40  ;;  %v5780_v4 = vld [vmem:[#allocation203_spill] sm:$0xff]  ;;  %v5789_v21 = vld [vmem:[#allocation200_spill] sm:$0xff] }
  0xca   : > { %v627_v58 = vadd.f32 %v623_v20, %v619_v48  ;;  %v5773_v48 = vld [vmem:[#allocation124_spill] sm:$0xff]  ;;  %v5776_v20 = vld [vmem:[#allocation130_spill] sm:$0xff]  ;;  %v4366_v28 = vpop.eup %2655  ;;  %v578_v43 = vadd.f32 %v5780_v4, %v5779_v14  ;;  %v5784_v57 = vld [vmem:[#allocation205_spill] sm:$0xff] }
  0xcb   : > { %v597_v62 = vadd.f32 %v5774_v50, %v5773_v48  ;;  %v601_v5 = vadd.f32 %v5776_v20, %v5775_v16  ;;  %v624_v23 = vadd.f32 %v616_v2, %v612_v47  ;;  %v4368_v11 = vpop.eup %2657  ;;  %v613_v0 = vadd.f32 %v593_v15, %v589_v52  ;;  %v5782_v47 = vld [vmem:[#allocation204_spill] sm:$0xff]  ;;  %v5785_v15 = vld [vmem:[#allocation198_spill] sm:$0xff]  ;;  %v5786_v40 = vld [vmem:[#allocation207_spill] sm:$0xff] }
  0xcc   : > { %v4374_v60 = vpop.eup %2659  ;;  %1970 = vst [vmem:[%s4356_s7] sm:$0xff] %v627_v58  ;;  %v621_v16 = vadd.f32 %v609_v13, %v605_v45  ;;  %v582_v22 = vadd.f32 %v5782_v47, %v5781_v18  ;;  %v586_v2 = vadd.f32 %v5784_v57, %v5783_v61  ;;  %v5788_v14 = vld [vmem:[#allocation208_spill] sm:$0xff]  ;;  %v5790_v58 = vld [vmem:[#allocation209_spill] sm:$0xff]  ;;  %v5792_v13 = vld [vmem:[#allocation210_spill] sm:$0xff]  ;;  %v606_v7 = vadd.f32 %v578_v43, %v574_v63 }
  0xcd   : > { %v617_v6 = vadd.f32 %v601_v5, %v597_v62  ;;  %v628_v48 = vadd.f32 %v624_v23, %v620_v10  ;;  %v4381_v46 = vpop.eup %2661  ;;  %v590_v62 = vadd.f32 %v5786_v40, %v5785_v15  ;;  %v5787_v5 = vld [vmem:[#allocation199_spill] sm:$0xff]  ;;  %v598_v10 = vadd.f32 %v5790_v58, %v5789_v21  ;;  %v5791_v23 = vld [vmem:[#allocation201_spill] sm:$0xff]  ;;  %v5793_v57 = vld [vmem:[#allocation58_spill] sm:$0xff] }
  0xce   : > { %v594_v4 = vadd.f32 %v5788_v14, %v5787_v5  ;;  %v602_v45 = vadd.f32 %v5792_v13, %v5791_v23  ;;  %v610_v18 = vadd.f32 %v586_v2, %v582_v22  ;;  %v1567_v39 = vmul.f32 0.6931472, %v5793_v57  ;;  %v5796_v14 = vld [vmem:[#allocation61_spill] sm:$0xff]  ;;  %v5797_v21 = vld [vmem:[#allocation62_spill] sm:$0xff]  ;;  %v5798_v49 = vld [vmem:[#allocation63_spill] sm:$0xff] }
  0xcf   : > { %v625_v52 = vadd.f32 %v617_v6, %v613_v0  ;;  %v5794_v6 = vld [vmem:[#allocation59_spill] sm:$0xff]  ;;  %1971 = vst [vmem:[%s4356_s7 + $0x8] sm:$0xff] %v628_v48  ;;  %v1583_v5 = vmul.f32 0.6931472, %v5795_v59  ;;  %v1591_v51 = vmul.f32 0.6931472, %v5796_v14 }
  0xd0   : > { %v614_v61 = vadd.f32 %v594_v4, %v590_v62  ;;  %v1575_v0 = vmul.f32 0.6931472, %v5794_v6  ;;  %v618_v15 = vadd.f32 %v602_v45, %v598_v10  ;;  %v622_v40 = vadd.f32 %v610_v18, %v606_v7  ;;  %v5799_v63 = vld [vmem:[#allocation66_spill] sm:$0xff]  ;;  %v5800_v22 = vld [vmem:[#allocation71_spill] sm:$0xff]  ;;  %v5803_v7 = vld [vmem:[#allocation52_spill] sm:$0xff] }
  0xd1   : > { %v629_v47 = vadd.f32 %v625_v52, %v621_v16  ;;  %v1599_v58 = vmul.f32 0.6931472, %v5797_v21  ;;  %v1607_v23 = vmul.f32 0.6931472, %v5798_v49  ;;  %v1615_v43 = vmul.f32 0.6931472, %v5799_v63 }
  0xd2   : > { %v626_v16 = vadd.f32 %v618_v15, %v614_v61  ;;  %v1623_v4 = vmul.f32 0.6931472, %v5800_v22  ;;  %v5801_v2 = vld [vmem:[#allocation50_spill] sm:$0xff]  ;;  %v5802_v52 = vld [vmem:[#allocation51_spill] sm:$0xff]  ;;  %v4408_v59 = vmul.f32 %v5803_v7, %v1583_v5  ;;  %v5804_v62 = vld [vmem:[#allocation53_spill] sm:$0xff] }
  0xd3   : > { %v4401_v57 = vmul.f32 %v5801_v2, %v1567_v39  ;;  %v4404_v48 = vmul.f32 %v5802_v52, %v1575_v0  ;;  %1972 = vst [vmem:[%s4356_s7 + $0x10] sm:$0xff] %v629_v47  ;;  %v4411_v14 = vmul.f32 %v5804_v62, %v1591_v51  ;;  %v5805_v10 = vld [vmem:[#allocation54_spill] sm:$0xff]  ;;  %v5806_v45 = vld [vmem:[#allocation55_spill] sm:$0xff]  ;;  %v5807_v39 = vld [vmem:[#allocation56_spill] sm:$0xff] }
  0xd4   : > { %v4414_v49 = vmul.f32 %v5805_v10, %v1599_v58  ;;  %v4417_v18 = vmul.f32 %v5806_v45, %v1607_v23  ;;  %v630_v61 = vadd.f32 %v626_v16, %v622_v40  ;;  %v4420_v6 = vmul.f32 %v5807_v39, %v1615_v43  ;;  %v5808_v0 = vld [vmem:[#allocation57_spill] sm:$0xff]  ;;  %v5809_v43 = vld [vmem:[#allocation126_spill] sm:$0xff]  ;;  %v5811_v2 = vld [vmem:[#allocation132_spill] sm:$0xff] }
  0xd5   : > { %v4423_v15 = vmul.f32 %v5808_v0, %v1623_v4  ;;  %v1694_v47 = vmul.f32 %v2926_v25, %v4401_v57  ;;  %v1698_v51 = vmul.f32 %v2929_v26, %v4404_v48  ;;  %v1702_v58 = vmul.f32 %v2934_v29, %v4408_v59  ;;  %v5810_v29 = vld [vmem:[#allocation131_spill] sm:$0xff]  ;;  %v5812_v52 = vld [vmem:[#allocation133_spill] sm:$0xff]  ;;  %v5813_v62 = vld [vmem:[#allocation134_spill] sm:$0xff] }
  0xd6   : > { %v1706_v5 = vmul.f32 %v2937_v30, %v4411_v14  ;;  %v1710_v40 = vmul.f32 %v2940_v31, %v4414_v49  ;;  %v1714_v21 = vmul.f32 %v2943_v32, %v4417_v18  ;;  %v1718_v23 = vmul.f32 %v2946_v33, %v4420_v6  ;;  %1973 = vst [vmem:[%s4356_s7 + $0x18] sm:$0xff] %v630_v61  ;;  %v5814_v10 = vld [vmem:[#allocation135_spill] sm:$0xff] }
  0xd7   : > { %v1722_v25 = vmul.f32 %v2949_v34, %v4423_v15  ;;  %v1726_v63 = vadd.f32 %v1698_v51, %v1694_v47  ;;  %v1569_v16 = vmul.f32 0.6931472, %v5809_v43  ;;  %v1577_v22 = vmul.f32 0.6931472, %v5810_v29  ;;  %v5815_v34 = vld [vmem:[#allocation136_spill] sm:$0xff]  ;;  %v5816_v47 = vld [vmem:[#allocation139_spill] sm:$0xff] }
  0xd8   : > { %v1730_v26 = vadd.f32 %v1706_v5, %v1702_v58  ;;  %v1734_v30 = vadd.f32 %v1714_v21, %v1710_v40  ;;  %v1585_v31 = vmul.f32 0.6931472, %v5811_v2  ;;  %v1593_v7 = vmul.f32 0.6931472, %v5812_v52  ;;  %v5817_v58 = vld [vmem:[#allocation114_spill] sm:$0xff]  ;;  %v5818_v61 = vld [vmem:[#allocation115_spill] sm:$0xff] }
  0xd9   : > { %v1738_v4 = vadd.f32 %v1722_v25, %v1718_v23  ;;  %v1601_v33 = vmul.f32 0.6931472, %v5813_v62  ;;  %v1609_v45 = vmul.f32 0.6931472, %v5814_v10  ;;  %v1617_v39 = vmul.f32 0.6931472, %v5815_v34 }
  0xda   : > { %v1742_v32 = vadd.f32 %v1730_v26, %v1726_v63  ;;  %v1625_v51 = vmul.f32 0.6931472, %v5816_v47  ;;  %v4451_v5 = vmul.f32 %v5817_v58, %v1569_v16  ;;  %v4454_v40 = vmul.f32 %v5818_v61, %v1577_v22  ;;  %v5819_v21 = vld [vmem:[#allocation116_spill] sm:$0xff]  ;;  %v5820_v25 = vld [vmem:[#allocation117_spill] sm:$0xff]  ;;  %v5821_v26 = vld [vmem:[#allocation118_spill] sm:$0xff] }
  0xdb   : > { %v1746_v0 = vadd.f32 %v1738_v4, %v1734_v30  ;;  %v4457_v23 = vmul.f32 %v5819_v21, %v1585_v31  ;;  %v4460_v63 = vmul.f32 %v5820_v25, %v1593_v7  ;;  %v4463_v43 = vmul.f32 %v5821_v26, %v1601_v33  ;;  %v5822_v29 = vld [vmem:[#allocation119_spill] sm:$0xff]  ;;  %v5823_v4 = vld [vmem:[#allocation120_spill] sm:$0xff]  ;;  %v5824_v16 = vld [vmem:[#allocation121_spill] sm:$0xff] }
  0xdc   : > { %v4466_v2 = vmul.f32 %v5822_v29, %v1609_v45  ;;  %v4469_v52 = vmul.f32 %v5823_v4, %v1617_v39  ;;  %v4472_v62 = vmul.f32 %v5824_v16, %v1625_v51  ;;  %v1695_v22 = vmul.f32 %v3253_v56, %v4451_v5  ;;  %v5825_v39 = vld [vmem:[#allocation206_spill] sm:$0xff]  ;;  %v5827_v58 = vld [vmem:[#allocation212_spill] sm:$0xff]  ;;  %v5828_v61 = vld [vmem:[#allocation213_spill] sm:$0xff] }
  0xdd   : > { %v1750_v30 = vadd.f32 %v1746_v0, %v1742_v32  ;;  %v1699_v31 = vmul.f32 %v3258_v55, %v4454_v40  ;;  %v1703_v7 = vmul.f32 %v3261_v41, %v4457_v23  ;;  %v1707_v32 = vmul.f32 %v3264_v35, %v4460_v63  ;;  %v5826_v41 = vld [vmem:[#allocation211_spill] sm:$0xff]  ;;  %v5829_v25 = vld [vmem:[#allocation214_spill] sm:$0xff] }
  0xde   : > { %v1711_v33 = vmul.f32 %v3267_v36, %v4463_v43  ;;  %v1715_v56 = vmul.f32 %v3270_v37, %v4466_v2  ;;  %v1719_v10 = vmul.f32 %v3273_v38, %v4469_v52  ;;  %v1723_v45 = vmul.f32 %v3276_v42, %v4472_v62  ;;  %v5830_v38 = vld [vmem:[#allocation215_spill] sm:$0xff] }
  0xdf   : > { %v1727_v34 = vadd.f32 %v1699_v31, %v1695_v22  ;;  %v1731_v55 = vadd.f32 %v1707_v32, %v1703_v7  ;;  %v1571_v0 = vmul.f32 0.6931472, %v5825_v39  ;;  %v1579_v47 = vmul.f32 0.6931472, %v5826_v41  ;;  %1982 = vst [vmem:[%s4480_s10] sm:$0xff] %v1750_v30  ;;  %v5831_v4 = vld [vmem:[#allocation219_spill] sm:$0xff]  ;;  %v5832_v22 = vld [vmem:[#allocation225_spill] sm:$0xff] }
  0xe0   : > { %v1735_v35 = vadd.f32 %v1715_v56, %v1711_v33  ;;  %v1739_v51 = vadd.f32 %v1723_v45, %v1719_v10  ;;  %v1587_v36 = vmul.f32 0.6931472, %v5827_v58  ;;  %v1595_v21 = vmul.f32 0.6931472, %v5828_v61  ;;  %v5833_v7 = vld [vmem:[#allocation186_spill] sm:$0xff]  ;;  %v5834_v30 = vld [vmem:[#allocation187_spill] sm:$0xff] }
  0xe1   : > { %v1743_v37 = vadd.f32 %v1731_v55, %v1727_v34  ;;  %v1603_v26 = vmul.f32 0.6931472, %v5829_v25  ;;  %v1611_v29 = vmul.f32 0.6931472, %v5830_v38  ;;  %v1619_v42 = vmul.f32 0.6931472, %v5831_v4 }
  0xe2   : > { %v1747_v16 = vadd.f32 %v1739_v51, %v1735_v35  ;;  %v1627_v31 = vmul.f32 0.6931472, %v5832_v22  ;;  %v4506_v32 = vmul.f32 %v5833_v7, %v1571_v0  ;;  %v4509_v33 = vmul.f32 %v5834_v30, %v1579_v47  ;;  %v5836_v56 = vld [vmem:[#allocation188_spill] sm:$0xff]  ;;  %v5838_v45 = vld [vmem:[#allocation189_spill] sm:$0xff]  ;;  %v5840_v55 = vld [vmem:[#allocation190_spill] sm:$0xff] }
  0xe3   : > { %v4512_v10 = vmul.f32 %v5836_v56, %v1587_v36  ;;  %v4515_v34 = vmul.f32 %v5838_v45, %v1595_v21  ;;  %v4518_v39 = vmul.f32 %v5840_v55, %v1603_v26  ;;  %v5842_v41 = vld [vmem:[#allocation191_spill] sm:$0xff]  ;;  %v5844_v51 = vld [vmem:[#allocation192_spill] sm:$0xff]  ;;  %v5846_v61 = vld [vmem:[#allocation193_spill] sm:$0xff]  ;;  %v1597_v22 = vmul.f32 0.6931472, %v4350_v8 }
  0xe4   : > { %5835 = vst [vmem:[#allocation122_spill] sm:$0xff] %v4509_v33  ;;  %v4521_v58 = vmul.f32 %v5842_v41, %v1611_v29  ;;  %v1751_v35 = vadd.f32 %v1747_v16, %v1743_v37  ;;  %v4524_v0 = vmul.f32 %v5844_v51, %v1619_v42  ;;  %v4527_v47 = vmul.f32 %v5846_v61, %v1627_v31  ;;  %v5850_v56 = vld [vmem:[#allocation274_spill] sm:$0xff]  ;;  %v5852_v8 = vld [vmem:[#allocation275_spill] sm:$0xff] }
  0xe5   : > { %5837 = vst [vmem:[#allocation127_spill] sm:$0xff] %v4512_v10  ;;  %5839 = vst [vmem:[#allocation123_spill] sm:$0xff] %v4515_v34  ;;  %v1696_v36 = vmul.f32 %v3611_v19, %v4506_v32  ;;  %v1700_v21 = vmul.f32 %v3614_v12, %v4509_v33  ;;  %v1704_v25 = vmul.f32 %v3617_v54, %v4512_v10  ;;  %v1573_v42 = vmul.f32 0.6931472, %v4334_v24  ;;  %v5858_v41 = vld [vmem:[#allocation278_spill] sm:$0xff] }
  0xe6   : > { %5841 = vst [vmem:[#allocation128_spill] sm:$0xff] %v4518_v39  ;;  %5843 = vst [vmem:[#allocation124_spill] sm:$0xff] %v4521_v58  ;;  %v1708_v26 = vmul.f32 %v3620_v17, %v4515_v34  ;;  %v1712_v37 = vmul.f32 %v5770_v3, %v4518_v39  ;;  %v1716_v38 = vmul.f32 %v5772_v53, %v4521_v58  ;;  %v1581_v54 = vmul.f32 0.6931472, %v4338_v1  ;;  %v5862_v51 = vld [vmem:[#allocation202_spill] sm:$0xff]  ;;  %v2706_v58 = vld [vmem:[%s2855_s26 + $0x170] sm:$0xff] }
  0xe7   : > { %5845 = vst [vmem:[#allocation129_spill] sm:$0xff] %v4524_v0  ;;  %5847 = vst [vmem:[#allocation125_spill] sm:$0xff] %v4527_v47  ;;  %v1720_v29 = vmul.f32 %v5774_v50, %v4524_v0  ;;  %v1724_v19 = vmul.f32 %v5776_v20, %v4527_v47  ;;  %v1728_v4 = vadd.f32 %v1700_v21, %v1696_v36  ;;  %v1589_v3 = vmul.f32 0.6931472, %v4346_v44  ;;  %v5863_v36 = vld [vmem:[#allocation203_spill] sm:$0xff]  ;;  %v2709_v39 = vld [vmem:[%s2855_s26 + $0x1d0] sm:$0xff] }
  0xe8   : > { %v1732_v12 = vadd.f32 %v1708_v26, %v1704_v25  ;;  %1983 = vst [vmem:[%s4480_s10 + $0x8] sm:$0xff] %v1751_v35  ;;  %v1736_v17 = vadd.f32 %v1716_v38, %v1712_v37  ;;  %v1605_v31 = vmul.f32 0.6931472, %v4366_v28  ;;  %v1613_v50 = vmul.f32 0.6931472, %v4368_v11  ;;  %v5854_v28 = vld [vmem:[#allocation276_spill] sm:$0xff] }
  0xe9   : > { %v1740_v16 = vadd.f32 %v1724_v19, %v1720_v29  ;;  %v1621_v20 = vmul.f32 0.6931472, %v4374_v60  ;;  %v1629_v30 = vmul.f32 0.6931472, %v4381_v46  ;;  %v4555_v24 = vmul.f32 %v4286_v27, %v1573_v42  ;;  %v5856_v11 = vld [vmem:[#allocation277_spill] sm:$0xff]  ;;  %v5860_v35 = vld [vmem:[#allocation279_spill] sm:$0xff] }
  0xea   : > { %v1744_v53 = vadd.f32 %v1732_v12, %v1728_v4  ;;  %v4558_v1 = vmul.f32 %v4288_v9, %v1581_v54  ;;  %v4561_v44 = vmul.f32 %v5850_v56, %v1589_v3  ;;  %v4564_v45 = vmul.f32 %v5852_v8, %v1597_v22  ;;  %v5864_v25 = vld [vmem:[#allocation204_spill] sm:$0xff]  ;;  %v5865_v37 = vld [vmem:[#allocation205_spill] sm:$0xff]  ;;  %v5866_v29 = vld [vmem:[#allocation207_spill] sm:$0xff] }
  0xeb   : > { %v1748_v7 = vadd.f32 %v1740_v16, %v1736_v17  ;;  %5848 = vst [vmem:[#allocation130_spill] sm:$0xff] %v4555_v24  ;;  %v4567_v55 = vmul.f32 %v5854_v28, %v1605_v31  ;;  %v4570_v60 = vmul.f32 %v5856_v11, %v1613_v50  ;;  %v4573_v27 = vmul.f32 %v5858_v41, %v1621_v20  ;;  %v5867_v4 = vld [vmem:[#allocation208_spill] sm:$0xff]  ;;  %v5868_v42 = vld [vmem:[#allocation209_spill] sm:$0xff]  ;;  %v5869_v22 = vld [vmem:[#allocation10_spill] sm:$0xff] }
  0xec   : > { %5849 = vst [vmem:[#allocation194_spill] sm:$0xff] %v4558_v1  ;;  %5851 = vst [vmem:[#allocation195_spill] sm:$0xff] %v4561_v44  ;;  %v4576_v9 = vmul.f32 %v5860_v35, %v1629_v30  ;;  %v1697_v61 = vmul.f32 %v5862_v51, %v4555_v24  ;;  %v1701_v21 = vmul.f32 %v5863_v36, %v4558_v1  ;;  %v5871_v50 = vld [vmem:[#allocation12_spill] sm:$0xff]  ;;  %v5872_v20 = vld [vmem:[#allocation13_spill] sm:$0xff] }
  0xed   : > { %5853 = vst [vmem:[#allocation196_spill] sm:$0xff] %v4564_v45  ;;  %5855 = vst [vmem:[#allocation197_spill] sm:$0xff] %v4567_v55  ;;  %v1752_v46 = vadd.f32 %v1748_v7, %v1744_v53  ;;  %v1705_v26 = vmul.f32 %v5864_v25, %v4561_v44  ;;  %v1709_v38 = vmul.f32 %v5865_v37, %v4564_v45  ;;  %v5870_v53 = vld [vmem:[#allocation11_spill] sm:$0xff]  ;;  %v5873_v8 = vld [vmem:[#allocation14_spill] sm:$0xff] }
  0xee   : > { %5857 = vst [vmem:[#allocation198_spill] sm:$0xff] %v4570_v60  ;;  %5859 = vst [vmem:[#allocation199_spill] sm:$0xff] %v4573_v27  ;;  %v1713_v19 = vmul.f32 %v5866_v29, %v4567_v55  ;;  %v1717_v12 = vmul.f32 %v5867_v4, %v4570_v60  ;;  %v1721_v54 = vmul.f32 %v5868_v42, %v4573_v27  ;;  %v5874_v28 = vld [vmem:[#allocation15_spill] sm:$0xff]  ;;  %v5875_v41 = vld [vmem:[#allocation16_spill] sm:$0xff] }
  0xef   : > { %5861 = vst [vmem:[#allocation200_spill] sm:$0xff] %v4576_v9  ;;  %v1725_v17 = vmul.f32 %v5792_v13, %v4576_v9  ;;  %v1729_v16 = vadd.f32 %v1701_v21, %v1697_v61  ;;  %v1733_v3 = vadd.f32 %v1709_v38, %v1705_v26  ;;  %v828_v31 = vadd.f32 %v5870_v53, %v5869_v22  ;;  %v5876_v35 = vld [vmem:[#allocation17_spill] sm:$0xff]  ;;  %v5877_v13 = vld [vmem:[#allocation74_spill] sm:$0xff]  ;;  %v5878_v61 = vld [vmem:[#allocation75_spill] sm:$0xff] }
  0xf0   : > { %v832_v7 = vadd.f32 %v5872_v20, %v5871_v50  ;;  %1984 = vst [vmem:[%s4480_s10 + $0x10] sm:$0xff] %v1752_v46  ;;  %v1737_v30 = vadd.f32 %v1717_v12, %v1713_v19  ;;  %v836_v11 = vadd.f32 %v5874_v28, %v5873_v8  ;;  %v840_v51 = vadd.f32 %v5876_v35, %v5875_v41  ;;  %v5879_v26 = vld [vmem:[#allocation76_spill] sm:$0xff]  ;;  %v5880_v37 = vld [vmem:[#allocation77_spill] sm:$0xff]  ;;  %v5881_v42 = vld [vmem:[#allocation78_spill] sm:$0xff] }
  0xf1   : > { %v1741_v56 = vadd.f32 %v1725_v17, %v1721_v54  ;;  %v1745_v36 = vadd.f32 %v1733_v3, %v1729_v16  ;;  %v829_v21 = vadd.f32 %v5878_v61, %v5877_v13  ;;  %v833_v38 = vadd.f32 %v5880_v37, %v5879_v26  ;;  %v5882_v46 = vld [vmem:[#allocation79_spill] sm:$0xff]  ;;  %v5883_v12 = vld [vmem:[#allocation80_spill] sm:$0xff]  ;;  %v5884_v54 = vld [vmem:[#allocation81_spill] sm:$0xff] }
  0xf2   : > { %v844_v25 = vadd.f32 %v832_v7, %v828_v31  ;;  %v848_v4 = vadd.f32 %v840_v51, %v836_v11  ;;  %v837_v19 = vadd.f32 %v5882_v46, %v5881_v42  ;;  %v841_v17 = vadd.f32 %v5884_v54, %v5883_v12  ;;  %v5885_v53 = vld [vmem:[#allocation146_spill] sm:$0xff]  ;;  %v5886_v50 = vld [vmem:[#allocation147_spill] sm:$0xff]  ;;  %v5887_v3 = vld [vmem:[#allocation148_spill] sm:$0xff] }
  0xf3   : > { %v1749_v29 = vadd.f32 %v1741_v56, %v1737_v30  ;;  %v845_v22 = vadd.f32 %v833_v38, %v829_v21  ;;  %v830_v16 = vadd.f32 %v5886_v50, %v5885_v53  ;;  %v5888_v31 = vld [vmem:[#allocation149_spill] sm:$0xff]  ;;  %v5889_v7 = vld [vmem:[#allocation150_spill] sm:$0xff]  ;;  %v5890_v8 = vld [vmem:[#allocation151_spill] sm:$0xff] }
  0xf4   : > { %v834_v20 = vadd.f32 %v5888_v31, %v5887_v3  ;;  %v838_v28 = vadd.f32 %v5890_v8, %v5889_v7  ;;  %v852_v56 = vadd.f32 %v848_v4, %v844_v25  ;;  %v849_v11 = vadd.f32 %v841_v17, %v837_v19  ;;  %v5891_v41 = vld [vmem:[#allocation152_spill] sm:$0xff]  ;;  %v5892_v35 = vld [vmem:[#allocation153_spill] sm:$0xff]  ;;  %v5893_v61 = vld [vmem:[#allocation234_spill] sm:$0xff] }
  0xf5   : > { %v1753_v30 = vadd.f32 %v1749_v29, %v1745_v36  ;;  %v842_v51 = vadd.f32 %v5892_v35, %v5891_v41  ;;  %v5894_v21 = vld [vmem:[#allocation235_spill] sm:$0xff]  ;;  %v5895_v37 = vld [vmem:[#allocation236_spill] sm:$0xff]  ;;  %v5896_v38 = vld [vmem:[#allocation237_spill] sm:$0xff] }
  0xf6   : > { %v846_v13 = vadd.f32 %v834_v20, %v830_v16  ;;  %v831_v26 = vadd.f32 %v5894_v21, %v5893_v61  ;;  %v835_v42 = vadd.f32 %v5896_v38, %v5895_v37  ;;  %v5897_v46 = vld [vmem:[#allocation238_spill] sm:$0xff]  ;;  %v5898_v12 = vld [vmem:[#allocation239_spill] sm:$0xff]  ;;  %v853_v36 = vadd.f32 %v849_v11, %v845_v22  ;;  %v5899_v29 = vld [vmem:[#allocation240_spill] sm:$0xff]  ;;  %2499 = vst [vmem:[%s3206_s30 + $0x20] sm:$0xff] %v852_v56 }
  0xf7   : > { %v839_v54 = vadd.f32 %v5898_v12, %v5897_v46  ;;  %v850_v25 = vadd.f32 %v842_v51, %v838_v28  ;;  %v5900_v4 = vld [vmem:[#allocation241_spill] sm:$0xff]  ;;  %v2687_v53 = vld [vmem:[%s2855_s26 + $0x100] sm:$0xff]  ;;  %v5902_v31 = vld [vmem:[#allocation3_spill] sm:$0xff]  ;;  %1985 = vst [vmem:[%s4480_s10 + $0x18] sm:$0xff] %v1753_v30 }
  0xf8   : > { %v843_v19 = vadd.f32 %v5900_v4, %v5899_v29  ;;  %v847_v17 = vadd.f32 %v835_v42, %v831_v26  ;;  %v5901_v50 = vld [vmem:[#allocation2_spill] sm:$0xff]  ;;  %v5903_v8 = vld [vmem:[#allocation4_spill] sm:$0xff]  ;;  %v5904_v41 = vld [vmem:[#allocation5_spill] sm:$0xff]  ;;  %2500 = vst [vmem:[%s3206_s30 + $0x28] sm:$0xff] %v853_v36 }
  0xf9   : > { %v860_v16 = vadd.f32 %v2687_v53, %v5901_v50  ;;  %v2688_v3 = vld [vmem:[%s2855_s26 + $0x120] sm:$0xff]  ;;  %v854_v7 = vadd.f32 %v850_v25, %v846_v13  ;;  %v5906_v38 = vld [vmem:[#allocation7_spill] sm:$0xff]  ;;  %v5907_v30 = vld [vmem:[#allocation8_spill] sm:$0xff] }
  0xfa   : > { %v864_v20 = vadd.f32 %v2688_v3, %v5902_v31  ;;  %v2689_v22 = vld [vmem:[%s2855_s26 + $0x140] sm:$0xff]  ;;  %v851_v51 = vadd.f32 %v843_v19, %v839_v54  ;;  %v5908_v12 = vld [vmem:[#allocation9_spill] sm:$0xff]  ;;  %v2695_v53 = vld [vmem:[%s2855_s26 + $0x108] sm:$0xff] }
  0xfb   : > { %v868_v28 = vadd.f32 %v2689_v22, %v5903_v8  ;;  %v2690_v11 = vld [vmem:[%s2855_s26 + $0x160] sm:$0xff]  ;;  %v5909_v3 = vld [vmem:[#allocation64_spill] sm:$0xff]  ;;  %2501 = vst [vmem:[%s3206_s30 + $0x30] sm:$0xff] %v854_v7  ;;  %v2697_v9 = vld [vmem:[%s2855_s26 + $0x148] sm:$0xff] }
  0xfc   : > { %v872_v35 = vadd.f32 %v2690_v11, %v5904_v41  ;;  %v2691_v61 = vld [vmem:[%s2855_s26 + $0x180] sm:$0xff]  ;;  %v892_v29 = vadd.f32 %v864_v20, %v860_v16  ;;  %v855_v4 = vadd.f32 %v851_v51, %v847_v17  ;;  %v861_v22 = vadd.f32 %v2695_v53, %v5909_v3  ;;  %v2696_v11 = vld [vmem:[%s2855_s26 + $0x128] sm:$0xff]  ;;  %v5912_v20 = vld [vmem:[#allocation68_spill] sm:$0xff] }
  0xfd   : > { %v5905_v21 = vld [vmem:[#allocation6_spill] sm:$0xff]  ;;  %v2698_v16 = vld [vmem:[%s2855_s26 + $0x168] sm:$0xff]  ;;  %v5915_v7 = vld [vmem:[#allocation72_spill] sm:$0xff] }
  0xfe   : > { %v876_v26 = vadd.f32 %v2691_v61, %v5905_v21  ;;  %v2692_v37 = vld [vmem:[%s2855_s26 + $0x1a0] sm:$0xff]  ;;  %v896_v54 = vadd.f32 %v872_v35, %v868_v28  ;;  %v5910_v61 = vld [vmem:[#allocation65_spill] sm:$0xff]  ;;  %v873_v17 = vadd.f32 %v2698_v16, %v5912_v20  ;;  %v2699_v28 = vld [vmem:[%s2855_s26 + $0x188] sm:$0xff]  ;;  %2502 = vst [vmem:[%s3206_s30 + $0x38] sm:$0xff] %v855_v4 }
  0xff   : > { %v880_v42 = vadd.f32 %v2692_v37, %v5906_v38  ;;  %v2693_v46 = vld [vmem:[%s2855_s26 + $0x1c0] sm:$0xff]  ;;  %v865_v37 = vadd.f32 %v2696_v11, %v5910_v61  ;;  %v5913_v35 = vld [vmem:[#allocation69_spill] sm:$0xff]  ;;  %v2701_v11 = vld [vmem:[%s2855_s26 + $0x1c8] sm:$0xff] }
 0x100   : > { %v884_v56 = vadd.f32 %v2693_v46, %v5907_v30  ;;  %v2694_v13 = vld [vmem:[%s2855_s26 + $0x1e0] sm:$0xff]  ;;  %v908_v46 = vadd.f32 %v896_v54, %v892_v29  ;;  %v877_v51 = vadd.f32 %v2699_v28, %v5913_v35  ;;  %v2702_v29 = vld [vmem:[%s2855_s26 + $0x1e8] sm:$0xff]  ;;  %v5916_v54 = vld [vmem:[#allocation73_spill] sm:$0xff] }
 0x101   : > { %v888_v25 = vadd.f32 %v2694_v13, %v5908_v12  ;;  %v900_v19 = vadd.f32 %v880_v42, %v876_v26  ;;  %v5911_v13 = vld [vmem:[#allocation67_spill] sm:$0xff]  ;;  %v5914_v42 = vld [vmem:[#allocation70_spill] sm:$0xff]  ;;  %v893_v60 = vadd.f32 %v865_v37, %v861_v22  ;;  %v2703_v28 = vld [vmem:[%s2855_s26 + $0x110] sm:$0xff] }
 0x102   : > { %v869_v27 = vadd.f32 %v2697_v9, %v5911_v13  ;;  %v2700_v26 = vld [vmem:[%s2855_s26 + $0x1a8] sm:$0xff]  ;;  %v889_v9 = vadd.f32 %v2702_v29, %v5916_v54  ;;  %v5917_v45 = vld [vmem:[#allocation137_spill] sm:$0xff]  ;;  %v5918_v1 = vld [vmem:[#allocation138_spill] sm:$0xff] }
 0x103   : > { %v904_v36 = vadd.f32 %v888_v25, %v884_v56  ;;  %v881_v53 = vadd.f32 %v2700_v26, %v5914_v42  ;;  %v885_v56 = vadd.f32 %v2701_v11, %v5915_v7  ;;  %v862_v44 = vadd.f32 %v2703_v28, %v5917_v45  ;;  %v2704_v26 = vld [vmem:[%s2855_s26 + $0x130] sm:$0xff]  ;;  %v5920_v22 = vld [vmem:[#allocation141_spill] sm:$0xff]  ;;  %v5921_v37 = vld [vmem:[#allocation142_spill] sm:$0xff] }
 0x104   : > { %v897_v55 = vadd.f32 %v873_v17, %v869_v27  ;;  %v866_v24 = vadd.f32 %v2704_v26, %v5918_v1  ;;  %v2705_v11 = vld [vmem:[%s2855_s26 + $0x150] sm:$0xff]  ;;  %v874_v27 = vadd.f32 %v2706_v58, %v5920_v22  ;;  %v5924_v1 = vld [vmem:[#allocation145_spill] sm:$0xff]  ;;  %v5926_v58 = vld [vmem:[#allocation223_spill] sm:$0xff] }
 0x105   : > { %v912_v25 = vadd.f32 %v904_v36, %v900_v19  ;;  %v901_v16 = vadd.f32 %v881_v53, %v877_v51  ;;  %v5919_v19 = vld [vmem:[#allocation140_spill] sm:$0xff]  ;;  %v905_v0 = vadd.f32 %v889_v9, %v885_v56  ;;  %v5922_v53 = vld [vmem:[#allocation143_spill] sm:$0xff]  ;;  %v5927_v22 = vld [vmem:[#allocation217_spill] sm:$0xff] }
 0x106   : > { %v870_v36 = vadd.f32 %v2705_v11, %v5919_v19  ;;  %v909_v29 = vadd.f32 %v897_v55, %v893_v60  ;;  %v2707_v4 = vld [vmem:[%s2855_s26 + $0x190] sm:$0xff] }
 0x107   : > { %v916_v47 = vadd.f32 %v912_v25, %v908_v46  ;;  %v878_v17 = vadd.f32 %v2707_v4, %v5921_v37  ;;  %v2708_v51 = vld [vmem:[%s2855_s26 + $0x1b0] sm:$0xff]  ;;  %v913_v11 = vadd.f32 %v905_v0, %v901_v16  ;;  %v894_v46 = vadd.f32 %v866_v24, %v862_v44  ;;  %v5929_v37 = vld [vmem:[#allocation218_spill] sm:$0xff]  ;;  %v5933_v44 = vld [vmem:[#allocation221_spill] sm:$0xff] }
 0x108   : > { %v882_v28 = vadd.f32 %v2708_v51, %v5922_v53  ;;  %v5923_v34 = vld [vmem:[#allocation144_spill] sm:$0xff]  ;;  %v898_v56 = vadd.f32 %v874_v27, %v870_v36  ;;  %v5934_v16 = vld [vmem:[#allocation230_spill] sm:$0xff]  ;;  %v5936_v36 = vld [vmem:[#allocation231_spill] sm:$0xff] }
 0x109   : > { %v886_v10 = vadd.f32 %v2709_v39, %v5923_v34  ;;  %v2710_v26 = vld [vmem:[%s2855_s26 + $0x1f0] sm:$0xff]  ;;  %2507 = vst [vmem:[%s4356_s7 + $0x20] sm:$0xff] %v916_v47  ;;  %v917_v51 = vadd.f32 %v913_v11, %v909_v29  ;;  %v5939_v47 = vld [vmem:[#allocation227_spill] sm:$0xff] }
 0x10a   : > { %v890_v33 = vadd.f32 %v2710_v26, %v5924_v1  ;;  %v902_v55 = vadd.f32 %v882_v28, %v878_v17  ;;  %v5925_v25 = vld [vmem:[#allocation216_spill] sm:$0xff]  ;;  %v910_v53 = vadd.f32 %v898_v56, %v894_v46  ;;  %v5932_v26 = vld [vmem:[#allocation229_spill] sm:$0xff]  ;;  %v5937_v17 = vld [vmem:[#allocation226_spill] sm:$0xff] }
 0x10b   : > { %v863_v9 = vadd.f32 %v5926_v58, %v5925_v25  ;;  %v5928_v19 = vld [vmem:[#allocation224_spill] sm:$0xff]  ;;  %v5940_v25 = vld [vmem:[#allocation233_spill] sm:$0xff]  ;;  %2508 = vst [vmem:[%s4356_s7 + $0x28] sm:$0xff] %v917_v51 }
 0x10c   : > { %v906_v60 = vadd.f32 %v890_v33, %v886_v10  ;;  %v867_v4 = vadd.f32 %v5928_v19, %v5927_v22  ;;  %v5930_v39 = vld [vmem:[#allocation228_spill] sm:$0xff]  ;;  %v879_v33 = vadd.f32 %v5934_v16, %v5933_v44  ;;  %v5935_v10 = vld [vmem:[#allocation222_spill] sm:$0xff]  ;;  %v891_v29 = vadd.f32 %v5940_v25, %v5939_v47 }
 0x10d   : > { %v871_v34 = vadd.f32 %v5930_v39, %v5929_v37  ;;  %v5931_v45 = vld [vmem:[#allocation220_spill] sm:$0xff]  ;;  %v883_v27 = vadd.f32 %v5936_v36, %v5935_v10  ;;  %v1766_v10 = vmul.f32 %v5903_v8, %v4408_v59 }
 0x10e   : > { %v875_v0 = vadd.f32 %v5932_v26, %v5931_v45  ;;  %v914_v24 = vadd.f32 %v906_v60, %v902_v55  ;;  %v5938_v28 = vld [vmem:[#allocation232_spill] sm:$0xff]  ;;  %v895_v11 = vadd.f32 %v867_v4, %v863_v9  ;;  %v1758_v45 = vmul.f32 %v5901_v50, %v4401_v57 }
 0x10f   : > { %v887_v22 = vadd.f32 %v5938_v28, %v5937_v17  ;;  %v903_v37 = vadd.f32 %v883_v27, %v879_v33  ;;  %v1762_v55 = vmul.f32 %v5902_v31, %v4404_v48  ;;  %v1770_v17 = vmul.f32 %v5904_v41, %v4411_v14 }
 0x110   : > { %v899_v46 = vadd.f32 %v875_v0, %v871_v34  ;;  %v918_v56 = vadd.f32 %v914_v24, %v910_v53  ;;  %v1774_v34 = vmul.f32 %v5905_v21, %v4414_v49  ;;  %v1778_v53 = vmul.f32 %v5906_v38, %v4417_v18 }
 0x111   : > { %v907_v60 = vadd.f32 %v891_v29, %v887_v22  ;;  %v1782_v50 = vmul.f32 %v5907_v30, %v4420_v6  ;;  %v1786_v31 = vmul.f32 %v5908_v12, %v4423_v15  ;;  %v1790_v4 = vadd.f32 %v1762_v55, %v1758_v45  ;;  %v5944_v55 = vld [vmem:[#allocation127_spill] sm:$0xff] }
 0x112   : > { %v911_v44 = vadd.f32 %v899_v46, %v895_v11  ;;  %v1794_v51 = vadd.f32 %v1770_v17, %v1766_v10  ;;  %2509 = vst [vmem:[%s4356_s7 + $0x30] sm:$0xff] %v918_v56  ;;  %v1798_v8 = vadd.f32 %v1778_v53, %v1774_v34  ;;  %v1759_v41 = vmul.f32 %v5909_v3, %v4451_v5  ;;  %v5941_v46 = vld [vmem:[#allocation137_spill] sm:$0xff]  ;;  %v5942_v56 = vld [vmem:[#allocation122_spill] sm:$0xff]  ;;  %v5948_v34 = vld [vmem:[#allocation128_spill] sm:$0xff] }
 0x113   : > { %v915_v9 = vadd.f32 %v907_v60, %v903_v37  ;;  %v1763_v21 = vmul.f32 %v5910_v61, %v4454_v40  ;;  %v1767_v38 = vmul.f32 %v5911_v13, %v4457_v23  ;;  %v1802_v30 = vadd.f32 %v1786_v31, %v1782_v50  ;;  %v5943_v37 = vld [vmem:[#allocation138_spill] sm:$0xff]  ;;  %v5951_v31 = vld [vmem:[#allocation143_spill] sm:$0xff] }
 0x114   : > { %v1806_v24 = vadd.f32 %v1794_v51, %v1790_v4  ;;  %v1771_v12 = vmul.f32 %v5912_v20, %v4460_v63  ;;  %v1775_v33 = vmul.f32 %v5913_v35, %v4463_v43  ;;  %v1779_v27 = vmul.f32 %v5914_v42, %v4466_v2  ;;  %v5949_v53 = vld [vmem:[#allocation142_spill] sm:$0xff]  ;;  %v5952_v51 = vld [vmem:[#allocation129_spill] sm:$0xff] }
 0x115   : > { %v919_v0 = vadd.f32 %v915_v9, %v911_v44  ;;  %v1783_v3 = vmul.f32 %v5915_v7, %v4469_v52  ;;  %v1787_v61 = vmul.f32 %v5916_v54, %v4472_v62  ;;  %v1810_v13 = vadd.f32 %v1802_v30, %v1798_v8  ;;  %v5945_v7 = vld [vmem:[#allocation140_spill] sm:$0xff]  ;;  %v5946_v44 = vld [vmem:[#allocation123_spill] sm:$0xff]  ;;  %v5947_v54 = vld [vmem:[#allocation141_spill] sm:$0xff] }
 0x116   : > { %v1791_v22 = vadd.f32 %v1763_v21, %v1759_v41  ;;  %v1795_v47 = vadd.f32 %v1771_v12, %v1767_v38  ;;  %v1799_v29 = vadd.f32 %v1779_v27, %v1775_v33  ;;  %v1760_v20 = vmul.f32 %v5941_v46, %v4506_v32  ;;  %v5950_v9 = vld [vmem:[#allocation124_spill] sm:$0xff]  ;;  %v5954_v21 = vld [vmem:[#allocation125_spill] sm:$0xff]  ;;  %v5955_v33 = vld [vmem:[#allocation130_spill] sm:$0xff] }
 0x117   : > { %v1803_v11 = vadd.f32 %v1787_v61, %v1783_v3  ;;  %v1764_v35 = vmul.f32 %v5943_v37, %v5942_v56  ;;  %2510 = vst [vmem:[%s4356_s7 + $0x38] sm:$0xff] %v919_v0  ;;  %v1814_v42 = vadd.f32 %v1810_v13, %v1806_v24  ;;  %v1768_v60 = vmul.f32 %v5945_v7, %v5944_v55  ;;  %v5953_v8 = vld [vmem:[#allocation144_spill] sm:$0xff]  ;;  %v5956_v3 = vld [vmem:[#allocation194_spill] sm:$0xff]  ;;  %v5959_v46 = vld [vmem:[#allocation197_spill] sm:$0xff] }
 0x118   : > { %v1807_v45 = vadd.f32 %v1795_v47, %v1791_v22  ;;  %v1772_v10 = vmul.f32 %v5947_v54, %v5946_v44  ;;  %v1776_v50 = vmul.f32 %v5949_v53, %v5948_v34  ;;  %v1780_v4 = vmul.f32 %v5951_v31, %v5950_v9  ;;  %v5957_v47 = vld [vmem:[#allocation195_spill] sm:$0xff]  ;;  %v5960_v37 = vld [vmem:[#allocation198_spill] sm:$0xff]  ;;  %v5965_v53 = vld [vmem:[#allocation28_spill] sm:$0xff] }
 0x119   : > { %v1811_v17 = vadd.f32 %v1803_v11, %v1799_v29  ;;  %v1784_v41 = vmul.f32 %v5953_v8, %v5952_v51  ;;  %v1788_v38 = vmul.f32 %v5924_v1, %v5954_v21  ;;  %v1792_v0 = vadd.f32 %v1764_v35, %v1760_v20  ;;  %2515 = vst [vmem:[%s4480_s10 + $0x20] sm:$0xff] %v1814_v42  ;;  %v5958_v11 = vld [vmem:[#allocation196_spill] sm:$0xff]  ;;  %v5967_v31 = vld [vmem:[#allocation30_spill] sm:$0xff]  ;;  %v2737_v55 = vld [vmem:[%s2855_s26 + $0x258] sm:$0xff] }
 0x11a   : > { %v1796_v30 = vadd.f32 %v1772_v10, %v1768_v60  ;;  %v1800_v12 = vadd.f32 %v1780_v4, %v1776_v50  ;;  %v1761_v27 = vmul.f32 %v5926_v58, %v5955_v33  ;;  %v1765_v61 = vmul.f32 %v5928_v19, %v5956_v3  ;;  %v5962_v19 = vld [vmem:[#allocation200_spill] sm:$0xff]  ;;  %v5963_v10 = vld [vmem:[#allocation26_spill] sm:$0xff]  ;;  %v5966_v50 = vld [vmem:[#allocation29_spill] sm:$0xff] }
 0x11b   : > { %v1815_v24 = vadd.f32 %v1811_v17, %v1807_v45  ;;  %v1804_v13 = vadd.f32 %v1788_v38, %v1784_v41  ;;  %v1769_v29 = vmul.f32 %v5930_v39, %v5957_v47  ;;  %v1773_v1 = vmul.f32 %v5932_v26, %v5958_v11  ;;  %v5961_v45 = vld [vmem:[#allocation199_spill] sm:$0xff]  ;;  %v5969_v38 = vld [vmem:[#allocation32_spill] sm:$0xff]  ;;  %v6011_v11 = vld [vmem:[#allocation154_spill] sm:$0xff] }
 0x11c   : > { %v1808_v22 = vadd.f32 %v1796_v30, %v1792_v0  ;;  %v1777_v20 = vmul.f32 %v5934_v16, %v5959_v46  ;;  %v1781_v35 = vmul.f32 %v5936_v36, %v5960_v37  ;;  %v1785_v58 = vmul.f32 %v5938_v28, %v5961_v45  ;;  %v5964_v17 = vld [vmem:[#allocation27_spill] sm:$0xff]  ;;  %v5970_v0 = vld [vmem:[#allocation33_spill] sm:$0xff]  ;;  %v2733_v34 = vld [vmem:[%s2855_s26 + $0x2d0] sm:$0xff] }
 0x11d   : > { %v1812_v7 = vadd.f32 %v1804_v13, %v1800_v12  ;;  %v1789_v42 = vmul.f32 %v5940_v25, %v5962_v19  ;;  %v1793_v60 = vadd.f32 %v1765_v61, %v1761_v27  ;;  %v1797_v54 = vadd.f32 %v1773_v1, %v1769_v29  ;;  %2516 = vst [vmem:[%s4480_s10 + $0x28] sm:$0xff] %v1815_v24  ;;  %v5968_v4 = vld [vmem:[#allocation31_spill] sm:$0xff]  ;;  %v5971_v12 = vld [vmem:[#allocation90_spill] sm:$0xff]  ;;  %v5973_v61 = vld [vmem:[#allocation92_spill] sm:$0xff] }
 0x11e   : > { %v1801_v39 = vadd.f32 %v1781_v35, %v1777_v20  ;;  %v1117_v26 = vadd.f32 %v5964_v17, %v5963_v10  ;;  %v1121_v16 = vadd.f32 %v5966_v50, %v5965_v53  ;;  %v1125_v36 = vadd.f32 %v5968_v4, %v5967_v31  ;;  %v5972_v24 = vld [vmem:[#allocation91_spill] sm:$0xff]  ;;  %v5974_v13 = vld [vmem:[#allocation93_spill] sm:$0xff]  ;;  %v5975_v1 = vld [vmem:[#allocation94_spill] sm:$0xff] }
 0x11f   : > { %v1816_v8 = vadd.f32 %v1812_v7, %v1808_v22  ;;  %v1805_v28 = vadd.f32 %v1789_v42, %v1785_v58  ;;  %v1809_v41 = vadd.f32 %v1797_v54, %v1793_v60  ;;  %v1129_v25 = vadd.f32 %v5970_v0, %v5969_v38  ;;  %v5976_v20 = vld [vmem:[#allocation95_spill] sm:$0xff]  ;;  %v5977_v53 = vld [vmem:[#allocation96_spill] sm:$0xff]  ;;  %v5978_v50 = vld [vmem:[#allocation97_spill] sm:$0xff] }
 0x120   : > { %v1133_v30 = vadd.f32 %v1121_v16, %v1117_v26  ;;  %v1118_v27 = vadd.f32 %v5972_v24, %v5971_v12  ;;  %v1122_v29 = vadd.f32 %v5974_v13, %v5973_v61  ;;  %v1126_v35 = vadd.f32 %v5976_v20, %v5975_v1  ;;  %v5979_v7 = vld [vmem:[#allocation162_spill] sm:$0xff]  ;;  %v5980_v42 = vld [vmem:[#allocation163_spill] sm:$0xff]  ;;  %v5981_v54 = vld [vmem:[#allocation164_spill] sm:$0xff] }
 0x121   : > { %v1813_v10 = vadd.f32 %v1805_v28, %v1801_v39  ;;  %v1137_v17 = vadd.f32 %v1129_v25, %v1125_v36  ;;  %v1130_v22 = vadd.f32 %v5978_v50, %v5977_v53  ;;  %v1119_v60 = vadd.f32 %v5980_v42, %v5979_v7  ;;  %v5982_v26 = vld [vmem:[#allocation165_spill] sm:$0xff]  ;;  %v5983_v31 = vld [vmem:[#allocation166_spill] sm:$0xff]  ;;  %v5984_v4 = vld [vmem:[#allocation167_spill] sm:$0xff]  ;;  %2517 = vst [vmem:[%s4480_s10 + $0x30] sm:$0xff] %v1816_v8 }
 0x122   : > { %v1134_v58 = vadd.f32 %v1122_v29, %v1118_v27  ;;  %v1123_v16 = vadd.f32 %v5982_v26, %v5981_v54  ;;  %v1127_v38 = vadd.f32 %v5984_v4, %v5983_v31  ;;  %v5985_v28 = vld [vmem:[#allocation168_spill] sm:$0xff]  ;;  %v5986_v25 = vld [vmem:[#allocation169_spill] sm:$0xff]  ;;  %v5987_v27 = vld [vmem:[#allocation250_spill] sm:$0xff] }
 0x123   : > { %v1817_v0 = vadd.f32 %v1813_v10, %v1809_v41  ;;  %v1141_v39 = vadd.f32 %v1137_v17, %v1133_v30  ;;  %v1138_v36 = vadd.f32 %v1130_v22, %v1126_v35  ;;  %v1131_v12 = vadd.f32 %v5986_v25, %v5985_v28  ;;  %v5988_v61 = vld [vmem:[#allocation251_spill] sm:$0xff]  ;;  %v5989_v29 = vld [vmem:[#allocation252_spill] sm:$0xff]  ;;  %v5990_v1 = vld [vmem:[#allocation253_spill] sm:$0xff] }
 0x124   : > { %v1135_v24 = vadd.f32 %v1123_v16, %v1119_v60  ;;  %v1120_v13 = vadd.f32 %v5988_v61, %v5987_v27  ;;  %v1124_v20 = vadd.f32 %v5990_v1, %v5989_v29  ;;  %v5991_v53 = vld [vmem:[#allocation254_spill] sm:$0xff]  ;;  %v5992_v50 = vld [vmem:[#allocation255_spill] sm:$0xff]  ;;  %v5993_v10 = vld [vmem:[#allocation256_spill] sm:$0xff] }
 0x125   : > { %v1128_v8 = vadd.f32 %v5992_v50, %v5991_v53  ;;  %v1142_v41 = vadd.f32 %v1138_v36, %v1134_v58  ;;  %v1139_v30 = vadd.f32 %v1131_v12, %v1127_v38  ;;  %v5994_v35 = vld [vmem:[#allocation257_spill] sm:$0xff]  ;;  %v2711_v7 = vld [vmem:[%s2855_s26 + $0x200] sm:$0xff]  ;;  %v5996_v26 = vld [vmem:[#allocation19_spill] sm:$0xff]  ;;  %2518 = vst [vmem:[%s4480_s10 + $0x38] sm:$0xff] %v1817_v0 }
 0x126   : > { %v1132_v17 = vadd.f32 %v5994_v35, %v5993_v10  ;;  %v1136_v22 = vadd.f32 %v1124_v20, %v1120_v13  ;;  %v5995_v42 = vld [vmem:[#allocation18_spill] sm:$0xff]  ;;  %2523 = vst [vmem:[%s3206_s30 + $0x40] sm:$0xff] %v1141_v39  ;;  %v5997_v4 = vld [vmem:[#allocation20_spill] sm:$0xff]  ;;  %v5998_v28 = vld [vmem:[#allocation21_spill] sm:$0xff] }
 0x127   : > { %v1149_v60 = vadd.f32 %v2711_v7, %v5995_v42  ;;  %v2712_v54 = vld [vmem:[%s2855_s26 + $0x220] sm:$0xff]  ;;  %v1143_v31 = vadd.f32 %v1139_v30, %v1135_v24  ;;  %v6000_v1 = vld [vmem:[#allocation23_spill] sm:$0xff]  ;;  %v6001_v0 = vld [vmem:[#allocation24_spill] sm:$0xff]  ;;  %2524 = vst [vmem:[%s3206_s30 + $0x48] sm:$0xff] %v1142_v41 }
 0x128   : > { %v1153_v16 = vadd.f32 %v2712_v54, %v5996_v26  ;;  %v2713_v58 = vld [vmem:[%s2855_s26 + $0x240] sm:$0xff]  ;;  %v1140_v12 = vadd.f32 %v1132_v17, %v1128_v8  ;;  %v6002_v50 = vld [vmem:[#allocation25_spill] sm:$0xff]  ;;  %v2719_v7 = vld [vmem:[%s2855_s26 + $0x208] sm:$0xff] }
 0x129   : > { %v1157_v38 = vadd.f32 %v2713_v58, %v5997_v4  ;;  %v2714_v36 = vld [vmem:[%s2855_s26 + $0x260] sm:$0xff]  ;;  %2525 = vst [vmem:[%s3206_s30 + $0x50] sm:$0xff] %v1143_v31  ;;  %v2721_v19 = vld [vmem:[%s2855_s26 + $0x248] sm:$0xff]  ;;  %v6009_v31 = vld [vmem:[#allocation88_spill] sm:$0xff] }
 0x12a   : > { %v1161_v25 = vadd.f32 %v2714_v36, %v5998_v28  ;;  %v2715_v27 = vld [vmem:[%s2855_s26 + $0x280] sm:$0xff]  ;;  %v1181_v10 = vadd.f32 %v1153_v16, %v1149_v60  ;;  %v1144_v35 = vadd.f32 %v1140_v12, %v1136_v22  ;;  %v2720_v36 = vld [vmem:[%s2855_s26 + $0x228] sm:$0xff]  ;;  %v6006_v16 = vld [vmem:[#allocation85_spill] sm:$0xff] }
 0x12b   : > { %v5999_v61 = vld [vmem:[#allocation22_spill] sm:$0xff]  ;;  %v2722_v60 = vld [vmem:[%s2855_s26 + $0x268] sm:$0xff] }
 0x12c   : > { %v1165_v13 = vadd.f32 %v2715_v27, %v5999_v61  ;;  %v2716_v29 = vld [vmem:[%s2855_s26 + $0x2a0] sm:$0xff]  ;;  %v1185_v8 = vadd.f32 %v1161_v25, %v1157_v38  ;;  %v6004_v27 = vld [vmem:[#allocation83_spill] sm:$0xff]  ;;  %v1162_v22 = vadd.f32 %v2722_v60, %v6006_v16  ;;  %2526 = vst [vmem:[%s3206_s30 + $0x58] sm:$0xff] %v1144_v35  ;;  %v2731_v35 = vld [vmem:[%s2855_s26 + $0x290] sm:$0xff] }
 0x12d   : > { %v1169_v20 = vadd.f32 %v2716_v29, %v6000_v1  ;;  %v2717_v53 = vld [vmem:[%s2855_s26 + $0x2c0] sm:$0xff]  ;;  %v1154_v29 = vadd.f32 %v2720_v36, %v6004_v27  ;;  %v2723_v38 = vld [vmem:[%s2855_s26 + $0x288] sm:$0xff] }
 0x12e   : > { %v1173_v39 = vadd.f32 %v2717_v53, %v6001_v0  ;;  %v2718_v24 = vld [vmem:[%s2855_s26 + $0x2e0] sm:$0xff]  ;;  %v1197_v53 = vadd.f32 %v1185_v8, %v1181_v10  ;;  %v2725_v36 = vld [vmem:[%s2855_s26 + $0x2c8] sm:$0xff]  ;;  %v6010_v8 = vld [vmem:[#allocation89_spill] sm:$0xff] }
 0x12f   : > { %v1177_v30 = vadd.f32 %v2718_v24, %v6002_v50  ;;  %v1189_v17 = vadd.f32 %v1169_v20, %v1165_v13  ;;  %v6003_v54 = vld [vmem:[#allocation82_spill] sm:$0xff]  ;;  %v6005_v24 = vld [vmem:[#allocation84_spill] sm:$0xff]  ;;  %v2724_v13 = vld [vmem:[%s2855_s26 + $0x2a8] sm:$0xff] }
 0x130   : > { %v1150_v58 = vadd.f32 %v2719_v7, %v6003_v54  ;;  %v1158_v45 = vadd.f32 %v2721_v19, %v6005_v24  ;;  %v6007_v25 = vld [vmem:[#allocation86_spill] sm:$0xff]  ;;  %v6008_v20 = vld [vmem:[#allocation87_spill] sm:$0xff] }
 0x131   : > { %v1193_v41 = vadd.f32 %v1177_v30, %v1173_v39  ;;  %v1166_v12 = vadd.f32 %v2723_v38, %v6007_v25  ;;  %v1170_v7 = vadd.f32 %v2724_v13, %v6008_v20  ;;  %v1174_v39 = vadd.f32 %v2725_v36, %v6009_v31  ;;  %v2726_v10 = vld [vmem:[%s2855_s26 + $0x2e8] sm:$0xff]  ;;  %v2727_v38 = vld [vmem:[%s2855_s26 + $0x210] sm:$0xff] }
 0x132   : > { %v1178_v19 = vadd.f32 %v2726_v10, %v6010_v8  ;;  %v1182_v37 = vadd.f32 %v1154_v29, %v1150_v58  ;;  %v1186_v46 = vadd.f32 %v1162_v22, %v1158_v45  ;;  %v1151_v47 = vadd.f32 %v2727_v38, %v6011_v11  ;;  %v2728_v13 = vld [vmem:[%s2855_s26 + $0x230] sm:$0xff]  ;;  %v6012_v3 = vld [vmem:[#allocation155_spill] sm:$0xff]  ;;  %v6014_v45 = vld [vmem:[#allocation157_spill] sm:$0xff] }
 0x133   : > { %v1201_v30 = vadd.f32 %v1193_v41, %v1189_v17  ;;  %v1190_v60 = vadd.f32 %v1170_v7, %v1166_v12  ;;  %v1155_v33 = vadd.f32 %v2728_v13, %v6012_v3  ;;  %v2729_v36 = vld [vmem:[%s2855_s26 + $0x250] sm:$0xff]  ;;  %v6015_v22 = vld [vmem:[#allocation158_spill] sm:$0xff]  ;;  %v6016_v38 = vld [vmem:[#allocation159_spill] sm:$0xff] }
 0x134   : > { %v6013_v17 = vld [vmem:[#allocation156_spill] sm:$0xff]  ;;  %v1194_v51 = vadd.f32 %v1178_v19, %v1174_v39  ;;  %v1198_v10 = vadd.f32 %v1186_v46, %v1182_v37  ;;  %v1167_v12 = vadd.f32 %v2731_v35, %v6015_v22  ;;  %v2735_v35 = vld [vmem:[%s2855_s26 + $0x218] sm:$0xff]  ;;  %v6019_v22 = vld [vmem:[#allocation242_spill] sm:$0xff] }
 0x135   : > { %v1159_v41 = vadd.f32 %v2729_v36, %v6013_v17  ;;  %v1205_v21 = vadd.f32 %v1201_v30, %v1197_v53  ;;  %v2730_v58 = vld [vmem:[%s2855_s26 + $0x270] sm:$0xff]  ;;  %v6018_v53 = vld [vmem:[#allocation161_spill] sm:$0xff]  ;;  %v1183_v39 = vadd.f32 %v1155_v33, %v1151_v47 }
 0x136   : > { %v1163_v29 = vadd.f32 %v2730_v58, %v6014_v45  ;;  %v2732_v7 = vld [vmem:[%s2855_s26 + $0x2b0] sm:$0xff]  ;;  %v1202_v37 = vadd.f32 %v1194_v51, %v1190_v60  ;;  %v1152_v45 = vadd.f32 %v2735_v35, %v6019_v22  ;;  %v2738_v33 = vld [vmem:[%s2855_s26 + $0x278] sm:$0xff] }
 0x137   : > { %v1171_v9 = vadd.f32 %v2732_v7, %v6016_v38  ;;  %v6017_v13 = vld [vmem:[#allocation160_spill] sm:$0xff]  ;;  %v2736_v7 = vld [vmem:[%s2855_s26 + $0x238] sm:$0xff]  ;;  %v6020_v38 = vld [vmem:[#allocation243_spill] sm:$0xff]  ;;  %2531 = vst [vmem:[%s4356_s7 + $0x40] sm:$0xff] %v1205_v21 }
 0x138   : > { %v1175_v44 = vadd.f32 %v2733_v34, %v6017_v13  ;;  %v2734_v36 = vld [vmem:[%s2855_s26 + $0x2f0] sm:$0xff]  ;;  %v1187_v30 = vadd.f32 %v1163_v29, %v1159_v41  ;;  %v1156_v17 = vadd.f32 %v2736_v7, %v6020_v38  ;;  %v1206_v34 = vadd.f32 %v1202_v37, %v1198_v10  ;;  %v6022_v47 = vld [vmem:[#allocation245_spill] sm:$0xff]  ;;  %v6023_v41 = vld [vmem:[#allocation246_spill] sm:$0xff] }
 0x139   : > { %v1179_v46 = vadd.f32 %v2734_v36, %v6018_v53  ;;  %v1191_v19 = vadd.f32 %v1171_v9, %v1167_v12  ;;  %v6021_v36 = vld [vmem:[#allocation244_spill] sm:$0xff]  ;;  %v1164_v60 = vadd.f32 %v2738_v33, %v6022_v47  ;;  %v2740_v12 = vld [vmem:[%s2855_s26 + $0x2b8] sm:$0xff] }
 0x13a   : > { %v1199_v13 = vadd.f32 %v1187_v30, %v1183_v39  ;;  %v1160_v51 = vadd.f32 %v2737_v55, %v6021_v36  ;;  %v2741_v22 = vld [vmem:[%s2855_s26 + $0x2d8] sm:$0xff]  ;;  %v6025_v53 = vld [vmem:[#allocation248_spill] sm:$0xff]  ;;  %v1184_v39 = vadd.f32 %v1156_v17, %v1152_v45  ;;  %2532 = vst [vmem:[%s4356_s7 + $0x48] sm:$0xff] %v1206_v34  ;;  %v1838_v17 = vmul.f32 %v5999_v61, %v4414_v49 }
 0x13b   : > { %v1195_v58 = vadd.f32 %v1179_v46, %v1175_v44  ;;  %v2739_v44 = vld [vmem:[%s2855_s26 + $0x298] sm:$0xff]  ;;  %v6024_v46 = vld [vmem:[#allocation247_spill] sm:$0xff]  ;;  %v1176_v7 = vadd.f32 %v2741_v22, %v6025_v53  ;;  %v1830_v22 = vmul.f32 %v5997_v4, %v4408_v59  ;;  %v1842_v45 = vmul.f32 %v6000_v1, %v4417_v18 }
 0x13c   : > { %v1168_v29 = vadd.f32 %v2739_v44, %v6023_v41  ;;  %v1172_v35 = vadd.f32 %v2740_v12, %v6024_v46  ;;  %v2742_v21 = vld [vmem:[%s2855_s26 + $0x2f8] sm:$0xff]  ;;  %v1188_v30 = vadd.f32 %v1164_v60, %v1160_v51  ;;  %v1834_v12 = vmul.f32 %v5998_v28, %v4411_v14 }
 0x13d   : > { %v1203_v9 = vadd.f32 %v1195_v58, %v1191_v19  ;;  %v6026_v10 = vld [vmem:[#allocation249_spill] sm:$0xff]  ;;  %v1822_v19 = vmul.f32 %v5995_v42, %v4401_v57  ;;  %v1826_v58 = vmul.f32 %v5996_v26, %v4404_v48  ;;  %v1846_v42 = vmul.f32 %v6001_v0, %v4420_v6 }
 0x13e   : > { %v1180_v37 = vadd.f32 %v2742_v21, %v6026_v10  ;;  %v1192_v36 = vadd.f32 %v1172_v35, %v1168_v29  ;;  %v1200_v44 = vadd.f32 %v1188_v30, %v1184_v39  ;;  %v1850_v26 = vmul.f32 %v6002_v50, %v4423_v15  ;;  %v6027_v30 = vld [vmem:[#allocation127_spill] sm:$0xff] }
 0x13f   : > { %v1207_v55 = vadd.f32 %v1203_v9, %v1199_v13  ;;  %v1854_v34 = vadd.f32 %v1826_v58, %v1822_v19  ;;  %v1858_v51 = vadd.f32 %v1834_v12, %v1830_v22  ;;  %v1862_v4 = vadd.f32 %v1842_v45, %v1838_v17  ;;  %v6029_v19 = vld [vmem:[#allocation123_spill] sm:$0xff]  ;;  %v6032_v22 = vld [vmem:[#allocation158_spill] sm:$0xff]  ;;  %v6033_v17 = vld [vmem:[#allocation124_spill] sm:$0xff] }
 0x140   : > { %v1196_v33 = vadd.f32 %v1180_v37, %v1176_v7  ;;  %v1823_v28 = vmul.f32 %v6003_v54, %v4451_v5  ;;  %v1827_v61 = vmul.f32 %v6004_v27, %v4454_v40  ;;  %v1831_v1 = vmul.f32 %v6005_v24, %v4457_v23  ;;  %v6034_v45 = vld [vmem:[#allocation159_spill] sm:$0xff] }
 0x141   : > { %2533 = vst [vmem:[%s4356_s7 + $0x50] sm:$0xff] %v1207_v55  ;;  %v1866_v0 = vadd.f32 %v1850_v26, %v1846_v42  ;;  %v1835_v50 = vmul.f32 %v6006_v16, %v4460_v63  ;;  %v1839_v9 = vmul.f32 %v6007_v25, %v4463_v43  ;;  %v1843_v29 = vmul.f32 %v6008_v20, %v4466_v2  ;;  %v6035_v42 = vld [vmem:[#allocation129_spill] sm:$0xff] }
 0x142   : > { %v1204_v13 = vadd.f32 %v1196_v33, %v1192_v36  ;;  %v1870_v36 = vadd.f32 %v1858_v51, %v1854_v34  ;;  %v1847_v54 = vmul.f32 %v6009_v31, %v4469_v52  ;;  %v1851_v27 = vmul.f32 %v6010_v8, %v4472_v62  ;;  %v6028_v31 = vld [vmem:[#allocation156_spill] sm:$0xff]  ;;  %v6030_v8 = vld [vmem:[#allocation157_spill] sm:$0xff] }
 0x143   : > { %v1874_v24 = vadd.f32 %v1866_v0, %v1862_v4  ;;  %v1855_v35 = vadd.f32 %v1827_v61, %v1823_v28  ;;  %v1859_v7 = vadd.f32 %v1835_v50, %v1831_v1  ;;  %v1863_v21 = vadd.f32 %v1843_v29, %v1839_v9  ;;  %v6037_v26 = vld [vmem:[#allocation125_spill] sm:$0xff]  ;;  %v6040_v0 = vld [vmem:[#allocation242_spill] sm:$0xff] }
 0x144   : > { %v1208_v60 = vadd.f32 %v1204_v13, %v1200_v44  ;;  %v1867_v37 = vadd.f32 %v1851_v27, %v1847_v54  ;;  %v1824_v16 = vmul.f32 %v6011_v11, %v4506_v32  ;;  %v1828_v25 = vmul.f32 %v6012_v3, %v5942_v56  ;;  %v6031_v44 = vld [vmem:[#allocation128_spill] sm:$0xff]  ;;  %v6038_v34 = vld [vmem:[#allocation161_spill] sm:$0xff]  ;;  %v6041_v50 = vld [vmem:[#allocation194_spill] sm:$0xff] }
 0x145   : > { %v1878_v20 = vadd.f32 %v1874_v24, %v1870_v36  ;;  %v1871_v39 = vadd.f32 %v1859_v7, %v1855_v35  ;;  %v1832_v55 = vmul.f32 %v6028_v31, %v6027_v30  ;;  %v1836_v58 = vmul.f32 %v6030_v8, %v6029_v19  ;;  %v6036_v13 = vld [vmem:[#allocation160_spill] sm:$0xff]  ;;  %v6042_v27 = vld [vmem:[#allocation195_spill] sm:$0xff]  ;;  %v2769_v30 = vld [vmem:[%s2855_s26 + $0x358] sm:$0xff] }
 0x146   : > { %2534 = vst [vmem:[%s4356_s7 + $0x58] sm:$0xff] %v1208_v60  ;;  %v1875_v33 = vadd.f32 %v1867_v37, %v1863_v21  ;;  %v1840_v12 = vmul.f32 %v6032_v22, %v6031_v44  ;;  %v1844_v11 = vmul.f32 %v6034_v45, %v6033_v17  ;;  %v1848_v3 = vmul.f32 %v6036_v13, %v6035_v42  ;;  %v6039_v60 = vld [vmem:[#allocation130_spill] sm:$0xff]  ;;  %v6043_v24 = vld [vmem:[#allocation244_spill] sm:$0xff]  ;;  %v6045_v37 = vld [vmem:[#allocation197_spill] sm:$0xff] }
 0x147   : > { %v1852_v51 = vmul.f32 %v6038_v34, %v6037_v26  ;;  %v1856_v4 = vadd.f32 %v1828_v25, %v1824_v16  ;;  %v1860_v28 = vadd.f32 %v1836_v58, %v1832_v55  ;;  %v1825_v36 = vmul.f32 %v6040_v0, %v6039_v60  ;;  %2539 = vst [vmem:[%s4480_s10 + $0x40] sm:$0xff] %v1878_v20  ;;  %v6044_v7 = vld [vmem:[#allocation196_spill] sm:$0xff]  ;;  %v6046_v25 = vld [vmem:[#allocation198_spill] sm:$0xff]  ;;  %v6047_v31 = vld [vmem:[#allocation199_spill] sm:$0xff] }
 0x148   : > { %v1879_v61 = vadd.f32 %v1875_v33, %v1871_v39  ;;  %v1864_v1 = vadd.f32 %v1844_v11, %v1840_v12  ;;  %v1829_v9 = vmul.f32 %v6020_v38, %v6041_v50  ;;  %v1833_v35 = vmul.f32 %v6043_v24, %v6042_v27  ;;  %v6048_v38 = vld [vmem:[#allocation200_spill] sm:$0xff]  ;;  %v6049_v12 = vld [vmem:[#allocation42_spill] sm:$0xff]  ;;  %v6050_v45 = vld [vmem:[#allocation43_spill] sm:$0xff] }
 0x149   : > { %v1868_v29 = vadd.f32 %v1852_v51, %v1848_v3  ;;  %v1872_v54 = vadd.f32 %v1860_v28, %v1856_v4  ;;  %v1837_v21 = vmul.f32 %v6022_v47, %v6044_v7  ;;  %v1841_v16 = vmul.f32 %v6023_v41, %v6045_v37  ;;  %v6051_v11 = vld [vmem:[#allocation44_spill] sm:$0xff]  ;;  %v6052_v13 = vld [vmem:[#allocation45_spill] sm:$0xff]  ;;  %v6053_v3 = vld [vmem:[#allocation46_spill] sm:$0xff] }
 0x14a   : > { %v1845_v39 = vmul.f32 %v6024_v46, %v6046_v25  ;;  %v1849_v55 = vmul.f32 %v6025_v53, %v6047_v31  ;;  %v1853_v20 = vmul.f32 %v6026_v10, %v6048_v38  ;;  %v1857_v58 = vadd.f32 %v1829_v9, %v1825_v36  ;;  %2540 = vst [vmem:[%s4480_s10 + $0x48] sm:$0xff] %v1879_v61  ;;  %v6054_v34 = vld [vmem:[#allocation47_spill] sm:$0xff]  ;;  %v6055_v28 = vld [vmem:[#allocation48_spill] sm:$0xff]  ;;  %v6057_v36 = vld [vmem:[#allocation106_spill] sm:$0xff] }
 0x14b   : > { %v1876_v8 = vadd.f32 %v1868_v29, %v1864_v1  ;;  %v1861_v33 = vadd.f32 %v1837_v21, %v1833_v35  ;;  %v1406_v47 = vadd.f32 %v6050_v45, %v6049_v12  ;;  %v1410_v41 = vadd.f32 %v6052_v13, %v6051_v11  ;;  %v6056_v1 = vld [vmem:[#allocation49_spill] sm:$0xff]  ;;  %v6058_v61 = vld [vmem:[#allocation107_spill] sm:$0xff]  ;;  %v6059_v29 = vld [vmem:[#allocation108_spill] sm:$0xff] }
 0x14c   : > { %v1865_v22 = vadd.f32 %v1845_v39, %v1841_v16  ;;  %v1414_v46 = vadd.f32 %v6054_v34, %v6053_v3  ;;  %v1869_v53 = vadd.f32 %v1853_v20, %v1849_v55  ;;  %v1418_v10 = vadd.f32 %v6056_v1, %v6055_v28  ;;  %v6060_v24 = vld [vmem:[#allocation109_spill] sm:$0xff]  ;;  %v6061_v21 = vld [vmem:[#allocation110_spill] sm:$0xff]  ;;  %v6062_v16 = vld [vmem:[#allocation111_spill] sm:$0xff] }
 0x14d   : > { %v1880_v51 = vadd.f32 %v1876_v8, %v1872_v54  ;;  %v1873_v4 = vadd.f32 %v1861_v33, %v1857_v58  ;;  %v1422_v0 = vadd.f32 %v1410_v41, %v1406_v47  ;;  %v1407_v9 = vadd.f32 %v6058_v61, %v6057_v36  ;;  %v6063_v11 = vld [vmem:[#allocation112_spill] sm:$0xff]  ;;  %v6064_v13 = vld [vmem:[#allocation113_spill] sm:$0xff]  ;;  %v6065_v8 = vld [vmem:[#allocation178_spill] sm:$0xff] }
 0x14e   : > { %v1411_v35 = vadd.f32 %v6060_v24, %v6059_v29  ;;  %v1415_v39 = vadd.f32 %v6062_v16, %v6061_v21  ;;  %v1877_v12 = vadd.f32 %v1869_v53, %v1865_v22  ;;  %v1426_v45 = vadd.f32 %v1418_v10, %v1414_v46  ;;  %v6066_v20 = vld [vmem:[#allocation179_spill] sm:$0xff]  ;;  %v6067_v33 = vld [vmem:[#allocation180_spill] sm:$0xff]  ;;  %v6068_v47 = vld [vmem:[#allocation181_spill] sm:$0xff] }
 0x14f   : > { %v1419_v54 = vadd.f32 %v6064_v13, %v6063_v11  ;;  %v1408_v58 = vadd.f32 %v6066_v20, %v6065_v8  ;;  %v1412_v41 = vadd.f32 %v6068_v47, %v6067_v33  ;;  %v6069_v3 = vld [vmem:[#allocation182_spill] sm:$0xff]  ;;  %v6070_v34 = vld [vmem:[#allocation183_spill] sm:$0xff]  ;;  %2541 = vst [vmem:[%s4480_s10 + $0x50] sm:$0xff] %v1880_v51  ;;  %v6071_v53 = vld [vmem:[#allocation184_spill] sm:$0xff] }
 0x150   : > { %v1423_v55 = vadd.f32 %v1411_v35, %v1407_v9  ;;  %v1416_v28 = vadd.f32 %v6070_v34, %v6069_v3  ;;  %v1881_v1 = vadd.f32 %v1877_v12, %v1873_v4  ;;  %v1430_v22 = vadd.f32 %v1426_v45, %v1422_v0  ;;  %v6072_v10 = vld [vmem:[#allocation185_spill] sm:$0xff]  ;;  %v6073_v9 = vld [vmem:[#allocation266_spill] sm:$0xff]  ;;  %v6074_v29 = vld [vmem:[#allocation267_spill] sm:$0xff] }
 0x151   : > { %v1427_v46 = vadd.f32 %v1419_v54, %v1415_v39  ;;  %v1420_v36 = vadd.f32 %v6072_v10, %v6071_v53  ;;  %v1424_v61 = vadd.f32 %v1412_v41, %v1408_v58  ;;  %v1409_v24 = vadd.f32 %v6074_v29, %v6073_v9  ;;  %v6075_v35 = vld [vmem:[#allocation268_spill] sm:$0xff]  ;;  %v6076_v21 = vld [vmem:[#allocation269_spill] sm:$0xff]  ;;  %v6077_v11 = vld [vmem:[#allocation270_spill] sm:$0xff] }
 0x152   : > { %v1413_v16 = vadd.f32 %v6076_v21, %v6075_v35  ;;  %v6078_v13 = vld [vmem:[#allocation271_spill] sm:$0xff]  ;;  %v6079_v12 = vld [vmem:[#allocation272_spill] sm:$0xff]  ;;  %v6080_v39 = vld [vmem:[#allocation273_spill] sm:$0xff]  ;;  %2542 = vst [vmem:[%s4480_s10 + $0x58] sm:$0xff] %v1881_v1 }
 0x153   : > { %v1417_v51 = vadd.f32 %v6078_v13, %v6077_v11  ;;  %v1431_v4 = vadd.f32 %v1427_v46, %v1423_v55  ;;  %v1428_v0 = vadd.f32 %v1420_v36, %v1416_v28  ;;  %v1421_v45 = vadd.f32 %v6080_v39, %v6079_v12  ;;  %v2743_v8 = vld [vmem:[%s2855_s26 + $0x300] sm:$0xff]  ;;  %v6082_v47 = vld [vmem:[#allocation35_spill] sm:$0xff]  ;;  %2547 = vst [vmem:[%s3206_s30 + $0x60] sm:$0xff] %v1430_v22  ;;  %v6083_v34 = vld [vmem:[#allocation36_spill] sm:$0xff] }
 0x154   : > { %v1425_v54 = vadd.f32 %v1413_v16, %v1409_v24  ;;  %v6081_v20 = vld [vmem:[#allocation34_spill] sm:$0xff]  ;;  %v6084_v53 = vld [vmem:[#allocation37_spill] sm:$0xff]  ;;  %v6086_v21 = vld [vmem:[#allocation39_spill] sm:$0xff] }
 0x155   : > { %v1438_v58 = vadd.f32 %v2743_v8, %v6081_v20  ;;  %v2744_v33 = vld [vmem:[%s2855_s26 + $0x320] sm:$0xff]  ;;  %v1432_v3 = vadd.f32 %v1428_v0, %v1424_v61  ;;  %v1429_v36 = vadd.f32 %v1421_v45, %v1417_v51  ;;  %v6087_v1 = vld [vmem:[#allocation40_spill] sm:$0xff]  ;;  %2548 = vst [vmem:[%s3206_s30 + $0x68] sm:$0xff] %v1431_v4  ;;  %v6088_v13 = vld [vmem:[#allocation41_spill] sm:$0xff] }
 0x156   : > { %v1442_v41 = vadd.f32 %v2744_v33, %v6082_v47  ;;  %v2745_v55 = vld [vmem:[%s2855_s26 + $0x340] sm:$0xff]  ;;  %v2751_v8 = vld [vmem:[%s2855_s26 + $0x308] sm:$0xff]  ;;  %v2765_v44 = vld [vmem:[%s2855_s26 + $0x3d0] sm:$0xff] }
 0x157   : > { %v1446_v28 = vadd.f32 %v2745_v55, %v6083_v34  ;;  %v2746_v46 = vld [vmem:[%s2855_s26 + $0x360] sm:$0xff]  ;;  %v1433_v39 = vadd.f32 %v1429_v36, %v1425_v54  ;;  %2549 = vst [vmem:[%s3206_s30 + $0x70] sm:$0xff] %v1432_v3  ;;  %v2753_v38 = vld [vmem:[%s2855_s26 + $0x348] sm:$0xff]  ;;  %v6095_v3 = vld [vmem:[#allocation104_spill] sm:$0xff] }
 0x158   : > { %v1450_v10 = vadd.f32 %v2746_v46, %v6084_v53  ;;  %v2747_v9 = vld [vmem:[%s2855_s26 + $0x380] sm:$0xff]  ;;  %v1470_v12 = vadd.f32 %v1442_v41, %v1438_v58  ;;  %v2752_v46 = vld [vmem:[%s2855_s26 + $0x328] sm:$0xff]  ;;  %v6092_v41 = vld [vmem:[#allocation101_spill] sm:$0xff] }
 0x159   : > { %v6085_v29 = vld [vmem:[#allocation38_spill] sm:$0xff]  ;;  %v2754_v58 = vld [vmem:[%s2855_s26 + $0x368] sm:$0xff]  ;;  %2550 = vst [vmem:[%s3206_s30 + $0x78] sm:$0xff] %v1433_v39  ;;  %v2763_v39 = vld [vmem:[%s2855_s26 + $0x390] sm:$0xff] }
 0x15a   : > { %v1454_v24 = vadd.f32 %v2747_v9, %v6085_v29  ;;  %v2748_v35 = vld [vmem:[%s2855_s26 + $0x3a0] sm:$0xff]  ;;  %v1474_v51 = vadd.f32 %v1450_v10, %v1446_v28  ;;  %v6090_v9 = vld [vmem:[#allocation99_spill] sm:$0xff]  ;;  %v1451_v54 = vadd.f32 %v2754_v58, %v6092_v41 }
 0x15b   : > { %v1458_v16 = vadd.f32 %v2748_v35, %v6086_v21  ;;  %v2749_v11 = vld [vmem:[%s2855_s26 + $0x3c0] sm:$0xff]  ;;  %v1443_v35 = vadd.f32 %v2752_v46, %v6090_v9  ;;  %v2755_v28 = vld [vmem:[%s2855_s26 + $0x388] sm:$0xff] }
 0x15c   : > { %v1462_v22 = vadd.f32 %v2749_v11, %v6087_v1  ;;  %v2750_v61 = vld [vmem:[%s2855_s26 + $0x3e0] sm:$0xff]  ;;  %v1486_v11 = vadd.f32 %v1474_v51, %v1470_v12  ;;  %v2757_v46 = vld [vmem:[%s2855_s26 + $0x3c8] sm:$0xff]  ;;  %v6096_v51 = vld [vmem:[#allocation105_spill] sm:$0xff] }
 0x15d   : > { %v1466_v0 = vadd.f32 %v2750_v61, %v6088_v13  ;;  %v1478_v45 = vadd.f32 %v1458_v16, %v1454_v24  ;;  %v6089_v33 = vld [vmem:[#allocation98_spill] sm:$0xff]  ;;  %v6091_v61 = vld [vmem:[#allocation100_spill] sm:$0xff]  ;;  %v2756_v24 = vld [vmem:[%s2855_s26 + $0x3a8] sm:$0xff] }
 0x15e   : > { %v1439_v55 = vadd.f32 %v2751_v8, %v6089_v33  ;;  %v1447_v31 = vadd.f32 %v2753_v38, %v6091_v61  ;;  %v6093_v10 = vld [vmem:[#allocation102_spill] sm:$0xff]  ;;  %v6094_v16 = vld [vmem:[#allocation103_spill] sm:$0xff] }
 0x15f   : > { %v1482_v4 = vadd.f32 %v1466_v0, %v1462_v22  ;;  %v1455_v36 = vadd.f32 %v2755_v28, %v6093_v10  ;;  %v1459_v8 = vadd.f32 %v2756_v24, %v6094_v16  ;;  %v1463_v22 = vadd.f32 %v2757_v46, %v6095_v3  ;;  %v2758_v12 = vld [vmem:[%s2855_s26 + $0x3e8] sm:$0xff]  ;;  %v2759_v28 = vld [vmem:[%s2855_s26 + $0x310] sm:$0xff]  ;;  %v6097_v7 = vld [vmem:[#allocation170_spill] sm:$0xff] }
 0x160   : > { %v1467_v38 = vadd.f32 %v2758_v12, %v6096_v51  ;;  %v1471_v25 = vadd.f32 %v1443_v35, %v1439_v55  ;;  %v1475_v37 = vadd.f32 %v1451_v54, %v1447_v31  ;;  %v1440_v27 = vadd.f32 %v2759_v28, %v6097_v7  ;;  %v2760_v24 = vld [vmem:[%s2855_s26 + $0x330] sm:$0xff]  ;;  %v6098_v50 = vld [vmem:[#allocation171_spill] sm:$0xff]  ;;  %v6100_v31 = vld [vmem:[#allocation173_spill] sm:$0xff] }
 0x161   : > { %v1490_v0 = vadd.f32 %v1482_v4, %v1478_v45  ;;  %v1479_v58 = vadd.f32 %v1459_v8, %v1455_v36  ;;  %v1444_v60 = vadd.f32 %v2760_v24, %v6098_v50  ;;  %v2761_v46 = vld [vmem:[%s2855_s26 + $0x350] sm:$0xff]  ;;  %v6101_v54 = vld [vmem:[#allocation174_spill] sm:$0xff]  ;;  %v6102_v28 = vld [vmem:[#allocation175_spill] sm:$0xff] }
 0x162   : > { %v6099_v45 = vld [vmem:[#allocation172_spill] sm:$0xff]  ;;  %v1483_v42 = vadd.f32 %v1467_v38, %v1463_v22  ;;  %v1487_v12 = vadd.f32 %v1475_v37, %v1471_v25  ;;  %v1456_v36 = vadd.f32 %v2763_v39, %v6101_v54  ;;  %v2767_v39 = vld [vmem:[%s2855_s26 + $0x318] sm:$0xff]  ;;  %v6105_v54 = vld [vmem:[#allocation258_spill] sm:$0xff] }
 0x163   : > { %v1448_v4 = vadd.f32 %v2761_v46, %v6099_v45  ;;  %v1494_v26 = vadd.f32 %v1490_v0, %v1486_v11  ;;  %v2762_v55 = vld [vmem:[%s2855_s26 + $0x370] sm:$0xff]  ;;  %v6104_v11 = vld [vmem:[#allocation177_spill] sm:$0xff]  ;;  %v1472_v22 = vadd.f32 %v1444_v60, %v1440_v27 }
 0x164   : > { %v1452_v35 = vadd.f32 %v2762_v55, %v6100_v31  ;;  %v2764_v8 = vld [vmem:[%s2855_s26 + $0x3b0] sm:$0xff]  ;;  %v1491_v25 = vadd.f32 %v1483_v42, %v1479_v58  ;;  %v1441_v31 = vadd.f32 %v2767_v39, %v6105_v54  ;;  %v2770_v60 = vld [vmem:[%s2855_s26 + $0x378] sm:$0xff] }
 0x165   : > { %v1460_v17 = vadd.f32 %v2764_v8, %v6102_v28  ;;  %v6103_v24 = vld [vmem:[#allocation176_spill] sm:$0xff]  ;;  %v2768_v8 = vld [vmem:[%s2855_s26 + $0x338] sm:$0xff]  ;;  %v6106_v28 = vld [vmem:[#allocation259_spill] sm:$0xff]  ;;  %2555 = vst [vmem:[%s4356_s7 + $0x60] sm:$0xff] %v1494_v26 }
 0x166   : > { %v1464_v19 = vadd.f32 %v2765_v44, %v6103_v24  ;;  %v2766_v46 = vld [vmem:[%s2855_s26 + $0x3f0] sm:$0xff]  ;;  %v1476_v0 = vadd.f32 %v1452_v35, %v1448_v4  ;;  %v1445_v45 = vadd.f32 %v2768_v8, %v6106_v28  ;;  %v1495_v44 = vadd.f32 %v1491_v25, %v1487_v12  ;;  %v6108_v27 = vld [vmem:[#allocation261_spill] sm:$0xff]  ;;  %v6109_v4 = vld [vmem:[#allocation262_spill] sm:$0xff] }
 0x167   : > { %v1468_v37 = vadd.f32 %v2766_v46, %v6104_v11  ;;  %v1480_v38 = vadd.f32 %v1460_v17, %v1456_v36  ;;  %v6107_v46 = vld [vmem:[#allocation260_spill] sm:$0xff]  ;;  %v1453_v58 = vadd.f32 %v2770_v60, %v6108_v27  ;;  %v2772_v36 = vld [vmem:[%s2855_s26 + $0x3b8] sm:$0xff] }
 0x168   : > { %v1488_v24 = vadd.f32 %v1476_v0, %v1472_v22  ;;  %v1449_v42 = vadd.f32 %v2769_v30, %v6107_v46  ;;  %v2773_v54 = vld [vmem:[%s2855_s26 + $0x3d8] sm:$0xff]  ;;  %v6111_v11 = vld [vmem:[#allocation264_spill] sm:$0xff]  ;;  %v1473_v22 = vadd.f32 %v1445_v45, %v1441_v31  ;;  %2556 = vst [vmem:[%s4356_s7 + $0x68] sm:$0xff] %v1495_v44  ;;  %v1902_v45 = vmul.f32 %v6085_v29, %v4414_v49 }
 0x169   : > { %v1484_v55 = vadd.f32 %v1468_v37, %v1464_v19  ;;  %v2771_v19 = vld [vmem:[%s2855_s26 + $0x398] sm:$0xff]  ;;  %v6110_v37 = vld [vmem:[#allocation263_spill] sm:$0xff]  ;;  %v1465_v8 = vadd.f32 %v2773_v54, %v6111_v11  ;;  %v1894_v54 = vmul.f32 %v6083_v34, %v4408_v59  ;;  %v1906_v31 = vmul.f32 %v6086_v21, %v4417_v18  ;;  %v6117_v44 = vld [vmem:[#allocation128_spill] sm:$0xff] }
 0x16a   : > { %v1457_v35 = vadd.f32 %v2771_v19, %v6109_v4  ;;  %v1461_v39 = vadd.f32 %v2772_v36, %v6110_v37  ;;  %v2774_v26 = vld [vmem:[%s2855_s26 + $0x3f8] sm:$0xff]  ;;  %v1477_v0 = vadd.f32 %v1453_v58, %v1449_v42  ;;  %v1898_v36 = vmul.f32 %v6084_v53, %v4411_v14  ;;  %v6119_v58 = vld [vmem:[#allocation124_spill] sm:$0xff] }
 0x16b   : > { %v1492_v17 = vadd.f32 %v1484_v55, %v1480_v38  ;;  %v6112_v12 = vld [vmem:[#allocation265_spill] sm:$0xff]  ;;  %v1886_v38 = vmul.f32 %v6081_v20, %v4401_v57  ;;  %v1890_v55 = vmul.f32 %v6082_v47, %v4404_v48  ;;  %v1910_v57 = vmul.f32 %v6087_v1, %v4420_v6 }
 0x16c   : > { %v1469_v25 = vadd.f32 %v2774_v26, %v6112_v12  ;;  %v1481_v46 = vadd.f32 %v1461_v39, %v1457_v35  ;;  %v1489_v19 = vadd.f32 %v1477_v0, %v1473_v22  ;;  %v1914_v48 = vmul.f32 %v6088_v13, %v4423_v15  ;;  %v6122_v35 = vld [vmem:[#allocation176_spill] sm:$0xff]  ;;  %v6124_v39 = vld [vmem:[#allocation177_spill] sm:$0xff] }
 0x16d   : > { %v1496_v30 = vadd.f32 %v1492_v17, %v1488_v24  ;;  %v1918_v47 = vadd.f32 %v1890_v55, %v1886_v38  ;;  %v1922_v24 = vadd.f32 %v1898_v36, %v1894_v54  ;;  %v1926_v59 = vadd.f32 %v1906_v31, %v1902_v45  ;;  %v6120_v17 = vld [vmem:[#allocation175_spill] sm:$0xff]  ;;  %v6126_v38 = vld [vmem:[#allocation258_spill] sm:$0xff]  ;;  %v6129_v31 = vld [vmem:[#allocation260_spill] sm:$0xff] }
 0x16e   : > { %v1485_v60 = vadd.f32 %v1469_v25, %v1465_v8  ;;  %v1887_v14 = vmul.f32 %v6089_v33, %v4451_v5  ;;  %v1891_v49 = vmul.f32 %v6090_v9, %v4454_v40  ;;  %v1895_v18 = vmul.f32 %v6091_v61, %v4457_v23  ;;  %v6128_v45 = vld [vmem:[#allocation195_spill] sm:$0xff] }
 0x16f   : > { %2557 = vst [vmem:[%s4356_s7 + $0x70] sm:$0xff] %v1496_v30  ;;  %v1930_v6 = vadd.f32 %v1914_v48, %v1910_v57  ;;  %v1934_v53 = vadd.f32 %v1922_v24, %v1918_v47  ;;  %v1899_v15 = vmul.f32 %v6092_v41, %v4460_v63  ;;  %v1903_v29 = vmul.f32 %v6093_v10, %v4463_v43  ;;  %v6113_v41 = vld [vmem:[#allocation127_spill] sm:$0xff]  ;;  %v6125_v30 = vld [vmem:[#allocation130_spill] sm:$0xff]  ;;  %v6131_v47 = vld [vmem:[#allocation197_spill] sm:$0xff] }
 0x170   : > { %v1493_v20 = vadd.f32 %v1485_v60, %v1481_v46  ;;  %v1907_v21 = vmul.f32 %v6094_v16, %v4466_v2  ;;  %v1911_v5 = vmul.f32 %v6095_v3, %v4469_v52  ;;  %v1915_v40 = vmul.f32 %v6096_v51, %v4472_v62  ;;  %v6114_v52 = vld [vmem:[#allocation172_spill] sm:$0xff]  ;;  %v6115_v16 = vld [vmem:[#allocation123_spill] sm:$0xff]  ;;  %v6116_v62 = vld [vmem:[#allocation173_spill] sm:$0xff] }
 0x171   : > { %v1938_v23 = vadd.f32 %v1930_v6, %v1926_v59  ;;  %v1919_v1 = vadd.f32 %v1891_v49, %v1887_v14  ;;  %v1923_v13 = vadd.f32 %v1899_v15, %v1895_v18  ;;  %v1888_v63 = vmul.f32 %v6097_v7, %v4506_v32  ;;  %v6118_v46 = vld [vmem:[#allocation174_spill] sm:$0xff]  ;;  %v6121_v7 = vld [vmem:[#allocation129_spill] sm:$0xff]  ;;  %v6133_v49 = vld [vmem:[#allocation199_spill] sm:$0xff] }
 0x172   : > { %v1497_v34 = vadd.f32 %v1493_v20, %v1489_v19  ;;  %v1927_v33 = vadd.f32 %v1907_v21, %v1903_v29  ;;  %v1931_v9 = vadd.f32 %v1915_v40, %v1911_v5  ;;  %v1892_v43 = vmul.f32 %v6098_v50, %v5942_v56  ;;  %v6123_v50 = vld [vmem:[#allocation125_spill] sm:$0xff]  ;;  %v6127_v60 = vld [vmem:[#allocation194_spill] sm:$0xff]  ;;  %v6130_v20 = vld [vmem:[#allocation196_spill] sm:$0xff] }
 0x173   : > { %v1942_v2 = vadd.f32 %v1938_v23, %v1934_v53  ;;  %v1935_v61 = vadd.f32 %v1923_v13, %v1919_v1  ;;  %v1896_v10 = vmul.f32 %v6114_v52, %v6113_v41  ;;  %v1900_v3 = vmul.f32 %v6116_v62, %v6115_v16  ;;  %v6132_v59 = vld [vmem:[#allocation198_spill] sm:$0xff] }
 0x174   : > { %2558 = vst [vmem:[%s4356_s7 + $0x78] sm:$0xff] %v1497_v34  ;;  %v1939_v51 = vadd.f32 %v1931_v9, %v1927_v33  ;;  %v1904_v42 = vmul.f32 %v6118_v46, %v6117_v44  ;;  %v1908_v32 = vmul.f32 %v6120_v17, %v6119_v58  ;;  %v1912_v56 = vmul.f32 %v6122_v35, %v6121_v7  ;;  %v6134_v34 = vld [vmem:[#allocation200_spill] sm:$0xff] }
 0x175   : > { %v1916_v8 = vmul.f32 %v6124_v39, %v6123_v50  ;;  %v1920_v26 = vadd.f32 %v1892_v43, %v1888_v63  ;;  %v1924_v25 = vadd.f32 %v1900_v3, %v1896_v10  ;;  %v1889_v55 = vmul.f32 %v6126_v38, %v6125_v30  ;;  %2563 = vst [vmem:[%s4480_s10 + $0x60] sm:$0xff] %v1942_v2 }
 0x176   : > { %v1943_v22 = vadd.f32 %v1939_v51, %v1935_v61  ;;  %v1928_v0 = vadd.f32 %v1908_v32, %v1904_v42  ;;  %v1893_v19 = vmul.f32 %v6106_v28, %v6127_v60  ;;  %v1897_v57 = vmul.f32 %v6129_v31, %v6128_v45 }
 0x177   : > { %v1932_v54 = vadd.f32 %v1916_v8, %v1912_v56  ;;  %v1936_v36 = vadd.f32 %v1924_v25, %v1920_v26  ;;  %v1901_v48 = vmul.f32 %v6108_v27, %v6130_v20  ;;  %v1905_v24 = vmul.f32 %v6109_v4, %v6131_v47 }
 0x178   : > { %v1909_v14 = vmul.f32 %v6110_v37, %v6132_v59  ;;  %v1913_v28 = vmul.f32 %v6111_v11, %v6133_v49  ;;  %v1917_v6 = vmul.f32 %v6112_v12, %v6134_v34  ;;  %v1921_v53 = vadd.f32 %v1893_v19, %v1889_v55  ;;  %2564 = vst [vmem:[%s4480_s10 + $0x68] sm:$0xff] %v1943_v22 }
 0x179   : > { %v1940_v18 = vadd.f32 %v1932_v54, %v1928_v0  ;;  %v1925_v15 = vadd.f32 %v1901_v48, %v1897_v57 }
 0x17a   : > { %v1929_v29 = vadd.f32 %v1909_v14, %v1905_v24  ;;  %v1933_v27 = vadd.f32 %v1917_v6, %v1913_v28 }
 0x17b   : > { %v1944_v21 = vadd.f32 %v1940_v18, %v1936_v36  ;;  %v1937_v5 = vadd.f32 %v1925_v15, %v1921_v53 }
 0x17c   : > { %v1941_v40 = vadd.f32 %v1933_v27, %v1929_v29 }
 0x17d   : > { %2565 = vst [vmem:[%s4480_s10 + $0x70] sm:$0xff] %v1944_v21 }
 0x17e   : > { %v1945_v4 = vadd.f32 %v1941_v40, %v1937_v5 }
 0x180   : > { %2566 = vst [vmem:[%s4480_s10 + $0x78] sm:$0xff] %v1945_v4 }
 0x181 PF: > { %s15_s17 = sadd.s32 1, %s2797_s17   ;;  %s6135_s15 = smov %s2793_s16 }
 0x182   : > { %p12_p5 = scmp.ge.s32.totalorder %s15_s17, 4   ;;  %s6136_s16 = smov %s6138_s18 }
 0x184   :  { %14 = sbr.rel (!%p12_p5) target bundleno = 2 (0x2), region = 101 }

</bundles_post_ra>
